<compile_context>
chip_gen: v5e
topology: v5e:2x2
jax: 0.10.0
libtpu: 0.0.40
codegen_flags: <defaults>
</compile_context>

<pallas_src>
import math

import jax
import jax.numpy as jnp
from jax import lax
from jax.experimental import pallas as pl
from jax.experimental.pallas import tpu as pltpu

LRELU_SLOPE = 0.1

_CompilerParams = getattr(pltpu, "CompilerParams", None) or getattr(pltpu, "TPUCompilerParams")


# ----------------------------------------------------------------------------- Pallas conv

def _round_up(v, m):
    return (v + m - 1) // m * m


def _vmem_config():
    cap = None
    try:
        cap = int(pltpu.get_tpu_info().vmem_capacity_bytes)
    except Exception:
        cap = None
    if not cap or cap <= 0:
        kind = ""
        try:
            kind = jax.devices()[0].device_kind.lower()
        except Exception:
            pass
        cap = (64 << 20) if "v7" in kind else (128 << 20)
    cap = min(max(cap, 32 << 20), 128 << 20)
    limit = max(cap - 12 * (1 << 20), 24 << 20)        # one margin, no extra hedging factor
    return limit, limit - (2 << 20)


_VMEM_LIMIT, _VMEM_BUDGET = _vmem_config()


def _pick_tile_h(H, Wp, K, coutp, kh, out_bytes, has_res):
    """Largest row-band height (divisor of H) whose per-step working set fits VMEM."""
    def need(th):
        return (2 * (th + kh - 1) * Wp * K * 2         # double-buffered bf16 input band
                + 2 * th * Wp * coutp * out_bytes      # double-buffered output block
                + (2 * th * Wp * coutp * 2 if has_res else 0)
                + 2 * kh * K * coutp * 2               # weights
                + 2 * th * Wp * coutp * 4              # f32 accumulator + live dot result
                + 2 * th * Wp * K * 2                  # matmul operand staging slack
                + (2 << 20))                           # misc compiler scratch
    fitting = [d for d in range(1, H + 1) if H % d == 0 and need(d) <= _VMEM_BUDGET]
    if not fitting:
        return 1                                       # degenerate fallback (tiny budget)
    total_m = H * Wp
    target = 4 if total_m >= 4096 else (2 if total_m >= 2048 else 1)
    for mb in (target, 2, 1):
        cands = [d for d in fitting if H // d >= mb]
        if cands:
            if mb > 1:                                  # prefer an even band count (2 TCs)
                even = [d for d in cands if (H // d) % 2 == 0]
                if even:
                    return max(even)
            return max(cands)
    return max(fitting)


def _make_conv_kernel(kh, Wp, tm, act, out_dtype, has_residual):
    def kernel(*refs):
        if has_residual:
            x_ref, w_ref, b_ref, r_ref, o_ref = refs
        else:
            x_ref, w_ref, b_ref, o_ref = refs
        # kh matmuls; each operand is a single aligned, contiguous, lane-dense slab load
        # (kw taps are folded into K by the wrapper-side im2col).
        acc = jnp.dot(x_ref[pl.ds(0, tm), :], w_ref[0],
                      preferred_element_type=jnp.float32)
        for i in range(1, kh):
            acc = acc + jnp.dot(x_ref[pl.ds(i * Wp, tm), :], w_ref[i],
                                preferred_element_type=jnp.float32)
        acc = acc + b_ref[...]
        if act == "relu":
            acc = jnp.maximum(acc, 0.0)
        elif act == "lrelu":
            acc = jnp.where(acc >= 0.0, acc, LRELU_SLOPE * acc)
        if has_residual:
            acc = acc + r_ref[...].astype(jnp.float32)   # fused skip-add, in f32
        o_ref[...] = acc.astype(out_dtype)
    return kernel


def _conv_xla(x, w, b, act):
    o = lax.conv_general_dilated(
        x.astype(jnp.float32), w.astype(jnp.float32), (1, 1), "SAME",
        dimension_numbers=("NHWC", "HWIO", "NHWC")) + b.astype(jnp.float32)
    if act == "relu":
        o = jnp.maximum(o, 0.0)
    elif act == "lrelu":
        o = jnp.where(o >= 0.0, o, LRELU_SLOPE * o)
    return o


def conv2d(x, w, b, act=None, residual=None, out_dtype=jnp.bfloat16):
    """Stride-1 'same' conv.  x: (B,H,W,Cin), w: (kh,kw,Cin,Cout), b: (Cout,).
    `residual` (B,H,W,Cout), if given, is added in f32 after the activation."""
    B, H, W, Cin = x.shape
    kh, kw, _, Cout = w.shape

    # Degenerate-Cout layers (1/16-dense masked stores, ~3% MXU N-fill) and the tiny
    # coarse SpyNet pyramid levels (grid-step / launch-overhead bound) go to XLA.
    if Cout < 8 or H * W <= 256:
        o = _conv_xla(x, w, b, act)
        if residual is not None:
            o = o + residual.astype(jnp.float32)
        return o

    ph, pw = kh // 2, kw // 2
    cinp = _round_up(Cin, 8)
    coutp = _round_up(Cout, 8)
    Wp = _round_up(W, 16)                          # bf16 native sublane tile is (16, 128)
    Hp = H + kh - 1
    K = kw * cinp

    # --- wrapper-side W-direction im2col: cols[b, r, w, j*cinp + c] = xpad[b, r, w+j, c]
    xb = x.astype(jnp.bfloat16)
    xp = jnp.pad(xb, ((0, 0), (ph, ph), (pw, pw), (0, cinp - Cin)))
    cols = jnp.concatenate([xp[:, :, j:j + W, :] for j in range(kw)], axis=-1)
    if Wp > W:
        cols = jnp.pad(cols, ((0, 0), (0, 0), (0, Wp - W), (0, 0)))
    # cols: (B, Hp, Wp, K); conv tap i of output row y reads slab row y + i.

    out_bytes = jnp.dtype(out_dtype).itemsize
    th = _pick_tile_h(H, Wp, K, coutp, kh, out_bytes, residual is not None)
    nt = H // th
    tm = th * Wp
    R = (th + kh - 1) * Wp                         # rows per halo'd band

    if nt == 1:
        banded = cols.reshape(B, 1, R, K)
    else:
        ridx = (jnp.arange(nt)[:, None] * th
                + jnp.arange(th + kh - 1)[None, :]).reshape(-1)
        banded = jnp.take(cols, ridx, axis=1).reshape(B, nt, R, K)

    wp = jnp.pad(w.astype(jnp.float32),
                 ((0, 0), (0, 0), (0, cinp - Cin), (0, coutp - Cout)))
    wr = wp.reshape(kh, K, coutp).astype(jnp.bfloat16)
    bp = jnp.pad(b.astype(jnp.float32), (0, coutp - Cout)).reshape(1, coutp)

    in_specs = [
        pl.BlockSpec((None, None, R, K), lambda bi, ti: (bi, ti, 0, 0)),
        pl.BlockSpec((kh, K, coutp), lambda bi, ti: (0, 0, 0)),
        pl.BlockSpec((1, coutp), lambda bi, ti: (0, 0)),
    ]
    operands = [banded, wr, bp]
    if residual is not None:
        rp = jnp.pad(residual.astype(jnp.bfloat16),
                     ((0, 0), (0, 0), (0, Wp - W), (0, coutp - Cout)))
        operands.append(rp.reshape(B, nt, tm, coutp))
        in_specs.append(pl.BlockSpec((None, None, tm, coutp),
                                     lambda bi, ti: (bi, ti, 0, 0)))

    kernel = _make_conv_kernel(kh, Wp, tm, act, out_dtype, residual is not None)
    out = pl.pallas_call(
        kernel,
        out_shape=jax.ShapeDtypeStruct((B, nt, tm, coutp), out_dtype),
        grid=(B, nt),
        in_specs=in_specs,
        out_specs=pl.BlockSpec((None, None, tm, coutp),
                               lambda bi, ti: (bi, ti, 0, 0)),
        compiler_params=_CompilerParams(
            dimension_semantics=("parallel", "parallel"),
            vmem_limit_bytes=_VMEM_LIMIT),
    )(*operands)
    return out.reshape(B, H, Wp, coutp)[:, :, :W, :Cout]


# ------------------------------------------------------------------------ JAX glue ops

def _source_index(out_size, in_size, align_corners):
    d = jnp.arange(out_size, dtype=jnp.float32)
    if align_corners:
        if out_size == 1:
            src = jnp.zeros((out_size,), jnp.float32)
        else:
            src = d * ((in_size - 1) / (out_size - 1))
    else:
        scale = in_size / out_size
        src = jnp.maximum((d + 0.5) * scale - 0.5, 0.0)
    i0 = jnp.clip(jnp.floor(src).astype(jnp.int32), 0, in_size - 1)
    i1 = jnp.minimum(i0 + 1, in_size - 1)
    frac = src - i0.astype(jnp.float32)
    return i0, i1, frac


def resize_bilinear(x, out_h, out_w, align_corners):
    """Matches F.interpolate(mode='bilinear') for the given align_corners convention."""
    B, H, W, C = x.shape
    if (out_h, out_w) == (H, W):
        return x
    y0, y1, fy = _source_index(out_h, H, align_corners)
    x0, x1, fx = _source_index(out_w, W, align_corners)
    top, bot = x[:, y0], x[:, y1]
    fy = fy[None, :, None, None]
    rows = top * (1.0 - fy) + bot * fy
    left, right = rows[:, :, x0], rows[:, :, x1]
    fx = fx[None, None, :, None]
    return left * (1.0 - fx) + right * fx


def avg_pool_2x2(x):
    B, H, W, C = x.shape
    return x.reshape(B, H // 2, 2, W // 2, 2, C).mean(axis=(2, 4))


def flow_warp(x, flow, padding_mode="zeros"):
    """basicsr.flow_warp: bilinear grid_sample, align_corners=True.  flow[...,0]=dx, [...,1]=dy."""
    B, H, W, C = x.shape
    x = x.astype(jnp.float32)
    flow = flow.astype(jnp.float32)
    dt = jnp.float32
    ix = jnp.arange(W, dtype=dt)[None, None, :] + flow[..., 0]
    iy = jnp.arange(H, dtype=dt)[None, :, None] + flow[..., 1]
    if padding_mode == "border":
        ix = jnp.clip(ix, 0.0, W - 1)
        iy = jnp.clip(iy, 0.0, H - 1)
    x0 = jnp.floor(ix); x1 = x0 + 1.0
    y0 = jnp.floor(iy); y1 = y0 + 1.0
    wx1 = ix - x0; wx0 = 1.0 - wx1
    wy1 = iy - y0; wy0 = 1.0 - wy1
    bidx = jnp.arange(B)[:, None, None]

    def sample(yc, xc):
        yi = jnp.clip(yc, 0.0, H - 1).astype(jnp.int32)
        xi = jnp.clip(xc, 0.0, W - 1).astype(jnp.int32)
        v = x[bidx, yi, xi]
        if padding_mode == "zeros":
            m = ((xc >= 0) & (xc <= W - 1) & (yc >= 0) & (yc <= H - 1)).astype(dt)
            v = v * m[..., None]
        return v

    return (sample(y0, x0) * (wy0 * wx0)[..., None] +
            sample(y0, x1) * (wy0 * wx1)[..., None] +
            sample(y1, x0) * (wy1 * wx0)[..., None] +
            sample(y1, x1) * (wy1 * wx1)[..., None])


def pixel_shuffle_nhwc(x, r=2):
    B, H, W, C4 = x.shape
    C = C4 // (r * r)
    x = x.reshape(B, H, W, C, r, r)
    x = jnp.transpose(x, (0, 1, 4, 2, 5, 3))
    return x.reshape(B, H * r, W * r, C)


# ----------------------------------------------------------------------------- SpyNet

SPY_MEAN = jnp.array([0.485, 0.456, 0.406], jnp.float32)
SPY_STD = jnp.array([0.229, 0.224, 0.225], jnp.float32)


def spynet_basic_module(layers, x):
    acts = ["relu", "relu", "relu", "relu", None]
    for p, a in zip(layers, acts):
        x = conv2d(x, p["w"], p["b"], act=a)
    return x


def spynet_process(sp_params, ref, supp):
    ref = (ref - SPY_MEAN) / SPY_STD
    supp = (supp - SPY_MEAN) / SPY_STD
    refs, supps = [ref], [supp]
    for _ in range(5):
        refs.insert(0, avg_pool_2x2(refs[0]))
        supps.insert(0, avg_pool_2x2(supps[0]))
    b, h0, w0, _ = refs[0].shape
    flow = jnp.zeros((b, h0 // 2, w0 // 2, 2), jnp.float32)
    for level in range(len(refs)):
        up = resize_bilinear(flow, flow.shape[1] * 2, flow.shape[2] * 2,
                             align_corners=True) * 2.0
        if up.shape[1] != refs[level].shape[1]:
            up = jnp.pad(up, ((0, 0), (0, 1), (0, 0), (0, 0)), mode="edge")
        if up.shape[2] != refs[level].shape[2]:
            up = jnp.pad(up, ((0, 0), (0, 0), (0, 1), (0, 0)), mode="edge")
        warped = flow_warp(supps[level], up, padding_mode="border")
        inp = jnp.concatenate([refs[level], warped, up], axis=-1)
        flow = spynet_basic_module(sp_params[level], inp).astype(jnp.float32) + up
    return flow


def spynet_forward(sp_params, ref, supp):
    b, h, w, _ = ref.shape
    w_floor = int(math.ceil(w / 32.0) * 32)
    h_floor = int(math.ceil(h / 32.0) * 32)
    ref_r = resize_bilinear(ref, h_floor, w_floor, align_corners=False)
    supp_r = resize_bilinear(supp, h_floor, w_floor, align_corners=False)
    flow = spynet_process(sp_params, ref_r, supp_r)
    flow = resize_bilinear(flow, h, w, align_corners=False)
    flow = flow * jnp.array([float(w) / w_floor, float(h) / h_floor], jnp.float32)
    return flow


# --------------------------------------------------------------------------- parameters

def _conv_init(key, kh, kw, cin, cout, wscale=1.0):
    kw_, kb = jax.random.split(key)
    std = wscale / math.sqrt(kh * kw * cin)
    return {"w": jax.random.normal(kw_, (kh, kw, cin, cout), jnp.float32) * std,
            "b": jax.random.normal(kb, (cout,), jnp.float32) * 0.01}


def init_params(key, num_in_ch=3, num_out_ch=3, num_feat=64, num_frame=5,
                num_reconstruct_block=10):
    keys = iter(jax.random.split(key, 64))
    bm_io = [(8, 32), (32, 64), (64, 32), (32, 16), (16, 2)]
    spynet = []
    for _ in range(6):
        layers = []
        for li, (ci, co) in enumerate(bm_io):
            layers.append(_conv_init(next(keys), 7, 7, ci, co,
                                     0.1 if li == len(bm_io) - 1 else 1.0))
        spynet.append(layers)
    params = {
        "spynet": spynet,
        "conv_first": _conv_init(next(keys), 3, 3, num_in_ch * num_frame, num_feat),
        "upconv1": _conv_init(next(keys), 3, 3, num_feat, num_feat * 4),
        "upconv2": _conv_init(next(keys), 3, 3, num_feat, 64 * 4),
        "conv_hr": _conv_init(next(keys), 3, 3, 64, 64),
        "conv_last": _conv_init(next(keys), 3, 3, 64, num_out_ch),
    }
    w1, b1, w2, b2 = [], [], [], []
    for _ in range(num_reconstruct_block):           # ResidualBlockNoBN, 0.1-scaled init
        p1 = _conv_init(next(keys), 3, 3, num_feat, num_feat, 0.1)
        p2 = _conv_init(next(keys), 3, 3, num_feat, num_feat, 0.1)
        w1.append(p1["w"]); b1.append(p1["b"]); w2.append(p2["w"]); b2.append(p2["b"])
    params["recon"] = {"w1": jnp.stack(w1), "b1": jnp.stack(b1),
                       "w2": jnp.stack(w2), "b2": jnp.stack(b2)}
    return params


# ------------------------------------------------------------------------------ forward

@jax.jit
def flow_img_vsr_forward(params, x):
    """x: (B, T, C, H, W) float32 (PyTorch layout).  Returns (B, 3, 4H, 4W)."""
    b, t, c, h, w = x.shape
    assert h % 4 == 0 and w % 4 == 0
    center = t // 2
    xh = jnp.transpose(x, (0, 1, 3, 4, 2)).astype(jnp.float32)       # (B,T,H,W,C)
    x_center = xh[:, center]

    # SpyNet + warp, batched over the T frames (each frame is independent).
    ref = jnp.broadcast_to(x_center[:, None], (b, t, h, w, c)).reshape(b * t, h, w, c)
    supp = xh.reshape(b * t, h, w, c)
    flow = spynet_forward(params["spynet"], ref, supp)               # (B*T,H,W,2)
    aligned = flow_warp(supp, flow, padding_mode="zeros")
    aligned = aligned.reshape(b, t, h, w, c)
    aligned = jnp.transpose(aligned, (0, 2, 3, 1, 4)).reshape(b, h, w, t * c)

    feat = conv2d(aligned, params["conv_first"]["w"], params["conv_first"]["b"])

    def recon_body(f, blk):                                          # ResidualBlockNoBN
        r = conv2d(f, blk["w1"], blk["b1"], act="relu")
        f_new = conv2d(r, blk["w2"], blk["b2"], residual=f)          # fused f32 skip-add
        return f_new, None
    out, _ = lax.scan(recon_body, feat, params["recon"])

    # lrelu(pixel_shuffle(conv)) == pixel_shuffle(lrelu(conv)) -> fuse lrelu into kernel.
    out = pixel_shuffle_nhwc(conv2d(out, params["upconv1"]["w"],
                                    params["upconv1"]["b"], act="lrelu"), 2)
    out = pixel_shuffle_nhwc(conv2d(out, params["upconv2"]["w"],
                                    params["upconv2"]["b"], act="lrelu"), 2)
    out = conv2d(out, params["conv_hr"]["w"], params["conv_hr"]["b"], act="lrelu")
    out = conv2d(out, params["conv_last"]["w"], params["conv_last"]["b"])   # Cout=3 -> XLA

    base = resize_bilinear(x_center, 4 * h, 4 * w, align_corners=False)
    out = out.astype(jnp.float32) + base
    return jnp.transpose(out, (0, 3, 1, 2))


if __name__ == "__main__":
    key = jax.random.PRNGKey(0)
    kp, kx, k1, k2 = jax.random.split(key, 4)

    # --- self-check of the Pallas conv (incl. fused residual, multi-band) vs lax.conv ---
    def check(bt, ht, wdt, ci, co, kk, act_t, with_res, ks):
        kk0, kk1, kk2, kk3 = jax.random.split(ks, 4)
        xt = jax.random.uniform(kk0, (bt, ht, wdt, ci), jnp.float32)
        wt = jax.random.normal(kk1, (kk, kk, ci, co), jnp.float32) / math.sqrt(kk * kk * ci)
        bt_ = jax.random.normal(kk2, (co,), jnp.float32) * 0.1
        rt = jax.random.uniform(kk3, (bt, ht, wdt, co), jnp.float32) if with_res else None
        got = conv2d(xt, wt, bt_, act=act_t, residual=rt).astype(jnp.float32)
        want = _conv_xla(xt, wt, bt_, act_t)
        if with_res:
            want = want + rt
        err = float(jnp.max(jnp.abs(got - want)))
        assert err < 5e-2, f"conv2d mismatch: max abs err = {err}"

    check(2, 64, 56, 15, 32, 3, "lrelu", True, k1)    # 3x3, odd Cin, 4 bands, fused skip
    check(1, 32, 20, 10, 16, 7, "relu", False, k2)    # 7x7 SpyNet-style layer, single band

    # Small but structurally faithful configuration: T=3 frames, 5 residual blocks.
    params = init_params(kp, num_in_ch=3, num_out_ch=3, num_feat=64, num_frame=3,
                         num_reconstruct_block=5)
    # B=1, T=3, C=3, H=W=64 (smallest size SpyNet's 5-level pyramid supports cleanly).
    x = jax.random.uniform(kx, (1, 3, 3, 64, 64), jnp.float32)
    out = jax.block_until_ready(flow_img_vsr_forward(params, x))
    assert out.shape == (1, 3, 256, 256), out.shape
    assert bool(jnp.all(jnp.isfinite(out)))
    print("KERNEL_OK")
</pallas_src>

<mosaic_0001>
module attributes {stable_mosaic.version = 11 : i64} {
  func.func @kernel(%arg0: i32, %arg1: i32, %arg2: memref<1x1x1152x48xbf16, #tpu.memory_space<vmem>>, %arg3: memref<3x48x32xbf16, #tpu.memory_space<vmem>>, %arg4: memref<1x32xf32, #tpu.memory_space<vmem>>, %arg5: memref<1x1x1024x32xbf16, #tpu.memory_space<vmem>>, %arg6: memref<1x1x1024x32xbf16, #tpu.memory_space<vmem>>) attributes {dimension_semantics = [#tpu.dimension_semantics<parallel>, #tpu.dimension_semantics<parallel>], iteration_bounds = array<i64: 2, 4>, scalar_prefetch = 0 : i64, scratch_operands = 0 : i64, tpu.core_type = #tpu.core_type<tc>, window_params = [{transform_indices = @transform_0, window_bounds = array<i64: 1, 1, 1152, 48>}, {pipeline_mode = #tpu.pipeline_mode<synchronous>, transform_indices = @transform_1, window_bounds = array<i64: 3, 48, 32>}, {pipeline_mode = #tpu.pipeline_mode<synchronous>, transform_indices = @transform_2, window_bounds = array<i64: 1, 32>}, {transform_indices = @transform_3, window_bounds = array<i64: 1, 1, 1024, 32>}, {transform_indices = @transform_4, window_bounds = array<i64: 1, 1, 1024, 32>}]} {
    %c0 = arith.constant 0 : index
    %c0_0 = arith.constant 0 : index
    %c0_1 = arith.constant 0 : index
    %c0_2 = arith.constant 0 : index
    %0 = vector.load %arg2[%c0, %c0_0, %c0_1, %c0_2] : memref<1x1x1152x48xbf16, #tpu.memory_space<vmem>>, vector<1x1x1024x48xbf16>
    %1 = vector.shape_cast %0 : vector<1x1x1024x48xbf16> to vector<1024x48xbf16>
    %c0_3 = arith.constant 0 : index
    %c0_4 = arith.constant 0 : index
    %c0_5 = arith.constant 0 : index
    %2 = vector.load %arg3[%c0_3, %c0_4, %c0_5] : memref<3x48x32xbf16, #tpu.memory_space<vmem>>, vector<1x48x32xbf16>
    %3 = vector.shape_cast %2 : vector<1x48x32xbf16> to vector<48x32xbf16>
    %cst = arith.constant dense<0.000000e+00> : vector<1024x32xf32>
    %4 = tpu.matmul %1, %3, %cst {dimension_numbers = #tpu.dot_dimension_numbers<[1], [0], [0], [1], [0, 0, 1, 1], [], []>} : vector<1024x48xbf16>, vector<48x32xbf16>, vector<1024x32xf32> -> vector<1024x32xf32>
    %c0_6 = arith.constant 0 : index
    %c0_7 = arith.constant 0 : index
    %c64 = arith.constant 64 : index
    %c0_8 = arith.constant 0 : index
    %5 = vector.load %arg2[%c0_6, %c0_7, %c64, %c0_8] : memref<1x1x1152x48xbf16, #tpu.memory_space<vmem>>, vector<1x1x1024x48xbf16>
    %6 = vector.shape_cast %5 : vector<1x1x1024x48xbf16> to vector<1024x48xbf16>
    %c1 = arith.constant 1 : index
    %c0_9 = arith.constant 0 : index
    %c0_10 = arith.constant 0 : index
    %7 = vector.load %arg3[%c1, %c0_9, %c0_10] : memref<3x48x32xbf16, #tpu.memory_space<vmem>>, vector<1x48x32xbf16>
    %8 = vector.shape_cast %7 : vector<1x48x32xbf16> to vector<48x32xbf16>
    %cst_11 = arith.constant dense<0.000000e+00> : vector<1024x32xf32>
    %9 = tpu.matmul %6, %8, %cst_11 {dimension_numbers = #tpu.dot_dimension_numbers<[1], [0], [0], [1], [0, 0, 1, 1], [], []>} : vector<1024x48xbf16>, vector<48x32xbf16>, vector<1024x32xf32> -> vector<1024x32xf32>
    %10 = arith.addf %4, %9 : vector<1024x32xf32>
    %c0_12 = arith.constant 0 : index
    %c0_13 = arith.constant 0 : index
    %c128 = arith.constant 128 : index
    %c0_14 = arith.constant 0 : index
    %11 = vector.load %arg2[%c0_12, %c0_13, %c128, %c0_14] : memref<1x1x1152x48xbf16, #tpu.memory_space<vmem>>, vector<1x1x1024x48xbf16>
    %12 = vector.shape_cast %11 : vector<1x1x1024x48xbf16> to vector<1024x48xbf16>
    %c2 = arith.constant 2 : index
    %c0_15 = arith.constant 0 : index
    %c0_16 = arith.constant 0 : index
    %13 = vector.load %arg3[%c2, %c0_15, %c0_16] : memref<3x48x32xbf16, #tpu.memory_space<vmem>>, vector<1x48x32xbf16>
    %14 = vector.shape_cast %13 : vector<1x48x32xbf16> to vector<48x32xbf16>
    %cst_17 = arith.constant dense<0.000000e+00> : vector<1024x32xf32>
    %15 = tpu.matmul %12, %14, %cst_17 {dimension_numbers = #tpu.dot_dimension_numbers<[1], [0], [0], [1], [0, 0, 1, 1], [], []>} : vector<1024x48xbf16>, vector<48x32xbf16>, vector<1024x32xf32> -> vector<1024x32xf32>
    %16 = arith.addf %10, %15 : vector<1024x32xf32>
    %c0_18 = arith.constant 0 : index
    %c0_19 = arith.constant 0 : index
    %17 = vector.load %arg4[%c0_18, %c0_19] : memref<1x32xf32, #tpu.memory_space<vmem>>, vector<1x32xf32>
    %18 = vector.broadcast %17 : vector<1x32xf32> to vector<1024x32xf32>
    %19 = arith.addf %16, %18 : vector<1024x32xf32>
    %cst_20 = arith.constant 0.000000e+00 : f32
    %20 = vector.broadcast %cst_20 : f32 to vector<1024x32xf32>
    %21 = arith.cmpf oge, %19, %20 : vector<1024x32xf32>
    %cst_21 = arith.constant 1.000000e-01 : f32
    %22 = vector.broadcast %cst_21 : f32 to vector<1024x32xf32>
    %23 = arith.mulf %22, %19 : vector<1024x32xf32>
    %24 = arith.select %21, %19, %23 : vector<1024x32xi1>, vector<1024x32xf32>
    %c0_22 = arith.constant 0 : index
    %c0_23 = arith.constant 0 : index
    %c0_24 = arith.constant 0 : index
    %c0_25 = arith.constant 0 : index
    %25 = vector.load %arg5[%c0_22, %c0_23, %c0_24, %c0_25] : memref<1x1x1024x32xbf16, #tpu.memory_space<vmem>>, vector<1x1x1024x32xbf16>
    %26 = vector.shape_cast %25 : vector<1x1x1024x32xbf16> to vector<1024x32xbf16>
    %27 = arith.extf %26 : vector<1024x32xbf16> to vector<1024x32xf32>
    %28 = arith.addf %24, %27 : vector<1024x32xf32>
    %29 = arith.truncf %28 : vector<1024x32xf32> to vector<1024x32xbf16>
    %c0_26 = arith.constant 0 : index
    %c0_27 = arith.constant 0 : index
    %c0_28 = arith.constant 0 : index
    %c0_29 = arith.constant 0 : index
    %30 = vector.load %arg6[%c0_26, %c0_27, %c0_28, %c0_29] : memref<1x1x1024x32xbf16, #tpu.memory_space<vmem>>, vector<1x1x1024x32xbf16>
    %31 = vector.shape_cast %30 : vector<1x1x1024x32xbf16> to vector<1024x32xbf16>
    %32 = vector.shape_cast %29 : vector<1024x32xbf16> to vector<1x1x1024x32xbf16>
    tpu.vector_store %arg6[%c0_26, %c0_27, %c0_28, %c0_29], %32 {strides = array<i32>} : memref<1x1x1024x32xbf16, #tpu.memory_space<vmem>>, vector<1x1x1024x32xbf16>,
    return
  }
  func.func @transform_0(%arg0: i32, %arg1: i32) -> (i32, i32, i32, i32) {
    %c0_i32 = arith.constant 0 : i32
    %c0_i32_0 = arith.constant 0 : i32
    %c0_i32_1 = arith.constant 0 : i32
    return %arg0, %arg1, %c0_i32, %c0_i32_0 : i32, i32, i32, i32
  }
  func.func @transform_1(%arg0: i32, %arg1: i32) -> (i32, i32, i32) {
    %c0_i32 = arith.constant 0 : i32
    %c0_i32_0 = arith.constant 0 : i32
    %c0_i32_1 = arith.constant 0 : i32
    %c0_i32_2 = arith.constant 0 : i32
    return %c0_i32, %c0_i32_0, %c0_i32_1 : i32, i32, i32
  }
  func.func @transform_2(%arg0: i32, %arg1: i32) -> (i32, i32) {
    %c0_i32 = arith.constant 0 : i32
    %c0_i32_0 = arith.constant 0 : i32
    %c0_i32_1 = arith.constant 0 : i32
    return %c0_i32, %c0_i32_0 : i32, i32
  }
  func.func @transform_3(%arg0: i32, %arg1: i32) -> (i32, i32, i32, i32) {
    %c0_i32 = arith.constant 0 : i32
    %c0_i32_0 = arith.constant 0 : i32
    %c0_i32_1 = arith.constant 0 : i32
    return %arg0, %arg1, %c0_i32, %c0_i32_0 : i32, i32, i32, i32
  }
  func.func @transform_4(%arg0: i32, %arg1: i32) -> (i32, i32, i32, i32) {
    %c0_i32 = arith.constant 0 : i32
    %c0_i32_0 = arith.constant 0 : i32
    %c0_i32_1 = arith.constant 0 : i32
    return %arg0, %arg1, %c0_i32, %c0_i32_0 : i32, i32, i32, i32
  }
}

</mosaic_0001>

<bundles_post_ra>
// kernel: tpu_custom_call.1
= control target key start
LH: loop header
LB: loop body
LE: loop exit
PB: predicated region body
PF: predicated region fallthrough
CT: control target
= control target key end

     0   :  { %s5429_s15 = smov 0   ;;  %s5431_s16 = smov 0   ;;  %s6686_s0 = inlined_call_operand.vmem [shape: bf16[2,4,1152,48], index: 0, kind: input, shape index: {}]   ;;  %s6687_s1 = inlined_call_operand.vmem [shape: bf16[3,48,32], index: 1, kind: input, shape index: {}]   ;;  %s6688_s2 = inlined_call_operand.vmem [shape: f32[1,32], index: 2, kind: input, shape index: {}]   ;;  %s6689_s3 = inlined_call_operand.vmem [shape: bf16[2,4,1024,32], index: 3, kind: input, shape index: {}]   ;;  %s6690_s4 = inlined_call_operand.vmem [shape: bf16[2,4,1024,32], index: 4, kind: output, shape index: {}]  }
   0x1   :  { %s5433_s17 = smov 0   ;;  %s5435_s18 = smov 0  }
   0x2   :  { %s5437_s19 = smov 0  }
   0x3 LB: > { %s23_s20 = sadd.s32 1, %s5394_s17  ;;  %s26_s21 = sadd.s32 1, %s5398_s18  ;;  %s5402_s19 = sphi %s5437_s19, %s14_s19   ;;  %s5398_s18 = sphi %s5435_s18, %s6752_s18   ;;  %s5394_s17 = sphi %s5433_s17, %s6751_s17   ;;  %s5390_s16 = sphi %s5431_s16, %s6750_s16   ;;  %s5386_s15 = sphi %s5429_s15, %s6749_s15  }
   0x4   : > { %p24_p0 = scmp.ge.s32.totalorder %s23_s20, 4  ;;  %p4056_p1 = scmp.ge.s32.totalorder %s5402_s19, 1 }
   0x5   : > { %p198_p2 = scmp.lt.s32.totalorder %s5402_s19, 9 }
   0x6   : > { %s6754_s20 = smov (%p24_p0, %s23_s20), 0  ;;  %s6756_s21 = smov (!%p24_p0, %s26_s21), %s5398_s18 }
   0x7   : > { %p199_p3 = pnand %p4056_p1, %p198_p2  ;;  %p28_p4 = scmp.ge.s32.totalorder %s6756_s21, 2 }
   0x9   : > { %s6758_s21 = smov (%p28_p4, %s6756_s21), 0  ;;  %202 = sbr.rel (%p199_p3) target bundleno = 932 (0x3a4), region = 36 }
   0xe   : > { %v4907_v0 = vld [vmem:[%s6687_s1 + $0x28] sm:$0xff]  ;;  %v4900_v1 = vld [vmem:[%s6687_s1 + $0x10] sm:$0xff]  ;;  %v4974_v2 = vld [vmem:[%s6687_s1 + $0x40] sm:$0xff]  ;;  %p241_p5 = scmp.lt.s32.totalorder %s5390_s16, 1  ;;  %p243_p6 = scmp.lt.s32.totalorder %s5386_s15, 3  ;;  %vm756_vm0 = vcmask 392192  }
   0xf   : > { %954 = vmatpush.bf16.msra.mxu0 %v4907_v0  ;;  %5294 = vmatpush.bf16.msra.mxu3 %v4907_v0  ;;  %v4906_v3 = vld [vmem:[%s6687_s1 + $0x20] sm:$0xff]  ;;  %v4899_v4 = vld [vmem:[%s6687_s1 + $0x8] sm:$0xff]  ;;  %v4973_v5 = vld [vmem:[%s6687_s1 + $0x38] sm:$0xff]  ;;  %vm3807_vm2 = vcmask 257024  }
  0x10   : > { %s6760_s16 = smov (!%p241_p5, %s5390_s16), 1  ;;  %1333 = vmatpush.bf16.msra.mxu1 %v4900_v1  ;;  %2327 = vmatpush.bf16.msra.mxu2 %v4974_v2  ;;  %s6762_s15 = smov (!%p243_p6, %s5386_s15), 3  ;;  %v4905_v6 = vld [vmem:[%s6687_s1 + $0x18] sm:$0xff]  ;;  %v4898_v7 = vld [vmem:[%s6687_s1] sm:$0xff]  ;;  %v4972_v8 = vld [vmem:[%s6687_s1 + $0x30] sm:$0xff] }
  0x11   : > { %s5304_s8 = smul.u32 576, %s6760_s16  ;;  %s4058_s28 = sshll.u32 %s6762_s15, 7  ;;  %v5594_v44 = vld [vmem:[%s6688_s2] ss:$0 sm:$0xff] }
  0x12   : > { %s5303_s9 = smul.u32 144, %s6762_s15  ;;  %s4059_s29 = sshll.u32 %s6760_s16, 9 }
  0x13   : > { %955 = vmatpush.bf16.msra.mxu0 %v4906_v3  ;;  %5295 = vmatpush.bf16.msra.mxu3 %v4906_v3  ;;  %s5510_s30 = sadd.s32 %s4059_s29, %s4058_s28 }
  0x14   : > { %1334 = vmatpush.bf16.msra.mxu1 %v4899_v4  ;;  %2328 = vmatpush.bf16.msra.mxu2 %v4973_v5  ;;  %s247_s23 = sadd.s32 %s5304_s8, %s5303_s9  ;;  %s4060_s15 = sshll.u32 %s5510_s30, 2 }
  0x15   : > { %s4057_s24 = sshll.u32 %s247_s23, 2  ;;  %s5587_s6 = scalar_lea.vmem %s6689_s3, %s4060_s15 }
  0x16   : > { %s5495_s27 = scalar_lea.vmem %s6686_s0, %s4057_s24  ;;  %v4976_v47 = vld [vmem:[%s5587_s6] sm:$0xff]   ;;  %s5607_s11 = scalar_lea.vmem %s6690_s4, %s4060_s15 }
  0x17   : > { %956 = vmatpush.bf16.msra.mxu0 %v4905_v6  ;;  %5296 = vmatpush.bf16.msra.mxu3 %v4905_v6  ;;  %v4838_v9 = vld [vmem:[%s5495_s27 + $0x20] sm:$0xff]  ;;  %v4839_v13 = vld [vmem:[%s5495_s27 + $0x28] sm:$0xff]  ;;  %v4840_v17 = vld [vmem:[%s5495_s27 + $0x30] sm:$0xff]  ;;  %v4977_v51 = vunpack.c.l.bf16 %v4976_v47 }
  0x18   : > { %v5499_v10 = vld [vmem:[%s5495_s27 + $0x1a0] sm:$0xff]  ;;  %1335 = vmatpush.bf16.msra.mxu1 %v4898_v7  ;;  %2329 = vmatpush.bf16.msra.mxu2 %v4972_v8  ;;  %v4887_v14 = vld [vmem:[%s5495_s27 + $0x1a8] sm:$0xff]  ;;  %v4888_v18 = vld [vmem:[%s5495_s27 + $0x1b0] sm:$0xff] }
  0x19   : > { %v4834_v11 = vld [vmem:[%s5495_s27] sm:$0xff]  ;;  %v4835_v15 = vld [vmem:[%s5495_s27 + $0x8] sm:$0xff]  ;;  %v4836_v19 = vld [vmem:[%s5495_s27 + $0x10] sm:$0xff] }
  0x1a   : > { %v4908_v12 = vld [vmem:[%s5495_s27 + $0x40] sm:$0xff]  ;;  %4338 = vmatmul.msk.bf16.vlgmr.msra.gmra.mxu0 %vm756_vm0, %v4838_v9  ;;  %4386 = vmatmul.msk.bf16.vlgmr.msra.gmra.mxu3 %vm756_vm0, %v5499_v10  ;;  %v4909_v16 = vld [vmem:[%s5495_s27 + $0x48] sm:$0xff]  ;;  %v4910_v20 = vld [vmem:[%s5495_s27 + $0x50] sm:$0xff] }
  0x1b   : > { %5297 = vmatpush.bf16.msrb.mxu3 %v4900_v1  ;;  %4430 = vmatmul.msk.bf16.vlgmr.msra.gmra.mxu1 %vm756_vm0, %v4834_v11  ;;  %v4841_v21 = vld [vmem:[%s5495_s27 + $0x38] sm:$0xff]  ;;  %v4842_v25 = vld [vmem:[%s5495_s27 + $0x40] sm:$0xff]  ;;  %v5544_v28 = vld [vmem:[%s5495_s27 + $0x48] sm:$0xff] }
  0x1c   : > { %4768 = vmatmul.msk.bf16.vlgmr.msra.gmra.mxu2 %vm756_vm0, %v4908_v12  ;;  %v4889_v22 = vld [vmem:[%s5495_s27 + $0x1b8] sm:$0xff]  ;;  %v4890_v26 = vld [vmem:[%s5495_s27 + $0x1c0] sm:$0xff]  ;;  %v4891_v29 = vld [vmem:[%s5495_s27 + $0x1c8] sm:$0xff] }
  0x1d   : > { %v4837_v23 = vld [vmem:[%s5495_s27 + $0x18] sm:$0xff]  ;;  %v4912_v27 = vld [vmem:[%s5495_s27 + $0x60] sm:$0xff]  ;;  %v4913_v30 = vld [vmem:[%s5495_s27 + $0x68] sm:$0xff] }
  0x1e   : > { %v4911_v24 = vld [vmem:[%s5495_s27 + $0x58] sm:$0xff]  ;;  %v5554_v31 = vld [vmem:[%s5495_s27 + $0x50] sm:$0xff]  ;;  %v5574_v37 = vld [vmem:[%s5495_s27 + $0x60] sm:$0xff] }
  0x1f   : > { %5298 = vmatpush.bf16.msrb.mxu3 %v4899_v4  ;;  %v4892_v32 = vld [vmem:[%s5495_s27 + $0x1d0] sm:$0xff]  ;;  %v5564_v34 = vld [vmem:[%s5495_s27 + $0x58] sm:$0xff]  ;;  %v4894_v38 = vld [vmem:[%s5495_s27 + $0x1e0] sm:$0xff] }
  0x20   : > { %v4914_v33 = vld [vmem:[%s5495_s27 + $0x70] sm:$0xff]  ;;  %v4893_v35 = vld [vmem:[%s5495_s27 + $0x1d8] sm:$0xff]  ;;  %v4916_v40 = vld [vmem:[%s5495_s27 + $0x80] sm:$0xff] }
  0x21   : > { %v4915_v36 = vld [vmem:[%s5495_s27 + $0x78] sm:$0xff]  ;;  %v5601_v58 = vld [vmem:[%s5495_s27 + $0x68] sm:$0xff] }
  0x22   : > { %v4895_v59 = vld [vmem:[%s5495_s27 + $0x1e8] sm:$0xff] }
  0x23   : > { %5299 = vmatpush.bf16.msrb.mxu3 %v4898_v7  ;;  %v4917_v62 = vld [vmem:[%s5495_s27 + $0x88] sm:$0xff] }
  0x24   : > { %v5231_v11 = vld [vmem:[%s5587_s6 + $0x8] sm:$0xff]  }
  0x27   : > { %5300 = vmatpush.bf16.msra.mxu3 %v4974_v2  ;;  %v4978_v2 = vunpack.c.h.bf16 %v4976_v47 }
  0x2a   : > { %4339 = vmatmul.msk.bf16.gmra.mxu0 %vm756_vm0, %v4839_v13  ;;  %4387 = vmatmul.msk.bf16.gmra.mxu3 %vm756_vm0, %v4887_v14 }
  0x2b   : > { %5301 = vmatpush.bf16.msra.mxu3 %v4973_v5  ;;  %4431 = vmatmul.msk.bf16.gmra.mxu1 %vm756_vm0, %v4835_v15 }
  0x2c   : > { %4769 = vmatmul.msk.bf16.gmra.mxu2 %vm756_vm0, %v4909_v16  ;;  %v4981_v16 = vunpack.c.l.bf16 %v5231_v11 }
  0x2f   : > { %5302 = vmatpush.bf16.msra.mxu3 %v4972_v8 }
  0x3a   : > { %4340 = vmatmul.msk.bf16.gmra.mxu0 %vm756_vm0, %v4840_v17  ;;  %4388 = vmatmul.msk.bf16.gmra.mxu3 %vm756_vm0, %v4888_v18 }
  0x3b   : > { %4432 = vmatmul.msk.bf16.gmra.mxu1 %vm756_vm0, %v4836_v19 }
  0x3c   : > { %4770 = vmatmul.msk.bf16.gmra.mxu2 %vm756_vm0, %v4910_v20 }
  0x4a   : > { %4341 = vmatmul.msk.bf16.gmra.mxu0 %vm756_vm0, %v4841_v21  ;;  %4389 = vmatmul.msk.bf16.gmra.mxu3 %vm756_vm0, %v4889_v22 }
  0x4b   : > { %4433 = vmatmul.msk.bf16.gmra.mxu1 %vm756_vm0, %v4837_v23  ;;  %v5628_v23 = vld [vmem:[%s5495_s27 + $0x70] sm:$0xff] }
  0x4c   : > { %4771 = vmatmul.msk.bf16.gmra.mxu2 %vm756_vm0, %v4911_v24  ;;  %v4896_v24 = vld [vmem:[%s5495_s27 + $0x1f0] sm:$0xff] }
  0x5a   : > { %4342 = vmatmul.msk.bf16.gmra.mxu0 %vm756_vm0, %v4842_v25  ;;  %4390 = vmatmul.msk.bf16.gmra.mxu3 %vm756_vm0, %v4890_v26 }
  0x5b   : > { %4434 = vmatmul.msk.bf16.gmra.mxu1 %vm756_vm0, %v4838_v9 }
  0x5c   : > { %4772 = vmatmul.msk.bf16.gmra.mxu2 %vm756_vm0, %v4912_v27  ;;  %v4918_v27 = vld [vmem:[%s5495_s27 + $0x90] sm:$0xff] }
  0x6a   : > { %4343 = vmatmul.msk.bf16.gmra.mxu0 %vm756_vm0, %v5544_v28  ;;  %4391 = vmatmul.msk.bf16.gmra.mxu3 %vm756_vm0, %v4891_v29 }
  0x6b   : > { %4435 = vmatmul.msk.bf16.gmra.mxu1 %vm756_vm0, %v4839_v13 }
  0x6c   : > { %4773 = vmatmul.msk.bf16.gmra.mxu2 %vm756_vm0, %v4913_v30 }
  0x7a   : > { %4344 = vmatmul.msk.bf16.gmra.mxu0 %vm756_vm0, %v5554_v31  ;;  %4392 = vmatmul.msk.bf16.gmra.mxu3 %vm756_vm0, %v4892_v32  ;;  %v4982_v32 = vunpack.c.h.bf16 %v5231_v11  ;;  %v5233_v11 = vld [vmem:[%s5587_s6 + $0x18] sm:$0xff]  }
  0x7b   : > { %4436 = vmatmul.msk.bf16.gmra.mxu1 %vm756_vm0, %v4840_v17 }
  0x7c   : > { %4774 = vmatmul.msk.bf16.gmra.mxu2 %vm756_vm0, %v4914_v33 }
  0x8a   : > { %4345 = vmatmul.msk.bf16.gmra.mxu0 %vm756_vm0, %v5564_v34  ;;  %4393 = vmatmul.msk.bf16.gmra.mxu3 %vm756_vm0, %v4893_v35 }
  0x8b   : > { %4437 = vmatmul.msk.bf16.gmra.mxu1 %vm756_vm0, %v4841_v21 }
  0x8c   : > { %4775 = vmatmul.msk.bf16.gmra.mxu2 %vm756_vm0, %v4915_v36 }
  0x97   : > { %v958_v39 = vpop.f32.mrf.mxu0 }
  0x98   : > { %v1337_v41 = vpop.f32.mrf.mxu1 }
  0x99   : > { %v1338_v42 = vadd.f32 %v1337_v41, %v958_v39 }
  0x9a   : > { %4346 = vmatmul.msk.bf16.gmra.mxu0 %vm756_vm0, %v5574_v37  ;;  %4394 = vmatmul.msk.bf16.gmra.mxu3 %vm756_vm0, %v4894_v38 }
  0x9b   : > { %4438 = vmatmul.msk.bf16.gmra.mxu1 %vm756_vm0, %v4842_v25 }
  0x9c   : > { %4776 = vmatmul.msk.bf16.gmra.mxu2 %vm756_vm0, %v4916_v40 }
  0x9d   : > { %v5589_v43 = vpop.f32.mrf.mxu3 }
  0x9f   : > { %v2331_v45 = vpop.f32.mrf.mxu2  ;;  %v960_v48 = vpop.f32.mrf.mxu0 }
  0xa0   : > { %v2651_v46 = vadd.f32 %v2331_v45, %v1338_v42  ;;  %v1339_v49 = vpop.f32.mrf.mxu1  ;;  %v5232_v42 = vld [vmem:[%s5587_s6 + $0x10] sm:$0xff]  }
  0xa1   : > { %v1340_v54 = vadd.f32 %v1339_v49, %v960_v48 }
  0xa2   : > { %v2783_v50 = vadd.f32 %v5594_v44, %v2651_v46 }
  0xa4   : > { %vm2911_vm1 = vcmp.ge.f32.partialorder %v2783_v50, 0.0  ;;  %v3039_v52 = vmul.f32 0.1, %v2783_v50 }
  0xa5   : > { %v5598_v55 = vpop.f32.mrf.mxu3 }
  0xa6   : > { %v3167_v53 = vsel %vm2911_vm1, %v2783_v50, %v3039_v52 }
  0xa7   : > { %v3551_v56 = vadd.f32 %v4977_v51, %v3167_v53  ;;  %v2333_v57 = vpop.f32.mrf.mxu2  ;;  %v963_v61 = vpop.f32.mrf.mxu0 }
  0xa8   : > { %v2652_v60 = vadd.f32 %v2333_v57, %v1340_v54  ;;  %v1342_v0 = vpop.f32.mrf.mxu1  ;;  %v4897_v57 = vld [vmem:[%s5495_s27 + $0x1f8] sm:$0xff] }
  0xa9   : > { %v3679_v63 = vpack.c.bf16 %v3551_v56, %v3551_v56  ;;  %v1343_v4 = vadd.f32 %v1342_v0, %v963_v61  ;;  %v5650_v56 = vld [vmem:[%s5495_s27 + $0x78] sm:$0xff] }
  0xaa   : > { %v2784_v1 = vadd.f32 %v5594_v44, %v2652_v60  ;;  %4347 = vmatmul.msk.bf16.gmra.mxu0 %vm756_vm0, %v5601_v58  ;;  %4395 = vmatmul.msk.bf16.gmra.mxu3 %vm756_vm0, %v4895_v59  ;;  %v4919_v61 = vld [vmem:[%s5495_s27 + $0x98] sm:$0xff] }
  0xab   : > { %3808 = vst.msk [vmem:[%s5607_s11] sm:$0xf] %vm3807_vm2, %v3679_v63  ;;  %4439 = vmatmul.msk.bf16.gmra.mxu1 %vm756_vm0, %v5544_v28 }
  0xac   : > { %vm2912_vm3 = vcmp.ge.f32.partialorder %v2784_v1, 0.0  ;;  %v3040_v3 = vmul.f32 0.1, %v2784_v1  ;;  %4777 = vmatmul.msk.bf16.gmra.mxu2 %vm756_vm0, %v4917_v62 }
  0xad   : > { %v5619_v6 = vpop.f32.mrf.mxu3 }
  0xae   : > { %v3168_v5 = vsel %vm2912_vm3, %v2784_v1, %v3040_v3  ;;  %v4986_v1 = vunpack.c.h.bf16 %v5232_v42 }
  0xaf   : > { %v3552_v7 = vadd.f32 %v4978_v2, %v3168_v5  ;;  %v2336_v8 = vpop.f32.mrf.mxu2  ;;  %v965_v12 = vpop.f32.mrf.mxu0 }
  0xb0   : > { %v2653_v9 = vadd.f32 %v2336_v8, %v1343_v4  ;;  %v1344_v14 = vpop.f32.mrf.mxu1 }
  0xb1   : > { %v3680_v13 = vpack.c.bf16 %v3552_v7, %v3552_v7  ;;  %v1345_v19 = vadd.f32 %v1344_v14, %v965_v12 }
  0xb2   : > { %v2785_v15 = vadd.f32 %v5594_v44, %v2653_v9 }
  0xb3   : > { %3809 = vst.msk [vmem:[%s5607_s11 + $0x4] sm:$0xf] %vm3807_vm2, %v3680_v13 }
  0xb4   : > { %vm2913_vm4 = vcmp.ge.f32.partialorder %v2785_v15, 0.0  ;;  %v3041_v17 = vmul.f32 0.1, %v2785_v15 }
  0xb5   : > { %v5625_v20 = vpop.f32.mrf.mxu3 }
  0xb6   : > { %v3169_v18 = vsel %vm2913_vm4, %v2785_v15, %v3041_v17 }
  0xb7   : > { %v3553_v21 = vadd.f32 %v4981_v16, %v3169_v18  ;;  %v2338_v22 = vpop.f32.mrf.mxu2  ;;  %v968_v26 = vpop.f32.mrf.mxu0 }
  0xb8   : > { %v2654_v25 = vadd.f32 %v2338_v22, %v1345_v19  ;;  %v1347_v29 = vpop.f32.mrf.mxu1 }
  0xb9   : > { %v3681_v28 = vpack.c.bf16 %v3553_v21, %v3553_v21  ;;  %v1348_v35 = vadd.f32 %v1347_v29, %v968_v26 }
  0xba   : > { %v2786_v30 = vadd.f32 %v5594_v44, %v2654_v25  ;;  %4348 = vmatmul.msk.bf16.gmra.mxu0 %vm756_vm0, %v5628_v23  ;;  %4396 = vmatmul.msk.bf16.gmra.mxu3 %vm756_vm0, %v4896_v24  ;;  %v5672_v24 = vld [vmem:[%s5495_s27 + $0x80] sm:$0xff] }
  0xbb   : > { %3810 = vst.msk [vmem:[%s5607_s11 + $0x8] sm:$0xf] %vm3807_vm2, %v3681_v28  ;;  %4440 = vmatmul.msk.bf16.gmra.mxu1 %vm756_vm0, %v5554_v31  ;;  %v4985_v31 = vunpack.c.l.bf16 %v5232_v42  ;;  %v4901_v25 = vld [vmem:[%s5495_s27 + $0x200] sm:$0xff] }
  0xbc   : > { %vm2914_vm5 = vcmp.ge.f32.partialorder %v2786_v30, 0.0  ;;  %v3042_v33 = vmul.f32 0.1, %v2786_v30  ;;  %4778 = vmatmul.msk.bf16.gmra.mxu2 %vm756_vm0, %v4918_v27  ;;  %v4920_v28 = vld [vmem:[%s5495_s27 + $0xa0] sm:$0xff] }
  0xbd   : > { %v5641_v38 = vpop.f32.mrf.mxu3 }
  0xbe   : > { %v3170_v36 = vsel %vm2914_vm5, %v2786_v30, %v3042_v33  ;;  %v4990_v33 = vunpack.c.h.bf16 %v5233_v11 }
  0xbf   : > { %v3554_v39 = vadd.f32 %v4982_v32, %v3170_v36  ;;  %v2341_v40 = vpop.f32.mrf.mxu2  ;;  %v970_v45 = vpop.f32.mrf.mxu0 }
  0xc0   : > { %v2655_v41 = vadd.f32 %v2341_v40, %v1348_v35  ;;  %v1349_v47 = vpop.f32.mrf.mxu1 }
  0xc1   : > { %v3682_v46 = vpack.c.bf16 %v3554_v39, %v3554_v39  ;;  %v1350_v51 = vadd.f32 %v1349_v47, %v970_v45 }
  0xc2   : > { %v2787_v48 = vadd.f32 %v5594_v44, %v2655_v41 }
  0xc3   : > { %3811 = vst.msk [vmem:[%s5607_s11 + $0xc] sm:$0xf] %vm3807_vm2, %v3682_v46  ;;  %v5234_v46 = vld [vmem:[%s5587_s6 + $0x20] sm:$0xff]  }
  0xc4   : > { %vm2915_vm6 = vcmp.ge.f32.partialorder %v2787_v48, 0.0  ;;  %v3043_v49 = vmul.f32 0.1, %v2787_v48 }
  0xc5   : > { %v5647_v52 = vpop.f32.mrf.mxu3 }
  0xc6   : > { %v3171_v50 = vsel %vm2915_vm6, %v2787_v48, %v3043_v49 }
  0xc7   : > { %v3555_v53 = vadd.f32 %v4985_v31, %v3171_v50  ;;  %v2343_v54 = vpop.f32.mrf.mxu2  ;;  %v973_v60 = vpop.f32.mrf.mxu0 }
  0xc8   : > { %v2656_v59 = vadd.f32 %v2343_v54, %v1350_v51  ;;  %v1352_v63 = vpop.f32.mrf.mxu1 }
  0xc9   : > { %v3683_v62 = vpack.c.bf16 %v3555_v53, %v3555_v53  ;;  %v1353_v3 = vadd.f32 %v1352_v63, %v973_v60  ;;  %v5694_v60 = vld [vmem:[%s5495_s27 + $0x88] sm:$0xff] }
  0xca   : > { %v2788_v0 = vadd.f32 %v5594_v44, %v2656_v59  ;;  %4349 = vmatmul.msk.bf16.gmra.mxu0 %vm756_vm0, %v5650_v56  ;;  %4397 = vmatmul.msk.bf16.gmra.mxu3 %vm756_vm0, %v4897_v57 }
  0xcb   : > { %3812 = vst.msk [vmem:[%s5607_s11 + $0x10] sm:$0xf] %vm3807_vm2, %v3683_v62  ;;  %4441 = vmatmul.msk.bf16.gmra.mxu1 %vm756_vm0, %v5564_v34  ;;  %v4989_v34 = vunpack.c.l.bf16 %v5233_v11 }
  0xcc   : > { %vm2916_vm7 = vcmp.ge.f32.partialorder %v2788_v0, 0.0  ;;  %v3044_v2 = vmul.f32 0.1, %v2788_v0  ;;  %4779 = vmatmul.msk.bf16.gmra.mxu2 %vm756_vm0, %v4919_v61  ;;  %v4902_v61 = vld [vmem:[%s5495_s27 + $0x208] sm:$0xff] }
  0xcd   : > { %v5663_v5 = vpop.f32.mrf.mxu3 }
  0xce   : > { %v3172_v4 = vsel %vm2916_vm7, %v2788_v0, %v3044_v2  ;;  %v4921_v0 = vld [vmem:[%s5495_s27 + $0xa8] sm:$0xff] }
  0xcf   : > { %v3556_v7 = vadd.f32 %v4986_v1, %v3172_v4  ;;  %v2346_v8 = vpop.f32.mrf.mxu2  ;;  %v975_v12 = vpop.f32.mrf.mxu0  ;;  %v4994_v4 = vunpack.c.h.bf16 %v5234_v46 }
  0xd0   : > { %v2657_v9 = vadd.f32 %v2346_v8, %v1353_v3  ;;  %v1354_v14 = vpop.f32.mrf.mxu1 }
  0xd1   : > { %v3684_v13 = vpack.c.bf16 %v3556_v7, %v3556_v7  ;;  %v1355_v18 = vadd.f32 %v1354_v14, %v975_v12 }
  0xd2   : > { %v2789_v15 = vadd.f32 %v5594_v44, %v2657_v9 }
  0xd3   : > { %3813 = vst.msk [vmem:[%s5607_s11 + $0x14] sm:$0xf] %vm3807_vm2, %v3684_v13 }
  0xd4   : > { %vm2917_vm8 = vcmp.ge.f32.partialorder %v2789_v15, 0.0  ;;  %v3045_v16 = vmul.f32 0.1, %v2789_v15 }
  0xd5   : > { %v5669_v19 = vpop.f32.mrf.mxu3 }
  0xd6   : > { %v3173_v17 = vsel %vm2917_vm8, %v2789_v15, %v3045_v16  ;;  %v5235_v15 = vld [vmem:[%s5587_s6 + $0x28] sm:$0xff]  }
  0xd7   : > { %v3557_v21 = vadd.f32 %v4989_v34, %v3173_v17  ;;  %v2348_v22 = vpop.f32.mrf.mxu2  ;;  %v978_v27 = vpop.f32.mrf.mxu0 }
  0xd8   : > { %v2658_v26 = vadd.f32 %v2348_v22, %v1355_v18  ;;  %v1357_v30 = vpop.f32.mrf.mxu1 }
  0xd9   : > { %v3685_v29 = vpack.c.bf16 %v3557_v21, %v3557_v21  ;;  %v1358_v36 = vadd.f32 %v1357_v30, %v978_v27  ;;  %v4903_v30 = vld [vmem:[%s5495_s27 + $0x210] sm:$0xff] }
  0xda   : > { %v2790_v32 = vadd.f32 %v5594_v44, %v2658_v26  ;;  %4350 = vmatmul.msk.bf16.gmra.mxu0 %vm756_vm0, %v5672_v24  ;;  %4398 = vmatmul.msk.bf16.gmra.mxu3 %vm756_vm0, %v4901_v25 }
  0xdb   : > { %3814 = vst.msk [vmem:[%s5607_s11 + $0x18] sm:$0xf] %vm3807_vm2, %v3685_v29  ;;  %4442 = vmatmul.msk.bf16.gmra.mxu1 %vm756_vm0, %v5574_v37  ;;  %v4993_v37 = vunpack.c.l.bf16 %v5234_v46  ;;  %v5716_v29 = vld [vmem:[%s5495_s27 + $0x90] sm:$0xff] }
  0xdc   : > { %vm2918_vm9 = vcmp.ge.f32.partialorder %v2790_v32, 0.0  ;;  %v3046_v35 = vmul.f32 0.1, %v2790_v32  ;;  %4780 = vmatmul.msk.bf16.gmra.mxu2 %vm756_vm0, %v4920_v28 }
  0xdd   : > { %v5685_v40 = vpop.f32.mrf.mxu3 }
  0xde   : > { %v3174_v39 = vsel %vm2918_vm9, %v2790_v32, %v3046_v35  ;;  %v4922_v35 = vld [vmem:[%s5495_s27 + $0xb0] sm:$0xff] }
  0xdf   : > { %v3558_v41 = vadd.f32 %v4990_v33, %v3174_v39  ;;  %v2351_v42 = vpop.f32.mrf.mxu2  ;;  %v980_v47 = vpop.f32.mrf.mxu0 }
  0xe0   : > { %v2659_v45 = vadd.f32 %v2351_v42, %v1358_v36  ;;  %v1359_v31 = vpop.f32.mrf.mxu1  ;;  %v4998_v42 = vunpack.c.h.bf16 %v5235_v15 }
  0xe1   : > { %v3686_v48 = vpack.c.bf16 %v3558_v41, %v3558_v41  ;;  %v1360_v53 = vadd.f32 %v1359_v31, %v980_v47 }
  0xe2   : > { %v2791_v49 = vadd.f32 %v5594_v44, %v2659_v45 }
  0xe3   : > { %3815 = vst.msk [vmem:[%s5607_s11 + $0x1c] sm:$0xf] %vm3807_vm2, %v3686_v48 }
  0xe4   : > { %vm2919_vm10 = vcmp.ge.f32.partialorder %v2791_v49, 0.0  ;;  %v3047_v50 = vmul.f32 0.1, %v2791_v49 }
  0xe5   : > { %v5691_v54 = vpop.f32.mrf.mxu3 }
  0xe6   : > { %v3175_v51 = vsel %vm2919_vm10, %v2791_v49, %v3047_v50  ;;  %v5236_v50 = vld [vmem:[%s5587_s6 + $0x30] sm:$0xff]  }
  0xe7   : > { %v3559_v57 = vadd.f32 %v4993_v37, %v3175_v51  ;;  %v2353_v59 = vpop.f32.mrf.mxu2  ;;  %v983_v63 = vpop.f32.mrf.mxu0 }
  0xe8   : > { %v2660_v62 = vadd.f32 %v2353_v59, %v1360_v53  ;;  %v1362_v2 = vpop.f32.mrf.mxu1 }
  0xe9   : > { %v3687_v1 = vpack.c.bf16 %v3559_v57, %v3559_v57  ;;  %v1363_v8 = vadd.f32 %v1362_v2, %v983_v63 }
  0xea   : > { %v2792_v3 = vadd.f32 %v5594_v44, %v2660_v62  ;;  %4351 = vmatmul.msk.bf16.gmra.mxu0 %vm756_vm0, %v5694_v60  ;;  %4399 = vmatmul.msk.bf16.gmra.mxu3 %vm756_vm0, %v4902_v61 }
  0xeb   : > { %3816 = vst.msk [vmem:[%s5607_s11 + $0x20] sm:$0xf] %vm3807_vm2, %v3687_v1  ;;  %4443 = vmatmul.msk.bf16.gmra.mxu1 %vm756_vm0, %v5601_v58  ;;  %v4997_v58 = vunpack.c.l.bf16 %v5235_v15  ;;  %v5002_v15 = vunpack.c.h.bf16 %v5236_v50 }
  0xec   : > { %vm2920_vm11 = vcmp.ge.f32.partialorder %v2792_v3, 0.0  ;;  %v3048_v7 = vmul.f32 0.1, %v2792_v3  ;;  %4781 = vmatmul.msk.bf16.gmra.mxu2 %vm756_vm0, %v4921_v0 }
  0xed   : > { %v5707_v11 = vpop.f32.mrf.mxu3 }
  0xee   : > { %v3176_v9 = vsel %vm2920_vm11, %v2792_v3, %v3048_v7  ;;  %v5738_v3 = vld [vmem:[%s5495_s27 + $0x98] sm:$0xff] }
  0xef   : > { %v3560_v12 = vadd.f32 %v4994_v4, %v3176_v9  ;;  %v2356_v13 = vpop.f32.mrf.mxu2  ;;  %v985_v34 = vpop.f32.mrf.mxu0  ;;  %v4904_v4 = vld [vmem:[%s5495_s27 + $0x218] sm:$0xff] }
  0xf0   : > { %v2661_v14 = vadd.f32 %v2356_v13, %v1363_v8  ;;  %v1364_v17 = vpop.f32.mrf.mxu1  ;;  %v4923_v9 = vld [vmem:[%s5495_s27 + $0xb8] sm:$0xff] }
  0xf1   : > { %v3688_v16 = vpack.c.bf16 %v3560_v12, %v3560_v12  ;;  %v1365_v25 = vadd.f32 %v1364_v17, %v985_v34 }
  0xf2   : > { %v2793_v18 = vadd.f32 %v5594_v44, %v2661_v14 }
  0xf3   : > { %3817 = vst.msk [vmem:[%s5607_s11 + $0x24] sm:$0xf] %vm3807_vm2, %v3688_v16 }
  0xf4   : > { %vm2921_vm12 = vcmp.ge.f32.partialorder %v2793_v18, 0.0  ;;  %v3049_v21 = vmul.f32 0.1, %v2793_v18 }
  0xf5   : > { %v5713_v26 = vpop.f32.mrf.mxu3 }
  0xf6   : > { %v3177_v22 = vsel %vm2921_vm12, %v2793_v18, %v3049_v21 }
  0xf7   : > { %v3561_v27 = vadd.f32 %v4997_v58, %v3177_v22  ;;  %v2358_v28 = vpop.f32.mrf.mxu2  ;;  %v988_v33 = vpop.f32.mrf.mxu0 }
  0xf8   : > { %v2662_v32 = vadd.f32 %v2358_v28, %v1365_v25  ;;  %v1367_v39 = vpop.f32.mrf.mxu1  ;;  %v5237_v25 = vld [vmem:[%s5587_s6 + $0x38] sm:$0xff]  }
  0xf9   : > { %v3689_v36 = vpack.c.bf16 %v3561_v27, %v3561_v27  ;;  %v1368_v46 = vadd.f32 %v1367_v39, %v988_v33 }
  0xfa   : > { %v2794_v41 = vadd.f32 %v5594_v44, %v2662_v32  ;;  %4352 = vmatmul.msk.bf16.gmra.mxu0 %vm756_vm0, %v5716_v29  ;;  %4400 = vmatmul.msk.bf16.gmra.mxu3 %vm756_vm0, %v4903_v30 }
  0xfb   : > { %3818 = vst.msk [vmem:[%s5607_s11 + $0x28] sm:$0xf] %vm3807_vm2, %v3689_v36  ;;  %4444 = vmatmul.msk.bf16.gmra.mxu1 %vm756_vm0, %v5628_v23  ;;  %v5001_v23 = vunpack.c.l.bf16 %v5236_v50 }
  0xfc   : > { %vm2922_vm13 = vcmp.ge.f32.partialorder %v2794_v41, 0.0  ;;  %v3050_v45 = vmul.f32 0.1, %v2794_v41  ;;  %4782 = vmatmul.msk.bf16.gmra.mxu2 %vm756_vm0, %v4922_v35 }
  0xfd   : > { %v5729_v48 = vpop.f32.mrf.mxu3 }
  0xfe   : > { %v3178_v47 = vsel %vm2922_vm13, %v2794_v41, %v3050_v45  ;;  %v5760_v45 = vld [vmem:[%s5495_s27 + $0xa0] sm:$0xff] }
  0xff   : > { %v3562_v31 = vadd.f32 %v4998_v42, %v3178_v47  ;;  %v2361_v49 = vpop.f32.mrf.mxu2  ;;  %v990_v51 = vpop.f32.mrf.mxu0 }
 0x100   : > { %v2663_v37 = vadd.f32 %v2361_v49, %v1368_v46  ;;  %v1369_v57 = vpop.f32.mrf.mxu1  ;;  %v4882_v46 = vld [vmem:[%s5495_s27 + $0x180] sm:$0xff] }
 0x101   : > { %v3690_v53 = vpack.c.bf16 %v3562_v31, %v3562_v31  ;;  %v1370_v63 = vadd.f32 %v1369_v57, %v990_v51  ;;  %v4924_v49 = vld [vmem:[%s5495_s27 + $0xc0] sm:$0xff] }
 0x102   : > { %v2795_v59 = vadd.f32 %v5594_v44, %v2663_v37 }
 0x103   : > { %3819 = vst.msk [vmem:[%s5607_s11 + $0x2c] sm:$0xf] %vm3807_vm2, %v3690_v53  ;;  %v5006_v53 = vunpack.c.h.bf16 %v5237_v25 }
 0x104   : > { %vm2923_vm14 = vcmp.ge.f32.partialorder %v2795_v59, 0.0  ;;  %v3051_v61 = vmul.f32 0.1, %v2795_v59 }
 0x105   : > { %v5735_v0 = vpop.f32.mrf.mxu3 }
 0x106   : > { %v3179_v62 = vsel %vm2923_vm14, %v2795_v59, %v3051_v61 }
 0x107   : > { %v3563_v1 = vadd.f32 %v5001_v23, %v3179_v62  ;;  %v2363_v2 = vpop.f32.mrf.mxu2  ;;  %v993_v8 = vpop.f32.mrf.mxu0 }
 0x108   : > { %v2664_v7 = vadd.f32 %v2363_v2, %v1370_v63  ;;  %v1372_v13 = vpop.f32.mrf.mxu1  ;;  %v5238_v2 = vld [vmem:[%s5587_s6 + $0x40] sm:$0xff]  }
 0x109   : > { %v3691_v12 = vpack.c.bf16 %v3563_v1, %v3563_v1  ;;  %v1373_v16 = vadd.f32 %v1372_v13, %v993_v8 }
 0x10a   : > { %v2796_v14 = vadd.f32 %v5594_v44, %v2664_v7  ;;  %4353 = vmatmul.msk.bf16.gmra.mxu0 %vm756_vm0, %v5738_v3  ;;  %4401 = vmatmul.msk.bf16.gmra.mxu3 %vm756_vm0, %v4904_v4 }
 0x10b   : > { %3820 = vst.msk [vmem:[%s5607_s11 + $0x30] sm:$0xf] %vm3807_vm2, %v3691_v12  ;;  %4445 = vmatmul.msk.bf16.gmra.mxu1 %vm756_vm0, %v5650_v56  ;;  %v5005_v56 = vunpack.c.l.bf16 %v5237_v25  ;;  %v4925_v25 = vld [vmem:[%s5495_s27 + $0xc8] sm:$0xff] }
 0x10c   : > { %vm2924_vm15 = vcmp.ge.f32.partialorder %v2796_v14, 0.0  ;;  %v3052_v34 = vmul.f32 0.1, %v2796_v14  ;;  %4783 = vmatmul.msk.bf16.gmra.mxu2 %vm756_vm0, %v4923_v9 }
 0x10d   : > { %v5751_v18 = vpop.f32.mrf.mxu3 }
 0x10e   : > { %v3180_v17 = vsel %vm2924_vm15, %v2796_v14, %v3052_v34 }
 0x10f   : > { %v3564_v58 = vadd.f32 %v5002_v15, %v3180_v17  ;;  %v2366_v21 = vpop.f32.mrf.mxu2  ;;  %v995_v27 = vpop.f32.mrf.mxu0  ;;  %v5782_v17 = vld [vmem:[%s5495_s27 + $0xa8] sm:$0xff] }
 0x110   : > { %v2665_v22 = vadd.f32 %v2366_v21, %v1373_v16  ;;  %v1374_v30 = vpop.f32.mrf.mxu1 }
 0x111   : > { %v3692_v28 = vpack.c.bf16 %v3564_v58, %v3564_v58  ;;  %v1375_v36 = vadd.f32 %v1374_v30, %v995_v27  ;;  %v4883_v58 = vld [vmem:[%s5495_s27 + $0x188] sm:$0xff] }
 0x112   : > { %v2797_v32 = vadd.f32 %v5594_v44, %v2665_v22 }
 0x113   : > { %3821 = vst.msk [vmem:[%s5607_s11 + $0x34] sm:$0xf] %vm3807_vm2, %v3692_v28 }
 0x114   : > { %vm2925_vm1 = vcmp.ge.f32.partialorder %v2797_v32, 0.0  ;;  %v3053_v33 = vmul.f32 0.1, %v2797_v32 }
 0x115   : > { %v5757_v39 = vpop.f32.mrf.mxu3 }
 0x116   : > { %v3181_v35 = vsel %vm2925_vm1, %v2797_v32, %v3053_v33  ;;  %v5010_v32 = vunpack.c.h.bf16 %v5238_v2 }
 0x117   : > { %v3565_v41 = vadd.f32 %v5005_v56, %v3181_v35  ;;  %v2368_v42 = vpop.f32.mrf.mxu2  ;;  %v998_v31 = vpop.f32.mrf.mxu0 }
 0x118   : > { %v2666_v47 = vadd.f32 %v2368_v42, %v1375_v36  ;;  %v1377_v50 = vpop.f32.mrf.mxu1 }
 0x119   : > { %v3693_v37 = vpack.c.bf16 %v3565_v41, %v3565_v41  ;;  %v1378_v59 = vadd.f32 %v1377_v50, %v998_v31 }
 0x11a   : > { %v2798_v51 = vadd.f32 %v5594_v44, %v2666_v47  ;;  %4354 = vmatmul.msk.bf16.gmra.mxu0 %vm756_vm0, %v5760_v45  ;;  %4478 = vmatmul.msk.bf16.vlgmr.msrb.gmra.mxu3 %vm756_vm0, %v4882_v46  ;;  %v5239_v47 = vld [vmem:[%s5587_s6 + $0x48] sm:$0xff]  }
 0x11b   : > { %3822 = vst.msk [vmem:[%s5607_s11 + $0x38] sm:$0xf] %vm3807_vm2, %v3693_v37  ;;  %4446 = vmatmul.msk.bf16.gmra.mxu1 %vm756_vm0, %v5672_v24  ;;  %v5009_v24 = vunpack.c.l.bf16 %v5238_v2 }
 0x11c   : > { %vm2926_vm3 = vcmp.ge.f32.partialorder %v2798_v51, 0.0  ;;  %v3054_v57 = vmul.f32 0.1, %v2798_v51  ;;  %4784 = vmatmul.msk.bf16.gmra.mxu2 %vm756_vm0, %v4924_v49 }
 0x11d   : > { %v5773_v61 = vpop.f32.mrf.mxu3 }
 0x11e   : > { %v3182_v23 = vsel %vm2926_vm3, %v2798_v51, %v3054_v57 }
 0x11f   : > { %v3566_v62 = vadd.f32 %v5006_v53, %v3182_v23  ;;  %v2371_v63 = vpop.f32.mrf.mxu2  ;;  %v1000_v4 = vpop.f32.mrf.mxu0 }
 0x120   : > { %v2667_v1 = vadd.f32 %v2371_v63, %v1378_v59  ;;  %v1379_v8 = vpop.f32.mrf.mxu1  ;;  %v5804_v63 = vld [vmem:[%s5495_s27 + $0xb0] sm:$0xff] }
 0x121   : > { %v3694_v7 = vpack.c.bf16 %v3566_v62, %v3566_v62  ;;  %v1380_v14 = vadd.f32 %v1379_v8, %v1000_v4 }
 0x122   : > { %v2799_v9 = vadd.f32 %v5594_v44, %v2667_v1  ;;  %v4884_v1 = vld [vmem:[%s5495_s27 + $0x190] sm:$0xff] }
 0x123   : > { %3823 = vst.msk [vmem:[%s5607_s11 + $0x3c] sm:$0xf] %vm3807_vm2, %v3694_v7  ;;  %v4926_v7 = vld [vmem:[%s5495_s27 + $0xd0] sm:$0xff] }
 0x124   : > { %vm2927_vm4 = vcmp.ge.f32.partialorder %v2799_v9, 0.0  ;;  %v3055_v12 = vmul.f32 0.1, %v2799_v9 }
 0x125   : > { %v5779_v15 = vpop.f32.mrf.mxu3 }
 0x126   : > { %v3183_v13 = vsel %vm2927_vm4, %v2799_v9, %v3055_v12  ;;  %v5014_v12 = vunpack.c.h.bf16 %v5239_v47 }
 0x127   : > { %v3567_v34 = vadd.f32 %v5009_v24, %v3183_v13  ;;  %v2373_v16 = vpop.f32.mrf.mxu2  ;;  %v1003_v22 = vpop.f32.mrf.mxu0 }
 0x128   : > { %v2668_v21 = vadd.f32 %v2373_v16, %v1380_v14  ;;  %v1382_v28 = vpop.f32.mrf.mxu1 }
 0x129   : > { %v3695_v27 = vpack.c.bf16 %v3567_v34, %v3567_v34  ;;  %v1383_v33 = vadd.f32 %v1382_v28, %v1003_v22 }
 0x12a   : > { %v2800_v30 = vadd.f32 %v5594_v44, %v2668_v21  ;;  %4355 = vmatmul.msk.bf16.gmra.mxu0 %vm756_vm0, %v5782_v17  ;;  %4479 = vmatmul.msk.bf16.gmra.mxu3 %vm756_vm0, %v4883_v58 }
 0x12b   : > { %3824 = vst.msk [vmem:[%s5607_s11 + $0x40] sm:$0xf] %vm3807_vm2, %v3695_v27  ;;  %4447 = vmatmul.msk.bf16.gmra.mxu1 %vm756_vm0, %v5694_v60  ;;  %v5013_v60 = vunpack.c.l.bf16 %v5239_v47  ;;  %v5826_v47 = vld [vmem:[%s5495_s27 + $0xb8] sm:$0xff] }
 0x12c   : > { %vm2928_vm5 = vcmp.ge.f32.partialorder %v2800_v30, 0.0  ;;  %v3056_v56 = vmul.f32 0.1, %v2800_v30  ;;  %4785 = vmatmul.msk.bf16.gmra.mxu2 %vm756_vm0, %v4925_v25  ;;  %v5240_v25 = vld [vmem:[%s5587_s6 + $0x50] sm:$0xff]  }
 0x12d   : > { %v5795_v36 = vpop.f32.mrf.mxu3 }
 0x12e   : > { %v3184_v35 = vsel %vm2928_vm5, %v2800_v30, %v3056_v56  ;;  %6691 = vst [vmem:[#allocation2_spill] sm:$0xff] %v5795_v36  ;;  %v4949_v36 = vld [vmem:[%s5495_s27 + $0x188] sm:$0xff] }
 0x12f   : > { %v3568_v41 = vadd.f32 %v5010_v32, %v3184_v35  ;;  %v2376_v42 = vpop.f32.mrf.mxu2  ;;  %v1005_v31 = vpop.f32.mrf.mxu0 }
 0x130   : > { %v2669_v46 = vadd.f32 %v2376_v42, %v1383_v33  ;;  %v1384_v37 = vpop.f32.mrf.mxu1 }
 0x131   : > { %v3696_v49 = vpack.c.bf16 %v3568_v41, %v3568_v41  ;;  %v1385_v57 = vadd.f32 %v1384_v37, %v1005_v31  ;;  %v4885_v31 = vld [vmem:[%s5495_s27 + $0x198] sm:$0xff] }
 0x132   : > { %v2801_v50 = vadd.f32 %v5594_v44, %v2669_v46 }
 0x133   : > { %3825 = vst.msk [vmem:[%s5607_s11 + $0x44] sm:$0xf] %vm3807_vm2, %v3696_v49 }
 0x134   : > { %vm2929_vm6 = vcmp.ge.f32.partialorder %v2801_v50, 0.0  ;;  %v3057_v51 = vmul.f32 0.1, %v2801_v50 }
 0x135   : > { %v5801_v59 = vpop.f32.mrf.mxu3 }
 0x136   : > { %v3185_v53 = vsel %vm2929_vm6, %v2801_v50, %v3057_v51  ;;  %6692 = vst [vmem:[#allocation3_spill] sm:$0xff] %v5801_v59  ;;  %v4927_v50 = vld [vmem:[%s5495_s27 + $0xd8] sm:$0xff] }
 0x137   : > { %v3569_v23 = vadd.f32 %v5013_v60, %v3185_v53  ;;  %v2378_v62 = vpop.f32.mrf.mxu2  ;;  %v1008_v4 = vpop.f32.mrf.mxu0 }
 0x138   : > { %v2670_v2 = vadd.f32 %v2378_v62, %v1385_v57  ;;  %v1387_v9 = vpop.f32.mrf.mxu1  ;;  %v5018_v57 = vunpack.c.h.bf16 %v5240_v25 }
 0x139   : > { %v3697_v8 = vpack.c.bf16 %v3569_v23, %v3569_v23  ;;  %v1388_v14 = vadd.f32 %v1387_v9, %v1008_v4  ;;  %v5241_v9 = vld [vmem:[%s5587_s6 + $0x58] sm:$0xff]  }
 0x13a   : > { %v2802_v24 = vadd.f32 %v5594_v44, %v2670_v2  ;;  %4356 = vmatmul.msk.bf16.gmra.mxu0 %vm756_vm0, %v5804_v63  ;;  %4480 = vmatmul.msk.bf16.gmra.mxu3 %vm756_vm0, %v4884_v1 }
 0x13b   : > { %3826 = vst.msk [vmem:[%s5607_s11 + $0x48] sm:$0xf] %vm3807_vm2, %v3697_v8  ;;  %4448 = vmatmul.msk.bf16.gmra.mxu1 %vm756_vm0, %v5716_v29  ;;  %v5017_v29 = vunpack.c.l.bf16 %v5240_v25 }
 0x13c   : > { %vm2930_vm7 = vcmp.ge.f32.partialorder %v2802_v24, 0.0  ;;  %v3058_v13 = vmul.f32 0.1, %v2802_v24  ;;  %4786 = vmatmul.msk.bf16.gmra.mxu2 %vm756_vm0, %v4926_v7 }
 0x13d   : > { %v5817_v16 = vpop.f32.mrf.mxu3 }
 0x13e   : > { %v3186_v34 = vsel %vm2930_vm7, %v2802_v24, %v3058_v13  ;;  %6693 = vst [vmem:[#allocation4_spill] sm:$0xff] %v5817_v16 }
 0x13f   : > { %v3570_v58 = vadd.f32 %v5014_v12, %v3186_v34  ;;  %v2381_v21 = vpop.f32.mrf.mxu2  ;;  %v1010_v27 = vpop.f32.mrf.mxu0 }
 0x140   : > { %v2671_v22 = vadd.f32 %v2381_v21, %v1388_v14  ;;  %v1389_v30 = vpop.f32.mrf.mxu1 }
 0x141   : > { %v3698_v28 = vpack.c.bf16 %v3570_v58, %v3570_v58  ;;  %v1390_v35 = vadd.f32 %v1389_v30, %v1010_v27 }
 0x142   : > { %v2803_v32 = vadd.f32 %v5594_v44, %v2671_v22 }
 0x143   : > { %3827 = vst.msk [vmem:[%s5607_s11 + $0x4c] sm:$0xf] %vm3807_vm2, %v3698_v28  ;;  %v5848_v28 = vld [vmem:[%s5495_s27 + $0xc0] sm:$0xff] }
 0x144   : > { %vm2931_vm8 = vcmp.ge.f32.partialorder %v2803_v32, 0.0  ;;  %v3059_v56 = vmul.f32 0.1, %v2803_v32 }
 0x145   : > { %v5823_v41 = vpop.f32.mrf.mxu3 }
 0x146   : > { %v3187_v33 = vsel %vm2931_vm8, %v2803_v32, %v3059_v56  ;;  %6694 = vst [vmem:[#allocation5_spill] sm:$0xff] %v5823_v41 }
 0x147   : > { %v3571_v42 = vadd.f32 %v5017_v29, %v3187_v33  ;;  %v2383_v46 = vpop.f32.mrf.mxu2  ;;  %v1013_v37 = vpop.f32.mrf.mxu0  ;;  %v4928_v29 = vld [vmem:[%s5495_s27 + $0xe0] sm:$0xff] }
 0x148   : > { %v2672_v49 = vadd.f32 %v2383_v46, %v1390_v35  ;;  %v1392_v51 = vpop.f32.mrf.mxu1 }
 0x149   : > { %v3699_v60 = vpack.c.bf16 %v3571_v42, %v3571_v42  ;;  %v1393_v62 = vadd.f32 %v1392_v51, %v1013_v37  ;;  %v5022_v42 = vunpack.c.h.bf16 %v5241_v9 }
 0x14a   : > { %v2804_v53 = vadd.f32 %v5594_v44, %v2672_v49  ;;  %4357 = vmatmul.msk.bf16.gmra.mxu0 %vm756_vm0, %v5826_v47  ;;  %4481 = vmatmul.msk.bf16.gmra.mxu3 %vm756_vm0, %v4885_v31 }
 0x14b   : > { %3828 = vst.msk [vmem:[%s5607_s11 + $0x50] sm:$0xf] %vm3807_vm2, %v3699_v60  ;;  %4449 = vmatmul.msk.bf16.gmra.mxu1 %vm756_vm0, %v5738_v3  ;;  %v5021_v3 = vunpack.c.l.bf16 %v5241_v9 }
 0x14c   : > { %vm2932_vm9 = vcmp.ge.f32.partialorder %v2804_v53, 0.0  ;;  %v3060_v23 = vmul.f32 0.1, %v2804_v53  ;;  %4787 = vmatmul.msk.bf16.gmra.mxu2 %vm756_vm0, %v4927_v50 }
 0x14d   : > { %v5839_v2 = vpop.f32.mrf.mxu3 }
 0x14e   : > { %v3188_v1 = vsel %vm2932_vm9, %v2804_v53, %v3060_v23  ;;  %6695 = vst [vmem:[#allocation6_spill] sm:$0xff] %v5839_v2  ;;  %v5242_v53 = vld [vmem:[%s5587_s6 + $0x60] sm:$0xff]  }
 0x14f   : > { %v3572_v4 = vadd.f32 %v5018_v57, %v3188_v1  ;;  %v2386_v7 = vpop.f32.mrf.mxu2  ;;  %v1015_v24 = vpop.f32.mrf.mxu0 }
 0x150   : > { %v2673_v8 = vadd.f32 %v2386_v7, %v1393_v62  ;;  %v1394_v13 = vpop.f32.mrf.mxu1 }
 0x151   : > { %v3700_v12 = vpack.c.bf16 %v3572_v4, %v3572_v4  ;;  %v1395_v21 = vadd.f32 %v1394_v13, %v1015_v24 }
 0x152   : > { %v2805_v14 = vadd.f32 %v5594_v44, %v2673_v8 }
 0x153   : > { %3829 = vst.msk [vmem:[%s5607_s11 + $0x54] sm:$0xf] %vm3807_vm2, %v3700_v12  ;;  %v5870_v12 = vld [vmem:[%s5495_s27 + $0xc8] sm:$0xff] }
 0x154   : > { %vm2933_vm10 = vcmp.ge.f32.partialorder %v2805_v14, 0.0  ;;  %v3061_v34 = vmul.f32 0.1, %v2805_v14 }
 0x155   : > { %v5845_v22 = vpop.f32.mrf.mxu3 }
 0x156   : > { %v3189_v58 = vsel %vm2933_vm10, %v2805_v14, %v3061_v34  ;;  %6696 = vst [vmem:[#allocation7_spill] sm:$0xff] %v5845_v22 }
 0x157   : > { %v3573_v25 = vadd.f32 %v5021_v3, %v3189_v58  ;;  %v2388_v27 = vpop.f32.mrf.mxu2  ;;  %v1018_v32 = vpop.f32.mrf.mxu0  ;;  %v4929_v3 = vld [vmem:[%s5495_s27 + $0xe8] sm:$0xff] }
 0x158   : > { %v2674_v30 = vadd.f32 %v2388_v27, %v1395_v21  ;;  %v1397_v33 = vpop.f32.mrf.mxu1  ;;  %v5346_v27 = vld [vmem:[%s5495_s27 + $0x1a8] sm:$0xff] }
 0x159   : > { %v3701_v56 = vpack.c.bf16 %v3573_v25, %v3573_v25  ;;  %v1398_v31 = vadd.f32 %v1397_v33, %v1018_v32  ;;  %v5026_v25 = vunpack.c.h.bf16 %v5242_v53 }
 0x15a   : > { %v2806_v35 = vadd.f32 %v5594_v44, %v2674_v30  ;;  %4358 = vmatmul.msk.bf16.gmra.mxu0 %vm756_vm0, %v5848_v28  ;;  %4482 = vmatmul.msk.bf16.gmra.mxu3 %vm756_vm0, %v5499_v10 }
 0x15b   : > { %3830 = vst.msk [vmem:[%s5607_s11 + $0x58] sm:$0xf] %vm3807_vm2, %v3701_v56  ;;  %4450 = vmatmul.msk.bf16.gmra.mxu1 %vm756_vm0, %v5760_v45  ;;  %v5025_v45 = vunpack.c.l.bf16 %v5242_v53 }
 0x15c   : > { %vm2934_vm11 = vcmp.ge.f32.partialorder %v2806_v35, 0.0  ;;  %v3062_v46 = vmul.f32 0.1, %v2806_v35  ;;  %4788 = vmatmul.msk.bf16.gmra.mxu2 %vm756_vm0, %v4928_v29 }
 0x15d   : > { %v5861_v37 = vpop.f32.mrf.mxu3 }
 0x15e   : > { %v3190_v49 = vsel %vm2934_vm11, %v2806_v35, %v3062_v46  ;;  %6697 = vst [vmem:[#allocation8_spill] sm:$0xff] %v5861_v37  ;;  %v5243_v46 = vld [vmem:[%s5587_s6 + $0x68] sm:$0xff]  }
 0x15f   : > { %v3574_v50 = vadd.f32 %v5022_v42, %v3190_v49  ;;  %v2391_v60 = vpop.f32.mrf.mxu2  ;;  %v1020_v57 = vpop.f32.mrf.mxu0 }
 0x160   : > { %v2675_v51 = vadd.f32 %v2391_v60, %v1398_v31  ;;  %v1399_v23 = vpop.f32.mrf.mxu1 }
 0x161   : > { %v3702_v10 = vpack.c.bf16 %v3574_v50, %v3574_v50  ;;  %v1400_v7 = vadd.f32 %v1399_v23, %v1020_v57 }
 0x162   : > { %v2807_v62 = vadd.f32 %v5594_v44, %v2675_v51 }
 0x163   : > { %3831 = vst.msk [vmem:[%s5607_s11 + $0x5c] sm:$0xf] %vm3807_vm2, %v3702_v10 }
 0x164   : > { %vm2935_vm12 = vcmp.ge.f32.partialorder %v2807_v62, 0.0  ;;  %v3063_v1 = vmul.f32 0.1, %v2807_v62 }
 0x165   : > { %v5867_v8 = vpop.f32.mrf.mxu3 }
 0x166   : > { %v3191_v4 = vsel %vm2935_vm12, %v2807_v62, %v3063_v1  ;;  %6698 = vst [vmem:[#allocation9_spill] sm:$0xff] %v5867_v8 }
 0x167   : > { %v3575_v9 = vadd.f32 %v5025_v45, %v3191_v4  ;;  %v2393_v24 = vpop.f32.mrf.mxu2  ;;  %v1023_v14 = vpop.f32.mrf.mxu0  ;;  %v5892_v45 = vld [vmem:[%s5495_s27 + $0xd0] sm:$0xff] }
 0x168   : > { %v2676_v13 = vadd.f32 %v2393_v24, %v1400_v7  ;;  %v1402_v58 = vpop.f32.mrf.mxu1  ;;  %v4930_v7 = vld [vmem:[%s5495_s27 + $0xf0] sm:$0xff] }
 0x169   : > { %v3703_v34 = vpack.c.bf16 %v3575_v9, %v3575_v9  ;;  %v1403_v32 = vadd.f32 %v1402_v58, %v1023_v14  ;;  %v5030_v14 = vunpack.c.h.bf16 %v5243_v46 }
 0x16a   : > { %v2808_v21 = vadd.f32 %v5594_v44, %v2676_v13  ;;  %4359 = vmatmul.msk.bf16.gmra.mxu0 %vm756_vm0, %v5870_v12  ;;  %4483 = vmatmul.msk.bf16.gmra.mxu3 %vm756_vm0, %v5346_v27 }
 0x16b   : > { %3832 = vst.msk [vmem:[%s5607_s11 + $0x60] sm:$0xf] %vm3807_vm2, %v3703_v34  ;;  %4451 = vmatmul.msk.bf16.gmra.mxu1 %vm756_vm0, %v5782_v17  ;;  %v5029_v17 = vunpack.c.l.bf16 %v5243_v46 }
 0x16c   : > { %vm2936_vm13 = vcmp.ge.f32.partialorder %v2808_v21, 0.0  ;;  %v3064_v30 = vmul.f32 0.1, %v2808_v21  ;;  %4789 = vmatmul.msk.bf16.gmra.mxu2 %vm756_vm0, %v4929_v3  ;;  %v5347_v3 = vld [vmem:[%s5495_s27 + $0x1b0] sm:$0xff] }
 0x16d   : > { %v5883_v56 = vpop.f32.mrf.mxu3 }
 0x16e   : > { %v3192_v29 = vsel %vm2936_vm13, %v2808_v21, %v3064_v30  ;;  %6699 = vst [vmem:[#allocation10_spill] sm:$0xff] %v5883_v56  ;;  %v4940_v56 = vld [vmem:[%s5495_s27 + $0x140] sm:$0xff] }
 0x16f   : > { %v3576_v33 = vadd.f32 %v5026_v25, %v3192_v29  ;;  %v2396_v35 = vpop.f32.mrf.mxu2  ;;  %v1025_v31 = vpop.f32.mrf.mxu0  ;;  %v5244_v29 = vld [vmem:[%s5587_s6 + $0x70] sm:$0xff]  }
 0x170   : > { %v2677_v42 = vadd.f32 %v2396_v35, %v1403_v32  ;;  %v1404_v50 = vpop.f32.mrf.mxu1 }
 0x171   : > { %v3704_v49 = vpack.c.bf16 %v3576_v33, %v3576_v33  ;;  %v1405_v57 = vadd.f32 %v1404_v50, %v1025_v31  ;;  %v5033_v31 = vunpack.c.l.bf16 %v5244_v29 }
 0x172   : > { %v2809_v60 = vadd.f32 %v5594_v44, %v2677_v42 }
 0x173   : > { %3833 = vst.msk [vmem:[%s5607_s11 + $0x64] sm:$0xf] %vm3807_vm2, %v3704_v49 }
 0x174   : > { %vm2937_vm14 = vcmp.ge.f32.partialorder %v2809_v60, 0.0  ;;  %v3065_v51 = vmul.f32 0.1, %v2809_v60 }
 0x175   : > { %v5889_v10 = vpop.f32.mrf.mxu3 }
 0x176   : > { %v3193_v53 = vsel %vm2937_vm14, %v2809_v60, %v3065_v51  ;;  %6700 = vst [vmem:[#allocation11_spill] sm:$0xff] %v5889_v10 }
 0x177   : > { %v3577_v23 = vadd.f32 %v5029_v17, %v3193_v53  ;;  %v2398_v62 = vpop.f32.mrf.mxu2  ;;  %v1028_v4 = vpop.f32.mrf.mxu0  ;;  %v5914_v53 = vld [vmem:[%s5495_s27 + $0xd8] sm:$0xff] }
 0x178   : > { %v2678_v1 = vadd.f32 %v2398_v62, %v1405_v57  ;;  %v1407_v24 = vpop.f32.mrf.mxu1  ;;  %v4931_v62 = vld [vmem:[%s5495_s27 + $0xf8] sm:$0xff] }
 0x179   : > { %v3705_v9 = vpack.c.bf16 %v3577_v23, %v3577_v23  ;;  %v1408_v58 = vadd.f32 %v1407_v24, %v1028_v4  ;;  %v5920_v4 = vld [vmem:[%s6688_s2] ss:$0 sm:$0xff]  ;;  %v5349_v24 = vld [vmem:[%s5495_s27 + $0x1b8] sm:$0xff] }
 0x17a   : > { %v2810_v13 = vadd.f32 %v5594_v44, %v2678_v1  ;;  %4360 = vmatmul.msk.bf16.gmra.mxu0 %vm756_vm0, %v5892_v45  ;;  %4484 = vmatmul.msk.bf16.gmra.mxu3 %vm756_vm0, %v5347_v3 }
 0x17b   : > { %3834 = vst.msk [vmem:[%s5607_s11 + $0x68] sm:$0xf] %vm3807_vm2, %v3705_v9  ;;  %4452 = vmatmul.msk.bf16.gmra.mxu1 %vm756_vm0, %v5804_v63  ;;  %v5034_v9 = vunpack.c.h.bf16 %v5244_v29 }
 0x17c   : > { %vm2938_vm15 = vcmp.ge.f32.partialorder %v2810_v13, 0.0  ;;  %v3066_v34 = vmul.f32 0.1, %v2810_v13  ;;  %4790 = vmatmul.msk.bf16.gmra.mxu2 %vm756_vm0, %v4930_v7 }
 0x17d   : > { %v5905_v25 = vpop.f32.mrf.mxu3 }
 0x17e   : > { %v3194_v21 = vsel %vm2938_vm15, %v2810_v13, %v3066_v34  ;;  %6701 = vst [vmem:[#allocation12_spill] sm:$0xff] %v5905_v25 }
 0x17f   : > { %v3578_v27 = vadd.f32 %v5030_v14, %v3194_v21  ;;  %v2401_v30 = vpop.f32.mrf.mxu2  ;;  %v1030_v33 = vpop.f32.mrf.mxu0 }
 0x180   : > { %v2679_v32 = vadd.f32 %v2401_v30, %v1408_v58  ;;  %v1409_v42 = vpop.f32.mrf.mxu1  ;;  %v5245_v30 = vld [vmem:[%s5587_s6 + $0x78] sm:$0xff]  }
 0x181   : > { %v3706_v35 = vpack.c.bf16 %v3578_v27, %v3578_v27  ;;  %v1410_v50 = vadd.f32 %v1409_v42, %v1030_v33 }
 0x182   : > { %v2811_v46 = vadd.f32 %v5594_v44, %v2679_v32 }
 0x183   : > { %3835 = vst.msk [vmem:[%s5607_s11 + $0x6c] sm:$0xf] %vm3807_vm2, %v3706_v35 }
 0x184   : > { %vm2939_vm1 = vcmp.ge.f32.partialorder %v2811_v46, 0.0  ;;  %v3067_v63 = vmul.f32 0.1, %v2811_v46 }
 0x185   : > { %v5911_v60 = vpop.f32.mrf.mxu3 }
 0x186   : > { %v3195_v49 = vsel %vm2939_vm1, %v2811_v46, %v3067_v63  ;;  %6702 = vst [vmem:[#allocation13_spill] sm:$0xff] %v5911_v60 }
 0x187   : > { %v3579_v17 = vadd.f32 %v5033_v31, %v3195_v49  ;;  %v2403_v51 = vpop.f32.mrf.mxu2  ;;  %v1033_v23 = vpop.f32.mrf.mxu0 }
 0x188   : > { %v2680_v57 = vadd.f32 %v2403_v51, %v1410_v50  ;;  %v1412_v44 = vpop.f32.mrf.mxu1 }
 0x189   : > { %v3707_v1 = vpack.c.bf16 %v3579_v17, %v3579_v17  ;;  %v1413_v14 = vadd.f32 %v1412_v44, %v1033_v23  ;;  %v5941_v17 = vld [vmem:[%s5495_s27 + $0xe0] sm:$0xff] }
 0x18a   : > { %v2812_v7 = vadd.f32 %v5920_v4, %v2680_v57  ;;  %4361 = vmatmul.msk.bf16.gmra.mxu0 %vm756_vm0, %v5914_v53  ;;  %4485 = vmatmul.msk.bf16.gmra.mxu3 %vm756_vm0, %v5349_v24  ;;  %v4932_v23 = vld [vmem:[%s5495_s27 + $0x100] sm:$0xff] }
 0x18b   : > { %3836 = vst.msk [vmem:[%s5607_s11 + $0x70] sm:$0xf] %vm3807_vm2, %v3707_v1  ;;  %4453 = vmatmul.msk.bf16.gmra.mxu1 %vm756_vm0, %v5826_v47  ;;  %v5037_v47 = vunpack.c.l.bf16 %v5245_v30 }
 0x18c   : > { %vm2940_vm3 = vcmp.ge.f32.partialorder %v2812_v7, 0.0  ;;  %v3068_v13 = vmul.f32 0.1, %v2812_v7  ;;  %4791 = vmatmul.msk.bf16.gmra.mxu2 %vm756_vm0, %v4931_v62 }
 0x18d   : > { %v5932_v34 = vpop.f32.mrf.mxu3 }
 0x18e   : > { %v3196_v3 = vsel %vm2940_vm3, %v2812_v7, %v3068_v13  ;;  %6703 = vst [vmem:[#allocation14_spill] sm:$0xff] %v5932_v34  ;;  %v5038_v7 = vunpack.c.h.bf16 %v5245_v30  ;;  %v5246_v30 = vld [vmem:[%s5587_s6 + $0x80] sm:$0xff]  }
 0x18f   : > { %v3580_v58 = vadd.f32 %v5034_v9, %v3196_v3  ;;  %v2406_v21 = vpop.f32.mrf.mxu2  ;;  %v1035_v32 = vpop.f32.mrf.mxu0  ;;  %v5350_v9 = vld [vmem:[%s5495_s27 + $0x1c0] sm:$0xff] }
 0x190   : > { %v2681_v27 = vadd.f32 %v2406_v21, %v1413_v14  ;;  %v1414_v33 = vpop.f32.mrf.mxu1 }
 0x191   : > { %v3708_v29 = vpack.c.bf16 %v3580_v58, %v3580_v58  ;;  %v1415_v31 = vadd.f32 %v1414_v33, %v1035_v32 }
 0x192   : > { %v2813_v35 = vadd.f32 %v5920_v4, %v2681_v27 }
 0x193   : > { %3837 = vst.msk [vmem:[%s5607_s11 + $0x74] sm:$0xf] %vm3807_vm2, %v3708_v29 }
 0x194   : > { %vm2941_vm4 = vcmp.ge.f32.partialorder %v2813_v35, 0.0  ;;  %v3069_v42 = vmul.f32 0.1, %v2813_v35 }
 0x195   : > { %v5938_v63 = vpop.f32.mrf.mxu3 }
 0x196   : > { %v3197_v46 = vsel %vm2941_vm4, %v2813_v35, %v3069_v42  ;;  %6704 = vst [vmem:[#allocation15_spill] sm:$0xff] %v5938_v63 }
 0x197   : > { %v3581_v49 = vadd.f32 %v5037_v47, %v3197_v46  ;;  %v2408_v50 = vpop.f32.mrf.mxu2  ;;  %v1038_v57 = vpop.f32.mrf.mxu0 }
 0x198   : > { %v2682_v51 = vadd.f32 %v2408_v50, %v1415_v31  ;;  %v1417_v1 = vpop.f32.mrf.mxu1 }
 0x199   : > { %v3709_v62 = vpack.c.bf16 %v3581_v49, %v3581_v49  ;;  %v1418_v13 = vadd.f32 %v1417_v1, %v1038_v57 }
 0x19a   : > { %v2814_v44 = vadd.f32 %v5920_v4, %v2682_v51  ;;  %4362 = vmatmul.msk.bf16.gmra.mxu0 %vm756_vm0, %v5941_v17  ;;  %4486 = vmatmul.msk.bf16.gmra.mxu3 %vm756_vm0, %v5350_v9  ;;  %v5963_v51 = vld [vmem:[%s5495_s27 + $0xe8] sm:$0xff]  ;;  %v5042_v9 = vunpack.c.h.bf16 %v5246_v30 }
 0x19b   : > { %3838 = vst.msk [vmem:[%s5607_s11 + $0x78] sm:$0xf] %vm3807_vm2, %v3709_v62  ;;  %4454 = vmatmul.msk.bf16.gmra.mxu1 %vm756_vm0, %v5848_v28  ;;  %v5041_v28 = vunpack.c.l.bf16 %v5246_v30  ;;  %v4933_v62 = vld [vmem:[%s5495_s27 + $0x108] sm:$0xff] }
 0x19c   : > { %vm2942_vm5 = vcmp.ge.f32.partialorder %v2814_v44, 0.0  ;;  %v3070_v24 = vmul.f32 0.1, %v2814_v44  ;;  %4792 = vmatmul.msk.bf16.gmra.mxu2 %vm756_vm0, %v4932_v23 }
 0x19d   : > { %v5954_v3 = vpop.f32.mrf.mxu3 }
 0x19e   : > { %v3198_v14 = vsel %vm2942_vm5, %v2814_v44, %v3070_v24  ;;  %v5351_v24 = vld [vmem:[%s5495_s27 + $0x1c8] sm:$0xff] }
 0x19f   : > { %v3582_v58 = vadd.f32 %v5038_v7, %v3198_v14  ;;  %v2411_v21 = vpop.f32.mrf.mxu2  ;;  %v1040_v32 = vpop.f32.mrf.mxu0 }
 0x1a0   : > { %v2683_v27 = vadd.f32 %v2411_v21, %v1418_v13  ;;  %v1419_v33 = vpop.f32.mrf.mxu1 }
 0x1a1   : > { %v3710_v29 = vpack.c.bf16 %v3582_v58, %v3582_v58  ;;  %v1420_v46 = vadd.f32 %v1419_v33, %v1040_v32 }
 0x1a2   : > { %v2815_v35 = vadd.f32 %v5920_v4, %v2683_v27 }
 0x1a3   : > { %3839 = vst.msk [vmem:[%s5607_s11 + $0x7c] sm:$0xf] %vm3807_vm2, %v3710_v29  ;;  %v5247_v29 = vld [vmem:[%s5587_s6 + $0x88] sm:$0xff]  }
 0x1a4   : > { %vm2943_vm6 = vcmp.ge.f32.partialorder %v2815_v35, 0.0  ;;  %v3071_v47 = vmul.f32 0.1, %v2815_v35 }
 0x1a5   : > { %v5960_v31 = vpop.f32.mrf.mxu3 }
 0x1a6   : > { %v3199_v42 = vsel %vm2943_vm6, %v2815_v35, %v3071_v47 }
 0x1a7   : > { %v3583_v49 = vadd.f32 %v5041_v28, %v3199_v42  ;;  %v2413_v50 = vpop.f32.mrf.mxu2  ;;  %v1043_v23 = vpop.f32.mrf.mxu0 }
 0x1a8   : > { %v2684_v57 = vadd.f32 %v2413_v50, %v1420_v46  ;;  %v1422_v44 = vpop.f32.mrf.mxu1 }
 0x1a9   : > { %v3711_v1 = vpack.c.bf16 %v3583_v49, %v3583_v49  ;;  %v1423_v14 = vadd.f32 %v1422_v44, %v1043_v23 }
 0x1aa   : > { %v2816_v7 = vadd.f32 %v5920_v4, %v2684_v57  ;;  %4363 = vmatmul.msk.bf16.gmra.mxu0 %vm756_vm0, %v5963_v51  ;;  %4487 = vmatmul.msk.bf16.gmra.mxu3 %vm756_vm0, %v5351_v24 }
 0x1ab   : > { %3840 = vst.msk [vmem:[%s5607_s11 + $0x80] sm:$0xf] %vm3807_vm2, %v3711_v1  ;;  %4455 = vmatmul.msk.bf16.gmra.mxu1 %vm756_vm0, %v5870_v12  ;;  %v5045_v12 = vunpack.c.l.bf16 %v5247_v29 }
 0x1ac   : > { %vm2944_vm7 = vcmp.ge.f32.partialorder %v2816_v7, 0.0  ;;  %v3072_v13 = vmul.f32 0.1, %v2816_v7  ;;  %4793 = vmatmul.msk.bf16.gmra.mxu2 %vm756_vm0, %v4933_v62  ;;  %v5985_v62 = vld [vmem:[%s5495_s27 + $0xf0] sm:$0xff] }
 0x1ad   : > { %v5976_v21 = vpop.f32.mrf.mxu3 }
 0x1ae   : > { %v3200_v58 = vsel %vm2944_vm7, %v2816_v7, %v3072_v13  ;;  %v4934_v7 = vld [vmem:[%s5495_s27 + $0x110] sm:$0xff] }
 0x1af   : > { %v3584_v27 = vadd.f32 %v5042_v9, %v3200_v58  ;;  %v2416_v30 = vpop.f32.mrf.mxu2  ;;  %v1045_v33 = vpop.f32.mrf.mxu0  ;;  %v5352_v58 = vld [vmem:[%s5495_s27 + $0x1d0] sm:$0xff] }
 0x1b0   : > { %v2685_v32 = vadd.f32 %v2416_v30, %v1423_v14  ;;  %v1424_v28 = vpop.f32.mrf.mxu1  ;;  %v5046_v14 = vunpack.c.h.bf16 %v5247_v29 }
 0x1b1   : > { %v3712_v35 = vpack.c.bf16 %v3584_v27, %v3584_v27  ;;  %v1425_v49 = vadd.f32 %v1424_v28, %v1045_v33 }
 0x1b2   : > { %v2817_v47 = vadd.f32 %v5920_v4, %v2685_v32 }
 0x1b3   : > { %3841 = vst.msk [vmem:[%s5607_s11 + $0x84] sm:$0xf] %vm3807_vm2, %v3712_v35 }
 0x1b4   : > { %vm2945_vm8 = vcmp.ge.f32.partialorder %v2817_v47, 0.0  ;;  %v3073_v42 = vmul.f32 0.1, %v2817_v47 }
 0x1b5   : > { %v5982_v50 = vpop.f32.mrf.mxu3 }
 0x1b6   : > { %v3201_v46 = vsel %vm2945_vm8, %v2817_v47, %v3073_v42  ;;  %v5248_v47 = vld [vmem:[%s5587_s6 + $0x90] sm:$0xff]  }
 0x1b7   : > { %v3585_v57 = vadd.f32 %v5045_v12, %v3201_v46  ;;  %v2418_v23 = vpop.f32.mrf.mxu2  ;;  %v1048_v44 = vpop.f32.mrf.mxu0 }
 0x1b8   : > { %v2686_v1 = vadd.f32 %v2418_v23, %v1425_v49  ;;  %v1427_v24 = vpop.f32.mrf.mxu1 }
 0x1b9   : > { %v3713_v9 = vpack.c.bf16 %v3585_v57, %v3585_v57  ;;  %v1428_v30 = vadd.f32 %v1427_v24, %v1048_v44  ;;  %v6007_v24 = vld [vmem:[%s5495_s27 + $0xf8] sm:$0xff] }
 0x1ba   : > { %v2818_v13 = vadd.f32 %v5920_v4, %v2686_v1  ;;  %4364 = vmatmul.msk.bf16.gmra.mxu0 %vm756_vm0, %v5985_v62  ;;  %4488 = vmatmul.msk.bf16.gmra.mxu3 %vm756_vm0, %v5352_v58  ;;  %v4935_v58 = vld [vmem:[%s5495_s27 + $0x118] sm:$0xff] }
 0x1bb   : > { %3842 = vst.msk [vmem:[%s5607_s11 + $0x88] sm:$0xf] %vm3807_vm2, %v3713_v9  ;;  %4456 = vmatmul.msk.bf16.gmra.mxu1 %vm756_vm0, %v5892_v45  ;;  %v5049_v45 = vunpack.c.l.bf16 %v5248_v47 }
 0x1bc   : > { %vm2946_vm9 = vcmp.ge.f32.partialorder %v2818_v13, 0.0  ;;  %v3074_v27 = vmul.f32 0.1, %v2818_v13  ;;  %4794 = vmatmul.msk.bf16.gmra.mxu2 %vm756_vm0, %v4934_v7 }
 0x1bd   : > { %v5998_v33 = vpop.f32.mrf.mxu3 }
 0x1be   : > { %v3202_v32 = vsel %vm2946_vm9, %v2818_v13, %v3074_v27 }
 0x1bf   : > { %v3586_v35 = vadd.f32 %v5046_v14, %v3202_v32  ;;  %v2421_v29 = vpop.f32.mrf.mxu2  ;;  %v1050_v12 = vpop.f32.mrf.mxu0 }
 0x1c0   : > { %v2687_v28 = vadd.f32 %v2421_v29, %v1428_v30  ;;  %v1429_v46 = vpop.f32.mrf.mxu1  ;;  %v5353_v29 = vld [vmem:[%s5495_s27 + $0x1d8] sm:$0xff] }
 0x1c1   : > { %v3714_v42 = vpack.c.bf16 %v3586_v35, %v3586_v35  ;;  %v1430_v1 = vadd.f32 %v1429_v46, %v1050_v12  ;;  %v5050_v35 = vunpack.c.h.bf16 %v5248_v47 }
 0x1c2   : > { %v2819_v49 = vadd.f32 %v5920_v4, %v2687_v28 }
 0x1c3   : > { %3843 = vst.msk [vmem:[%s5607_s11 + $0x8c] sm:$0xf] %vm3807_vm2, %v3714_v42 }
 0x1c4   : > { %vm2947_vm10 = vcmp.ge.f32.partialorder %v2819_v49, 0.0  ;;  %v3075_v57 = vmul.f32 0.1, %v2819_v49 }
 0x1c5   : > { %v6004_v44 = vpop.f32.mrf.mxu3 }
 0x1c6   : > { %v3203_v23 = vsel %vm2947_vm10, %v2819_v49, %v3075_v57  ;;  %v5249_v57 = vld [vmem:[%s5587_s6 + $0x98] sm:$0xff]  }
 0x1c7   : > { %v3587_v7 = vadd.f32 %v5049_v45, %v3203_v23  ;;  %v2423_v9 = vpop.f32.mrf.mxu2  ;;  %v1053_v14 = vpop.f32.mrf.mxu0 }
 0x1c8   : > { %v2688_v13 = vadd.f32 %v2423_v9, %v1430_v1  ;;  %v1432_v30 = vpop.f32.mrf.mxu1 }
 0x1c9   : > { %v3715_v27 = vpack.c.bf16 %v3587_v7, %v3587_v7  ;;  %v1433_v12 = vadd.f32 %v1432_v30, %v1053_v14 }
 0x1ca   : > { %v2820_v32 = vadd.f32 %v5920_v4, %v2688_v13  ;;  %4365 = vmatmul.msk.bf16.gmra.mxu0 %vm756_vm0, %v6007_v24  ;;  %4489 = vmatmul.msk.bf16.gmra.mxu3 %vm756_vm0, %v5353_v29 }
 0x1cb   : > { %3844 = vst.msk [vmem:[%s5607_s11 + $0x90] sm:$0xf] %vm3807_vm2, %v3715_v27  ;;  %4457 = vmatmul.msk.bf16.gmra.mxu1 %vm756_vm0, %v5914_v53  ;;  %v5053_v53 = vunpack.c.l.bf16 %v5249_v57 }
 0x1cc   : > { %vm2948_vm11 = vcmp.ge.f32.partialorder %v2820_v32, 0.0  ;;  %v3076_v28 = vmul.f32 0.1, %v2820_v32  ;;  %4795 = vmatmul.msk.bf16.gmra.mxu2 %vm756_vm0, %v4935_v58 }
 0x1cd   : > { %v6020_v46 = vpop.f32.mrf.mxu3 }
 0x1ce   : > { %v3204_v42 = vsel %vm2948_vm11, %v2820_v32, %v3076_v28 }
 0x1cf   : > { %v3588_v49 = vadd.f32 %v5050_v35, %v3204_v42  ;;  %v2426_v47 = vpop.f32.mrf.mxu2  ;;  %v1055_v23 = vpop.f32.mrf.mxu0  ;;  %v6029_v35 = vld [vmem:[%s5495_s27 + $0x100] sm:$0xff] }
 0x1d0   : > { %v2689_v45 = vadd.f32 %v2426_v47, %v1433_v12  ;;  %v1434_v7 = vpop.f32.mrf.mxu1  ;;  %v4936_v12 = vld [vmem:[%s5495_s27 + $0x120] sm:$0xff] }
 0x1d1   : > { %v3716_v1 = vpack.c.bf16 %v3588_v49, %v3588_v49  ;;  %v1435_v58 = vadd.f32 %v1434_v7, %v1055_v23  ;;  %v5354_v23 = vld [vmem:[%s5495_s27 + $0x1e0] sm:$0xff] }
 0x1d2   : > { %v2821_v9 = vadd.f32 %v5920_v4, %v2689_v45  ;;  %v5054_v45 = vunpack.c.h.bf16 %v5249_v57 }
 0x1d3   : > { %3845 = vst.msk [vmem:[%s5607_s11 + $0x94] sm:$0xf] %vm3807_vm2, %v3716_v1 }
 0x1d4   : > { %vm2949_vm12 = vcmp.ge.f32.partialorder %v2821_v9, 0.0  ;;  %v3077_v13 = vmul.f32 0.1, %v2821_v9 }
 0x1d5   : > { %v6026_v27 = vpop.f32.mrf.mxu3 }
 0x1d6   : > { %v3205_v14 = vsel %vm2949_vm12, %v2821_v9, %v3077_v13 }
 0x1d7   : > { %v3589_v30 = vadd.f32 %v5053_v53, %v3205_v14  ;;  %v2428_v32 = vpop.f32.mrf.mxu2  ;;  %v1058_v28 = vpop.f32.mrf.mxu0 }
 0x1d8   : > { %v2690_v29 = vadd.f32 %v2428_v32, %v1435_v58  ;;  %v1437_v49 = vpop.f32.mrf.mxu1  ;;  %v5250_v58 = vld [vmem:[%s5587_s6 + $0xa0] sm:$0xff]  }
 0x1d9   : > { %v3717_v42 = vpack.c.bf16 %v3589_v30, %v3589_v30  ;;  %v1438_v7 = vadd.f32 %v1437_v49, %v1058_v28  ;;  %v5058_v63 = vunpack.c.h.bf16 %v5250_v58 }
 0x1da   : > { %v2822_v47 = vadd.f32 %v5920_v4, %v2690_v29  ;;  %4366 = vmatmul.msk.bf16.gmra.mxu0 %vm756_vm0, %v6029_v35  ;;  %4490 = vmatmul.msk.bf16.gmra.mxu3 %vm756_vm0, %v5354_v23 }
 0x1db   : > { %3846 = vst.msk [vmem:[%s5607_s11 + $0x98] sm:$0xf] %vm3807_vm2, %v3717_v42  ;;  %4458 = vmatmul.msk.bf16.gmra.mxu1 %vm756_vm0, %v5941_v17  ;;  %v5057_v17 = vunpack.c.l.bf16 %v5250_v58 }
 0x1dc   : > { %vm2950_vm13 = vcmp.ge.f32.partialorder %v2822_v47, 0.0  ;;  %v3078_v1 = vmul.f32 0.1, %v2822_v47  ;;  %4796 = vmatmul.msk.bf16.gmra.mxu2 %vm756_vm0, %v4936_v12 }
 0x1dd   : > { %v6042_v53 = vpop.f32.mrf.mxu3 }
 0x1de   : > { %v3206_v9 = vsel %vm2950_vm13, %v2822_v47, %v3078_v1  ;;  %v6051_v1 = vld [vmem:[%s5495_s27 + $0x108] sm:$0xff] }
 0x1df   : > { %v3590_v13 = vadd.f32 %v5054_v45, %v3206_v9  ;;  %v2431_v57 = vpop.f32.mrf.mxu2  ;;  %v1060_v30 = vpop.f32.mrf.mxu0 }
 0x1e0   : > { %v2691_v14 = vadd.f32 %v2431_v57, %v1438_v7  ;;  %v1439_v29 = vpop.f32.mrf.mxu1 }
 0x1e1   : > { %v3718_v32 = vpack.c.bf16 %v3590_v13, %v3590_v13  ;;  %v1440_v49 = vadd.f32 %v1439_v29, %v1060_v30  ;;  %v4937_v13 = vld [vmem:[%s5495_s27 + $0x128] sm:$0xff] }
 0x1e2   : > { %v2823_v42 = vadd.f32 %v5920_v4, %v2691_v14  ;;  %v5355_v30 = vld [vmem:[%s5495_s27 + $0x1e8] sm:$0xff] }
 0x1e3   : > { %3847 = vst.msk [vmem:[%s5607_s11 + $0x9c] sm:$0xf] %vm3807_vm2, %v3718_v32 }
 0x1e4   : > { %vm2951_vm14 = vcmp.ge.f32.partialorder %v2823_v42, 0.0  ;;  %v3079_v28 = vmul.f32 0.1, %v2823_v42 }
 0x1e5   : > { %v6048_v47 = vpop.f32.mrf.mxu3 }
 0x1e6   : > { %v3207_v12 = vsel %vm2951_vm14, %v2823_v42, %v3079_v28 }
 0x1e7   : > { %v3591_v45 = vadd.f32 %v5057_v17, %v3207_v12  ;;  %v2433_v23 = vpop.f32.mrf.mxu2  ;;  %v1063_v9 = vpop.f32.mrf.mxu0 }
 0x1e8   : > { %v2692_v7 = vadd.f32 %v2433_v23, %v1440_v49  ;;  %v1442_v14 = vpop.f32.mrf.mxu1 }
 0x1e9   : > { %v3719_v57 = vpack.c.bf16 %v3591_v45, %v3591_v45  ;;  %v1443_v42 = vadd.f32 %v1442_v14, %v1063_v9  ;;  %v5251_v45 = vld [vmem:[%s5587_s6 + $0xa8] sm:$0xff]  }
 0x1ea   : > { %v2824_v32 = vadd.f32 %v5920_v4, %v2692_v7  ;;  %4367 = vmatmul.msk.bf16.gmra.mxu0 %vm756_vm0, %v6051_v1  ;;  %4491 = vmatmul.msk.bf16.gmra.mxu3 %vm756_vm0, %v5355_v30  ;;  %v5062_v60 = vunpack.c.h.bf16 %v5251_v45 }
 0x1eb   : > { %3848 = vst.msk [vmem:[%s5607_s11 + $0xa0] sm:$0xf] %vm3807_vm2, %v3719_v57  ;;  %4459 = vmatmul.msk.bf16.gmra.mxu1 %vm756_vm0, %v5963_v51  ;;  %v5061_v51 = vunpack.c.l.bf16 %v5251_v45 }
 0x1ec   : > { %vm2952_vm15 = vcmp.ge.f32.partialorder %v2824_v32, 0.0  ;;  %v3080_v29 = vmul.f32 0.1, %v2824_v32  ;;  %4797 = vmatmul.msk.bf16.gmra.mxu2 %vm756_vm0, %v4937_v13 }
 0x1ed   : > { %v6064_v28 = vpop.f32.mrf.mxu3 }
 0x1ee   : > { %v3208_v17 = vsel %vm2952_vm15, %v2824_v32, %v3080_v29 }
 0x1ef   : > { %v3592_v12 = vadd.f32 %v5058_v63, %v3208_v17  ;;  %v2436_v58 = vpop.f32.mrf.mxu2  ;;  %v1065_v23 = vpop.f32.mrf.mxu0 }
 0x1f0   : > { %v2693_v49 = vadd.f32 %v2436_v58, %v1443_v42  ;;  %v1444_v57 = vpop.f32.mrf.mxu1  ;;  %v6073_v42 = vld [vmem:[%s5495_s27 + $0x110] sm:$0xff] }
 0x1f1   : > { %v3720_v7 = vpack.c.bf16 %v3592_v12, %v3592_v12  ;;  %v1445_v14 = vadd.f32 %v1444_v57, %v1065_v23  ;;  %v4938_v58 = vld [vmem:[%s5495_s27 + $0x130] sm:$0xff] }
 0x1f2   : > { %v2825_v30 = vadd.f32 %v5920_v4, %v2693_v49  ;;  %v5356_v23 = vld [vmem:[%s5495_s27 + $0x1f0] sm:$0xff] }
 0x1f3   : > { %3849 = vst.msk [vmem:[%s5607_s11 + $0xa4] sm:$0xf] %vm3807_vm2, %v3720_v7 }
 0x1f4   : > { %vm2953_vm1 = vcmp.ge.f32.partialorder %v2825_v30, 0.0  ;;  %v3081_v9 = vmul.f32 0.1, %v2825_v30 }
 0x1f5   : > { %v6070_v63 = vpop.f32.mrf.mxu3 }
 0x1f6   : > { %v3209_v13 = vsel %vm2953_vm1, %v2825_v30, %v3081_v9 }
 0x1f7   : > { %v3593_v32 = vadd.f32 %v5061_v51, %v3209_v13  ;;  %v2438_v29 = vpop.f32.mrf.mxu2  ;;  %v1068_v12 = vpop.f32.mrf.mxu0 }
 0x1f8   : > { %v2694_v17 = vadd.f32 %v2438_v29, %v1445_v14  ;;  %v1447_v49 = vpop.f32.mrf.mxu1  ;;  %v5252_v14 = vld [vmem:[%s5587_s6 + $0xb0] sm:$0xff]  }
 0x1f9   : > { %v3721_v34 = vpack.c.bf16 %v3593_v32, %v3593_v32  ;;  %v1448_v30 = vadd.f32 %v1447_v49, %v1068_v12  ;;  %v5066_v10 = vunpack.c.h.bf16 %v5252_v14 }
 0x1fa   : > { %v2826_v7 = vadd.f32 %v5920_v4, %v2694_v17  ;;  %4368 = vmatmul.msk.bf16.gmra.mxu0 %vm756_vm0, %v6073_v42  ;;  %4492 = vmatmul.msk.bf16.gmra.mxu3 %vm756_vm0, %v5356_v23 }
 0x1fb   : > { %3850 = vst.msk [vmem:[%s5607_s11 + $0xa8] sm:$0xf] %vm3807_vm2, %v3721_v34  ;;  %4460 = vmatmul.msk.bf16.gmra.mxu1 %vm756_vm0, %v5985_v62  ;;  %v5065_v62 = vunpack.c.l.bf16 %v5252_v14 }
 0x1fc   : > { %vm2954_vm3 = vcmp.ge.f32.partialorder %v2826_v7, 0.0  ;;  %v3082_v57 = vmul.f32 0.1, %v2826_v7  ;;  %4798 = vmatmul.msk.bf16.gmra.mxu2 %vm756_vm0, %v4938_v58 }
 0x1fd   : > { %v6086_v9 = vpop.f32.mrf.mxu3 }
 0x1fe   : > { %v3210_v51 = vsel %vm2954_vm3, %v2826_v7, %v3082_v57 }
 0x1ff   : > { %v3594_v34 = vadd.f32 %v5062_v60, %v3210_v51  ;;  %v2441_v45 = vpop.f32.mrf.mxu2  ;;  %v1070_v32 = vpop.f32.mrf.mxu0 }
 0x200   : > { %v2695_v13 = vadd.f32 %v2441_v45, %v1448_v30  ;;  %v1449_v17 = vpop.f32.mrf.mxu1  ;;  %v6095_v30 = vld [vmem:[%s5495_s27 + $0x118] sm:$0xff] }
 0x201   : > { %v3722_v29 = vpack.c.bf16 %v3594_v34, %v3594_v34  ;;  %v1450_v49 = vadd.f32 %v1449_v17, %v1070_v32  ;;  %v4939_v45 = vld [vmem:[%s5495_s27 + $0x138] sm:$0xff] }
 0x202   : > { %v2827_v23 = vadd.f32 %v5920_v4, %v2695_v13  ;;  %v5357_v32 = vld [vmem:[%s5495_s27 + $0x1f8] sm:$0xff] }
 0x203   : > { %3851 = vst.msk [vmem:[%s5607_s11 + $0xac] sm:$0xf] %vm3807_vm2, %v3722_v29 }
 0x204   : > { %vm2955_vm4 = vcmp.ge.f32.partialorder %v2827_v23, 0.0  ;;  %v3083_v12 = vmul.f32 0.1, %v2827_v23 }
 0x205   : > { %v6092_v60 = vpop.f32.mrf.mxu3 }
 0x206   : > { %v3211_v58 = vsel %vm2955_vm4, %v2827_v23, %v3083_v12 }
 0x207   : > { %v3595_v7 = vadd.f32 %v5065_v62, %v3211_v58  ;;  %v2443_v57 = vpop.f32.mrf.mxu2  ;;  %v1073_v34 = vpop.f32.mrf.mxu0 }
 0x208   : > { %v2696_v51 = vadd.f32 %v2443_v57, %v1450_v49  ;;  %v1452_v13 = vpop.f32.mrf.mxu1  ;;  %v5253_v49 = vld [vmem:[%s5587_s6 + $0xb8] sm:$0xff]  }
 0x209   : > { %v3723_v25 = vpack.c.bf16 %v3595_v7, %v3595_v7  ;;  %v1453_v23 = vadd.f32 %v1452_v13, %v1073_v34  ;;  %v5070_v37 = vunpack.c.h.bf16 %v5253_v49 }
 0x20a   : > { %v2828_v29 = vadd.f32 %v5920_v4, %v2696_v51  ;;  %4369 = vmatmul.msk.bf16.gmra.mxu0 %vm756_vm0, %v6095_v30  ;;  %4493 = vmatmul.msk.bf16.gmra.mxu3 %vm756_vm0, %v5357_v32 }
 0x20b   : > { %3852 = vst.msk [vmem:[%s5607_s11 + $0xb0] sm:$0xf] %vm3807_vm2, %v3723_v25  ;;  %4461 = vmatmul.msk.bf16.gmra.mxu1 %vm756_vm0, %v6007_v24  ;;  %v5069_v24 = vunpack.c.l.bf16 %v5253_v49 }
 0x20c   : > { %vm2956_vm5 = vcmp.ge.f32.partialorder %v2828_v29, 0.0  ;;  %v3084_v17 = vmul.f32 0.1, %v2828_v29  ;;  %4799 = vmatmul.msk.bf16.gmra.mxu2 %vm756_vm0, %v4939_v45 }
 0x20d   : > { %v6108_v12 = vpop.f32.mrf.mxu3 }
 0x20e   : > { %v3212_v62 = vsel %vm2956_vm5, %v2828_v29, %v3084_v17 }
 0x20f   : > { %v3596_v25 = vadd.f32 %v5066_v10, %v3212_v62  ;;  %v2446_v14 = vpop.f32.mrf.mxu2  ;;  %v1075_v7 = vpop.f32.mrf.mxu0  ;;  %v4956_v62 = vld [vmem:[%s5495_s27 + $0x1c0] sm:$0xff] }
 0x210   : > { %v2697_v58 = vadd.f32 %v2446_v14, %v1453_v23  ;;  %v1454_v51 = vpop.f32.mrf.mxu1  ;;  %v6117_v23 = vld [vmem:[%s5495_s27 + $0x120] sm:$0xff] }
 0x211   : > { %v3724_v57 = vpack.c.bf16 %v3596_v25, %v3596_v25  ;;  %v1455_v29 = vadd.f32 %v1454_v51, %v1075_v7 }
 0x212   : > { %v2829_v34 = vadd.f32 %v5920_v4, %v2697_v58 }
 0x213   : > { %3853 = vst.msk [vmem:[%s5607_s11 + $0xb4] sm:$0xf] %vm3807_vm2, %v3724_v57 }
 0x214   : > { %vm2957_vm6 = vcmp.ge.f32.partialorder %v2829_v34, 0.0  ;;  %v3085_v45 = vmul.f32 0.1, %v2829_v34 }
 0x215   : > { %v6114_v10 = vpop.f32.mrf.mxu3 }
 0x216   : > { %v3213_v13 = vsel %vm2957_vm6, %v2829_v34, %v3085_v45 }
 0x217   : > { %v3597_v32 = vadd.f32 %v5069_v24, %v3213_v13  ;;  %v2448_v17 = vpop.f32.mrf.mxu2  ;;  %v1078_v14 = vpop.f32.mrf.mxu0  ;;  %v5254_v13 = vld [vmem:[%s5587_s6 + $0xc0] sm:$0xff]  }
 0x218   : > { %v2698_v25 = vadd.f32 %v2448_v17, %v1455_v29  ;;  %v1457_v58 = vpop.f32.mrf.mxu1  ;;  %v5074_v2 = vunpack.c.h.bf16 %v5254_v13 }
 0x219   : > { %v3725_v8 = vpack.c.bf16 %v3597_v32, %v3597_v32  ;;  %v1458_v51 = vadd.f32 %v1457_v58, %v1078_v14 }
 0x21a   : > { %v2830_v57 = vadd.f32 %v5920_v4, %v2698_v25  ;;  %4370 = vmatmul.msk.bf16.gmra.mxu0 %vm756_vm0, %v6117_v23  ;;  %4816 = vmatmul.msk.bf16.vlgmr.msra.gmra.mxu3 %vm756_vm0, %v4956_v62 }
 0x21b   : > { %3854 = vst.msk [vmem:[%s5607_s11 + $0xb8] sm:$0xf] %vm3807_vm2, %v3725_v8  ;;  %4462 = vmatmul.msk.bf16.gmra.mxu1 %vm756_vm0, %v6029_v35  ;;  %v5073_v35 = vunpack.c.l.bf16 %v5254_v13 }
 0x21c   : > { %vm2958_vm7 = vcmp.ge.f32.partialorder %v2830_v57, 0.0  ;;  %v3086_v7 = vmul.f32 0.1, %v2830_v57  ;;  %4800 = vmatmul.msk.bf16.gmra.mxu2 %vm756_vm0, %v4940_v56 }
 0x21d   : > { %v6130_v24 = vpop.f32.mrf.mxu3 }
 0x21e   : > { %v3214_v34 = vsel %vm2958_vm7, %v2830_v57, %v3086_v7  ;;  %v6139_v7 = vld [vmem:[%s5495_s27 + $0x128] sm:$0xff] }
 0x21f   : > { %v3598_v45 = vadd.f32 %v5070_v37, %v3214_v34  ;;  %v2451_v8 = vpop.f32.mrf.mxu2  ;;  %v1080_v29 = vpop.f32.mrf.mxu0 }
 0x220   : > { %v2699_v49 = vadd.f32 %v2451_v8, %v1458_v51  ;;  %v1459_v17 = vpop.f32.mrf.mxu1  ;;  %v4957_v51 = vld [vmem:[%s5495_s27 + $0x1c8] sm:$0xff] }
 0x221   : > { %v3726_v32 = vpack.c.bf16 %v3598_v45, %v3598_v45  ;;  %v1460_v14 = vadd.f32 %v1459_v17, %v1080_v29  ;;  %v4941_v8 = vld [vmem:[%s5495_s27 + $0x148] sm:$0xff] }
 0x222   : > { %v2831_v62 = vadd.f32 %v5920_v4, %v2699_v49 }
 0x223   : > { %3855 = vst.msk [vmem:[%s5607_s11 + $0xbc] sm:$0xf] %vm3807_vm2, %v3726_v32 }
 0x224   : > { %vm2959_vm8 = vcmp.ge.f32.partialorder %v2831_v62, 0.0  ;;  %v3087_v56 = vmul.f32 0.1, %v2831_v62 }
 0x225   : > { %v6136_v37 = vpop.f32.mrf.mxu3 }
 0x226   : > { %v3215_v25 = vsel %vm2959_vm8, %v2831_v62, %v3087_v56  ;;  %6705 = vst [vmem:[#allocation16_spill] sm:$0xff] %v6136_v37 }
 0x227   : > { %v3599_v58 = vadd.f32 %v5073_v35, %v3215_v25  ;;  %v2453_v57 = vpop.f32.mrf.mxu2  ;;  %v1083_v45 = vpop.f32.mrf.mxu0  ;;  %v5255_v25 = vld [vmem:[%s5587_s6 + $0xc8] sm:$0xff]  }
 0x228   : > { %v2700_v34 = vadd.f32 %v2453_v57, %v1460_v14  ;;  %v1462_v49 = vpop.f32.mrf.mxu1  ;;  %v5078_v16 = vunpack.c.h.bf16 %v5255_v25 }
 0x229   : > { %v3727_v22 = vpack.c.bf16 %v3599_v58, %v3599_v58  ;;  %v1463_v17 = vadd.f32 %v1462_v49, %v1083_v45 }
 0x22a   : > { %v2832_v32 = vadd.f32 %v5920_v4, %v2700_v34  ;;  %4371 = vmatmul.msk.bf16.gmra.mxu0 %vm756_vm0, %v6139_v7  ;;  %4817 = vmatmul.msk.bf16.gmra.mxu3 %vm756_vm0, %v4957_v51 }
 0x22b   : > { %3856 = vst.msk [vmem:[%s5607_s11 + $0xc0] sm:$0xf] %vm3807_vm2, %v3727_v22  ;;  %4463 = vmatmul.msk.bf16.gmra.mxu1 %vm756_vm0, %v6051_v1  ;;  %v5077_v1 = vunpack.c.l.bf16 %v5255_v25 }
 0x22c   : > { %vm2960_vm9 = vcmp.ge.f32.partialorder %v2832_v32, 0.0  ;;  %v3088_v29 = vmul.f32 0.1, %v2832_v32  ;;  %4801 = vmatmul.msk.bf16.gmra.mxu2 %vm756_vm0, %v4941_v8 }
 0x22d   : > { %v6152_v35 = vpop.f32.mrf.mxu3 }
 0x22e   : > { %v3216_v62 = vsel %vm2960_vm9, %v2832_v32, %v3088_v29  ;;  %6706 = vst [vmem:[#allocation17_spill] sm:$0xff] %v6152_v35  ;;  %v6161_v29 = vld [vmem:[%s5495_s27 + $0x130] sm:$0xff] }
 0x22f   : > { %v3600_v56 = vadd.f32 %v5074_v2, %v3216_v62  ;;  %v2456_v22 = vpop.f32.mrf.mxu2  ;;  %v1085_v14 = vpop.f32.mrf.mxu0 }
 0x230   : > { %v2701_v13 = vadd.f32 %v2456_v22, %v1463_v17  ;;  %v1464_v57 = vpop.f32.mrf.mxu1  ;;  %v4958_v17 = vld [vmem:[%s5495_s27 + $0x1d0] sm:$0xff] }
 0x231   : > { %v3728_v58 = vpack.c.bf16 %v3600_v56, %v3600_v56  ;;  %v1465_v8 = vadd.f32 %v1464_v57, %v1085_v14  ;;  %v4942_v22 = vld [vmem:[%s5495_s27 + $0x150] sm:$0xff] }
 0x232   : > { %v2833_v51 = vadd.f32 %v5920_v4, %v2701_v13 }
 0x233   : > { %3857 = vst.msk [vmem:[%s5607_s11 + $0xc4] sm:$0xf] %vm3807_vm2, %v3728_v58 }
 0x234   : > { %vm2961_vm10 = vcmp.ge.f32.partialorder %v2833_v51, 0.0  ;;  %v3089_v34 = vmul.f32 0.1, %v2833_v51 }
 0x235   : > { %v6158_v2 = vpop.f32.mrf.mxu3 }
 0x236   : > { %v3217_v45 = vsel %vm2961_vm10, %v2833_v51, %v3089_v34  ;;  %6707 = vst [vmem:[#allocation18_spill] sm:$0xff] %v6158_v2 }
 0x237   : > { %v3601_v49 = vadd.f32 %v5077_v1, %v3217_v45  ;;  %v2458_v32 = vpop.f32.mrf.mxu2  ;;  %v1088_v56 = vpop.f32.mrf.mxu0  ;;  %v5256_v45 = vld [vmem:[%s5587_s6 + $0xd0] sm:$0xff]  }
 0x238   : > { %v2702_v62 = vadd.f32 %v2458_v32, %v1465_v8  ;;  %v1467_v13 = vpop.f32.mrf.mxu1  ;;  %v5082_v2 = vunpack.c.h.bf16 %v5256_v45 }
 0x239   : > { %v3729_v41 = vpack.c.bf16 %v3601_v49, %v3601_v49  ;;  %v1468_v57 = vadd.f32 %v1467_v13, %v1088_v56 }
 0x23a   : > { %v2834_v58 = vadd.f32 %v5920_v4, %v2702_v62  ;;  %4372 = vmatmul.msk.bf16.gmra.mxu0 %vm756_vm0, %v6161_v29  ;;  %4818 = vmatmul.msk.bf16.gmra.mxu3 %vm756_vm0, %v4958_v17 }
 0x23b   : > { %3858 = vst.msk [vmem:[%s5607_s11 + $0xc8] sm:$0xf] %vm3807_vm2, %v3729_v41  ;;  %4464 = vmatmul.msk.bf16.gmra.mxu1 %vm756_vm0, %v6073_v42  ;;  %v5081_v42 = vunpack.c.l.bf16 %v5256_v45 }
 0x23c   : > { %vm2962_vm11 = vcmp.ge.f32.partialorder %v2834_v58, 0.0  ;;  %v3090_v14 = vmul.f32 0.1, %v2834_v58  ;;  %4802 = vmatmul.msk.bf16.gmra.mxu2 %vm756_vm0, %v4942_v22 }
 0x23d   : > { %v6174_v1 = vpop.f32.mrf.mxu3 }
 0x23e   : > { %v3218_v51 = vsel %vm2962_vm11, %v2834_v58, %v3090_v14  ;;  %6708 = vst [vmem:[#allocation19_spill] sm:$0xff] %v6174_v1  ;;  %v6183_v14 = vld [vmem:[%s5495_s27 + $0x138] sm:$0xff] }
 0x23f   : > { %v3602_v34 = vadd.f32 %v5078_v16, %v3218_v51  ;;  %v2461_v41 = vpop.f32.mrf.mxu2  ;;  %v1090_v8 = vpop.f32.mrf.mxu0 }
 0x240   : > { %v2703_v25 = vadd.f32 %v2461_v41, %v1468_v57  ;;  %v1469_v32 = vpop.f32.mrf.mxu1  ;;  %v4959_v57 = vld [vmem:[%s5495_s27 + $0x1d8] sm:$0xff] }
 0x241   : > { %v3730_v49 = vpack.c.bf16 %v3602_v34, %v3602_v34  ;;  %v1470_v22 = vadd.f32 %v1469_v32, %v1090_v8  ;;  %v4943_v41 = vld [vmem:[%s5495_s27 + $0x158] sm:$0xff] }
 0x242   : > { %v2835_v17 = vadd.f32 %v5920_v4, %v2703_v25 }
 0x243   : > { %3859 = vst.msk [vmem:[%s5607_s11 + $0xcc] sm:$0xf] %vm3807_vm2, %v3730_v49 }
 0x244   : > { %vm2963_vm12 = vcmp.ge.f32.partialorder %v2835_v17, 0.0  ;;  %v3091_v62 = vmul.f32 0.1, %v2835_v17 }
 0x245   : > { %v6180_v16 = vpop.f32.mrf.mxu3 }
 0x246   : > { %v3219_v56 = vsel %vm2963_vm12, %v2835_v17, %v3091_v62  ;;  %6709 = vst [vmem:[#allocation20_spill] sm:$0xff] %v6180_v16 }
 0x247   : > { %v3603_v13 = vadd.f32 %v5081_v42, %v3219_v56  ;;  %v2463_v58 = vpop.f32.mrf.mxu2  ;;  %v1093_v34 = vpop.f32.mrf.mxu0  ;;  %v5257_v56 = vld [vmem:[%s5587_s6 + $0xd8] sm:$0xff]  }
 0x248   : > { %v2704_v51 = vadd.f32 %v2463_v58, %v1470_v22  ;;  %v1472_v25 = vpop.f32.mrf.mxu1  ;;  %v5086_v16 = vunpack.c.h.bf16 %v5257_v56 }
 0x249   : > { %v3731_v1 = vpack.c.bf16 %v3603_v13, %v3603_v13  ;;  %v1473_v32 = vadd.f32 %v1472_v25, %v1093_v34 }
 0x24a   : > { %v2836_v49 = vadd.f32 %v5920_v4, %v2704_v51  ;;  %4373 = vmatmul.msk.bf16.gmra.mxu0 %vm756_vm0, %v6183_v14  ;;  %4819 = vmatmul.msk.bf16.gmra.mxu3 %vm756_vm0, %v4959_v57 }
 0x24b   : > { %3860 = vst.msk [vmem:[%s5607_s11 + $0xd0] sm:$0xf] %vm3807_vm2, %v3731_v1  ;;  %4465 = vmatmul.msk.bf16.gmra.mxu1 %vm756_vm0, %v6095_v30  ;;  %v5085_v30 = vunpack.c.l.bf16 %v5257_v56 }
 0x24c   : > { %vm2964_vm13 = vcmp.ge.f32.partialorder %v2836_v49, 0.0  ;;  %v3092_v8 = vmul.f32 0.1, %v2836_v49  ;;  %4803 = vmatmul.msk.bf16.gmra.mxu2 %vm756_vm0, %v4943_v41 }
 0x24d   : > { %v6196_v42 = vpop.f32.mrf.mxu3 }
 0x24e   : > { %v3220_v17 = vsel %vm2964_vm13, %v2836_v49, %v3092_v8  ;;  %6710 = vst [vmem:[#allocation21_spill] sm:$0xff] %v6196_v42  ;;  %v6205_v8 = vld [vmem:[%s5495_s27 + $0x140] sm:$0xff] }
 0x24f   : > { %v3604_v62 = vadd.f32 %v5082_v2, %v3220_v17  ;;  %v2466_v1 = vpop.f32.mrf.mxu2  ;;  %v1095_v22 = vpop.f32.mrf.mxu0 }
 0x250   : > { %v2705_v45 = vadd.f32 %v2466_v1, %v1473_v32  ;;  %v1474_v58 = vpop.f32.mrf.mxu1  ;;  %v4960_v32 = vld [vmem:[%s5495_s27 + $0x1e0] sm:$0xff] }
 0x251   : > { %v3732_v13 = vpack.c.bf16 %v3604_v62, %v3604_v62  ;;  %v1475_v41 = vadd.f32 %v1474_v58, %v1095_v22  ;;  %v4944_v1 = vld [vmem:[%s5495_s27 + $0x160] sm:$0xff] }
 0x252   : > { %v2837_v57 = vadd.f32 %v5920_v4, %v2705_v45 }
 0x253   : > { %3861 = vst.msk [vmem:[%s5607_s11 + $0xd4] sm:$0xf] %vm3807_vm2, %v3732_v13 }
 0x254   : > { %vm2965_vm14 = vcmp.ge.f32.partialorder %v2837_v57, 0.0  ;;  %v3093_v51 = vmul.f32 0.1, %v2837_v57 }
 0x255   : > { %v6202_v2 = vpop.f32.mrf.mxu3 }
 0x256   : > { %v3221_v34 = vsel %vm2965_vm14, %v2837_v57, %v3093_v51  ;;  %6711 = vst [vmem:[#allocation22_spill] sm:$0xff] %v6202_v2 }
 0x257   : > { %v3605_v25 = vadd.f32 %v5085_v30, %v3221_v34  ;;  %v2468_v49 = vpop.f32.mrf.mxu2  ;;  %v1098_v62 = vpop.f32.mrf.mxu0  ;;  %v5258_v34 = vld [vmem:[%s5587_s6 + $0xe0] sm:$0xff]  }
 0x258   : > { %v2706_v17 = vadd.f32 %v2468_v49, %v1475_v41  ;;  %v1477_v45 = vpop.f32.mrf.mxu1  ;;  %v5090_v2 = vunpack.c.h.bf16 %v5258_v34 }
 0x259   : > { %v3733_v42 = vpack.c.bf16 %v3605_v25, %v3605_v25  ;;  %v1478_v58 = vadd.f32 %v1477_v45, %v1098_v62 }
 0x25a   : > { %v2838_v13 = vadd.f32 %v5920_v4, %v2706_v17  ;;  %4374 = vmatmul.msk.bf16.gmra.mxu0 %vm756_vm0, %v6205_v8  ;;  %4820 = vmatmul.msk.bf16.gmra.mxu3 %vm756_vm0, %v4960_v32 }
 0x25b   : > { %3862 = vst.msk [vmem:[%s5607_s11 + $0xd8] sm:$0xf] %vm3807_vm2, %v3733_v42  ;;  %4466 = vmatmul.msk.bf16.gmra.mxu1 %vm756_vm0, %v6117_v23  ;;  %v5089_v23 = vunpack.c.l.bf16 %v5258_v34 }
 0x25c   : > { %vm2966_vm15 = vcmp.ge.f32.partialorder %v2838_v13, 0.0  ;;  %v3094_v22 = vmul.f32 0.1, %v2838_v13  ;;  %4804 = vmatmul.msk.bf16.gmra.mxu2 %vm756_vm0, %v4944_v1 }
 0x25d   : > { %v6218_v30 = vpop.f32.mrf.mxu3 }
 0x25e   : > { %v3222_v57 = vsel %vm2966_vm15, %v2838_v13, %v3094_v22  ;;  %6712 = vst [vmem:[#allocation23_spill] sm:$0xff] %v6218_v30  ;;  %v6227_v22 = vld [vmem:[%s5495_s27 + $0x148] sm:$0xff] }
 0x25f   : > { %v3606_v51 = vadd.f32 %v5086_v16, %v3222_v57  ;;  %v2471_v42 = vpop.f32.mrf.mxu2  ;;  %v1100_v41 = vpop.f32.mrf.mxu0 }
 0x260   : > { %v2707_v56 = vadd.f32 %v2471_v42, %v1478_v58  ;;  %v1479_v49 = vpop.f32.mrf.mxu1  ;;  %v4961_v58 = vld [vmem:[%s5495_s27 + $0x1e8] sm:$0xff] }
 0x261   : > { %v3734_v25 = vpack.c.bf16 %v3606_v51, %v3606_v51  ;;  %v1480_v1 = vadd.f32 %v1479_v49, %v1100_v41  ;;  %v4945_v42 = vld [vmem:[%s5495_s27 + $0x168] sm:$0xff] }
 0x262   : > { %v2839_v32 = vadd.f32 %v5920_v4, %v2707_v56 }
 0x263   : > { %3863 = vst.msk [vmem:[%s5607_s11 + $0xdc] sm:$0xf] %vm3807_vm2, %v3734_v25 }
 0x264   : > { %vm2967_vm1 = vcmp.ge.f32.partialorder %v2839_v32, 0.0  ;;  %v3095_v17 = vmul.f32 0.1, %v2839_v32 }
 0x265   : > { %v6224_v16 = vpop.f32.mrf.mxu3 }
 0x266   : > { %v3223_v62 = vsel %vm2967_vm1, %v2839_v32, %v3095_v17  ;;  %6713 = vst [vmem:[#allocation24_spill] sm:$0xff] %v6224_v16  ;;  %v5259_v17 = vld [vmem:[%s5587_s6 + $0xe8] sm:$0xff]  }
 0x267   : > { %v3607_v45 = vadd.f32 %v5089_v23, %v3223_v62  ;;  %v2473_v13 = vpop.f32.mrf.mxu2  ;;  %v1103_v51 = vpop.f32.mrf.mxu0  ;;  %v5094_v16 = vunpack.c.h.bf16 %v5259_v17 }
 0x268   : > { %v2708_v57 = vadd.f32 %v2473_v13, %v1480_v1  ;;  %v1482_v56 = vpop.f32.mrf.mxu1  ;;  %v6246_v13 = vld [vmem:[%s6688_s2] ss:$0 sm:$0xff] }
 0x269   : > { %v3735_v30 = vpack.c.bf16 %v3607_v45, %v3607_v45  ;;  %v1483_v49 = vadd.f32 %v1482_v56, %v1103_v51 }
 0x26a   : > { %v2840_v25 = vadd.f32 %v5920_v4, %v2708_v57  ;;  %4375 = vmatmul.msk.bf16.gmra.mxu0 %vm756_vm0, %v6227_v22  ;;  %4821 = vmatmul.msk.bf16.gmra.mxu3 %vm756_vm0, %v4961_v58  ;;  %v5093_v58 = vunpack.c.l.bf16 %v5259_v17 }
 0x26b   : > { %3864 = vst.msk [vmem:[%s5607_s11 + $0xe0] sm:$0xf] %vm3807_vm2, %v3735_v30  ;;  %4467 = vmatmul.msk.bf16.gmra.mxu1 %vm756_vm0, %v6139_v7 }
 0x26c   : > { %vm2968_vm3 = vcmp.ge.f32.partialorder %v2840_v25, 0.0  ;;  %v3096_v41 = vmul.f32 0.1, %v2840_v25  ;;  %4805 = vmatmul.msk.bf16.gmra.mxu2 %vm756_vm0, %v4945_v42 }
 0x26d   : > { %v6240_v23 = vpop.f32.mrf.mxu3 }
 0x26e   : > { %v3224_v32 = vsel %vm2968_vm3, %v2840_v25, %v3096_v41  ;;  %6714 = vst [vmem:[#allocation25_spill] sm:$0xff] %v6240_v23  ;;  %v6254_v41 = vld [vmem:[%s5495_s27 + $0x150] sm:$0xff] }
 0x26f   : > { %v3608_v4 = vadd.f32 %v5090_v2, %v3224_v32  ;;  %v2476_v30 = vpop.f32.mrf.mxu2  ;;  %v1105_v62 = vpop.f32.mrf.mxu0 }
 0x270   : > { %v2709_v34 = vadd.f32 %v2476_v30, %v1483_v49  ;;  %v1484_v45 = vpop.f32.mrf.mxu1  ;;  %v4962_v49 = vld [vmem:[%s5495_s27 + $0x1f0] sm:$0xff] }
 0x271   : > { %v3736_v1 = vpack.c.bf16 %v3608_v4, %v3608_v4  ;;  %v1485_v51 = vadd.f32 %v1484_v45, %v1105_v62  ;;  %v4946_v30 = vld [vmem:[%s5495_s27 + $0x170] sm:$0xff] }
 0x272   : > { %v2841_v7 = vadd.f32 %v6246_v13, %v2709_v34 }
 0x273   : > { %3865 = vst.msk [vmem:[%s5607_s11 + $0xe4] sm:$0xf] %vm3807_vm2, %v3736_v1 }
 0x274   : > { %vm2969_vm4 = vcmp.ge.f32.partialorder %v2841_v7, 0.0  ;;  %v3097_v2 = vmul.f32 0.1, %v2841_v7 }
 0x275   : > { %v6251_v42 = vpop.f32.mrf.mxu3 }
 0x276   : > { %v3225_v57 = vsel %vm2969_vm4, %v2841_v7, %v3097_v2  ;;  %6715 = vst [vmem:[#allocation26_spill] sm:$0xff] %v6251_v42 }
 0x277   : > { %v3609_v56 = vadd.f32 %v5093_v58, %v3225_v57  ;;  %v2478_v25 = vpop.f32.mrf.mxu2  ;;  %v1108_v4 = vpop.f32.mrf.mxu0  ;;  %v5260_v57 = vld [vmem:[%s5587_s6 + $0xf0] sm:$0xff]  }
 0x278   : > { %v2710_v32 = vadd.f32 %v2478_v25, %v1485_v51  ;;  %v1487_v34 = vpop.f32.mrf.mxu1  ;;  %v5098_v42 = vunpack.c.h.bf16 %v5260_v57 }
 0x279   : > { %v3737_v23 = vpack.c.bf16 %v3609_v56, %v3609_v56  ;;  %v1488_v45 = vadd.f32 %v1487_v34, %v1108_v4 }
 0x27a   : > { %v2842_v1 = vadd.f32 %v6246_v13, %v2710_v32  ;;  %4376 = vmatmul.msk.bf16.gmra.mxu0 %vm756_vm0, %v6254_v41  ;;  %4822 = vmatmul.msk.bf16.gmra.mxu3 %vm756_vm0, %v4962_v49 }
 0x27b   : > { %3866 = vst.msk [vmem:[%s5607_s11 + $0xe8] sm:$0xf] %vm3807_vm2, %v3737_v23  ;;  %4468 = vmatmul.msk.bf16.gmra.mxu1 %vm756_vm0, %v6161_v29  ;;  %v5097_v29 = vunpack.c.l.bf16 %v5260_v57 }
 0x27c   : > { %vm2970_vm5 = vcmp.ge.f32.partialorder %v2842_v1, 0.0  ;;  %v3098_v62 = vmul.f32 0.1, %v2842_v1  ;;  %4806 = vmatmul.msk.bf16.gmra.mxu2 %vm756_vm0, %v4946_v30 }
 0x27d   : > { %v6267_v58 = vpop.f32.mrf.mxu3 }
 0x27e   : > { %v3226_v7 = vsel %vm2970_vm5, %v2842_v1, %v3098_v62  ;;  %6716 = vst [vmem:[#allocation27_spill] sm:$0xff] %v6267_v58  ;;  %v6276_v62 = vld [vmem:[%s5495_s27 + $0x158] sm:$0xff] }
 0x27f   : > { %v3610_v2 = vadd.f32 %v5094_v16, %v3226_v7  ;;  %v2481_v23 = vpop.f32.mrf.mxu2  ;;  %v1110_v51 = vpop.f32.mrf.mxu0 }
 0x280   : > { %v2711_v17 = vadd.f32 %v2481_v23, %v1488_v45  ;;  %v1489_v25 = vpop.f32.mrf.mxu1  ;;  %v4963_v45 = vld [vmem:[%s5495_s27 + $0x1f8] sm:$0xff] }
 0x281   : > { %v3738_v56 = vpack.c.bf16 %v3610_v2, %v3610_v2  ;;  %v1490_v30 = vadd.f32 %v1489_v25, %v1110_v51  ;;  %v4947_v23 = vld [vmem:[%s5495_s27 + $0x178] sm:$0xff] }
 0x282   : > { %v2843_v49 = vadd.f32 %v6246_v13, %v2711_v17 }
 0x283   : > { %3867 = vst.msk [vmem:[%s5607_s11 + $0xec] sm:$0xf] %vm3807_vm2, %v3738_v56 }
 0x284   : > { %vm2971_vm6 = vcmp.ge.f32.partialorder %v2843_v49, 0.0  ;;  %v3099_v32 = vmul.f32 0.1, %v2843_v49 }
 0x285   : > { %v6273_v16 = vpop.f32.mrf.mxu3 }
 0x286   : > { %v3227_v4 = vsel %vm2971_vm6, %v2843_v49, %v3099_v32  ;;  %6717 = vst [vmem:[#allocation28_spill] sm:$0xff] %v6273_v16 }
 0x287   : > { %v3611_v34 = vadd.f32 %v5097_v29, %v3227_v4  ;;  %v2483_v1 = vpop.f32.mrf.mxu2  ;;  %v1113_v2 = vpop.f32.mrf.mxu0  ;;  %v5261_v4 = vld [vmem:[%s5587_s6 + $0xf8] sm:$0xff]  }
 0x288   : > { %v2712_v7 = vadd.f32 %v2483_v1, %v1490_v30  ;;  %v1492_v17 = vpop.f32.mrf.mxu1  ;;  %v5102_v16 = vunpack.c.h.bf16 %v5261_v4 }
 0x289   : > { %v3739_v58 = vpack.c.bf16 %v3611_v34, %v3611_v34  ;;  %v1493_v25 = vadd.f32 %v1492_v17, %v1113_v2 }
 0x28a   : > { %v2844_v56 = vadd.f32 %v6246_v13, %v2712_v7  ;;  %4377 = vmatmul.msk.bf16.gmra.mxu0 %vm756_vm0, %v6276_v62  ;;  %4823 = vmatmul.msk.bf16.gmra.mxu3 %vm756_vm0, %v4963_v45 }
 0x28b   : > { %3868 = vst.msk [vmem:[%s5607_s11 + $0xf0] sm:$0xf] %vm3807_vm2, %v3739_v58  ;;  %4469 = vmatmul.msk.bf16.gmra.mxu1 %vm756_vm0, %v6183_v14  ;;  %v5101_v14 = vunpack.c.l.bf16 %v5261_v4 }
 0x28c   : > { %vm2972_vm7 = vcmp.ge.f32.partialorder %v2844_v56, 0.0  ;;  %v3100_v51 = vmul.f32 0.1, %v2844_v56  ;;  %4807 = vmatmul.msk.bf16.gmra.mxu2 %vm756_vm0, %v4947_v23 }
 0x28d   : > { %v6289_v29 = vpop.f32.mrf.mxu3 }
 0x28e   : > { %v3228_v49 = vsel %vm2972_vm7, %v2844_v56, %v3100_v51  ;;  %6718 = vst [vmem:[#allocation29_spill] sm:$0xff] %v6289_v29  ;;  %v6298_v51 = vld [vmem:[%s5495_s27 + $0x160] sm:$0xff] }
 0x28f   : > { %v3612_v32 = vadd.f32 %v5098_v42, %v3228_v49  ;;  %v2486_v58 = vpop.f32.mrf.mxu2  ;;  %v1115_v30 = vpop.f32.mrf.mxu0 }
 0x290   : > { %v2713_v57 = vadd.f32 %v2486_v58, %v1493_v25  ;;  %v1494_v1 = vpop.f32.mrf.mxu1  ;;  %v4964_v25 = vld [vmem:[%s5495_s27 + $0x200] sm:$0xff] }
 0x291   : > { %v3740_v34 = vpack.c.bf16 %v3612_v32, %v3612_v32  ;;  %v1495_v23 = vadd.f32 %v1494_v1, %v1115_v30  ;;  %v4948_v58 = vld [vmem:[%s5495_s27 + $0x180] sm:$0xff] }
 0x292   : > { %v2845_v45 = vadd.f32 %v6246_v13, %v2713_v57 }
 0x293   : > { %3869 = vst.msk [vmem:[%s5607_s11 + $0xf4] sm:$0xf] %vm3807_vm2, %v3740_v34 }
 0x294   : > { %vm2973_vm8 = vcmp.ge.f32.partialorder %v2845_v45, 0.0  ;;  %v3101_v7 = vmul.f32 0.1, %v2845_v45 }
 0x295   : > { %v6295_v42 = vpop.f32.mrf.mxu3 }
 0x296   : > { %v3229_v2 = vsel %vm2973_vm8, %v2845_v45, %v3101_v7  ;;  %6719 = vst [vmem:[#allocation30_spill] sm:$0xff] %v6295_v42  ;;  %v1578_v45 = vadd.f32 %v5954_v3, %v5589_v43 }
 0x297   : > { %v3613_v17 = vadd.f32 %v5101_v14, %v3229_v2  ;;  %v2488_v56 = vpop.f32.mrf.mxu2  ;;  %v1118_v32 = vpop.f32.mrf.mxu0 }
 0x298   : > { %v2714_v49 = vadd.f32 %v2488_v56, %v1495_v23  ;;  %v1497_v57 = vpop.f32.mrf.mxu1  ;;  %v5278_v23 = vld [vmem:[%s5587_s6 + $0x180] sm:$0xff]  }
 0x299   : > { %v3741_v29 = vpack.c.bf16 %v3613_v17, %v3613_v17  ;;  %v1498_v1 = vadd.f32 %v1497_v57, %v1118_v32  ;;  %v5262_v56 = vld [vmem:[%s5587_s6 + $0x100] sm:$0xff]  }
 0x29a   : > { %v2846_v34 = vadd.f32 %v6246_v13, %v2714_v49  ;;  %4378 = vmatmul.msk.bf16.gmra.mxu0 %vm756_vm0, %v6298_v51  ;;  %4824 = vmatmul.msk.bf16.gmra.mxu3 %vm756_vm0, %v4964_v25  ;;  %v5105_v43 = vunpack.c.l.bf16 %v5262_v56 }
 0x29b   : > { %3870 = vst.msk [vmem:[%s5607_s11 + $0xf8] sm:$0xf] %vm3807_vm2, %v3741_v29  ;;  %4470 = vmatmul.msk.bf16.gmra.mxu1 %vm756_vm0, %v6205_v8 }
 0x29c   : > { %vm2974_vm9 = vcmp.ge.f32.partialorder %v2846_v34, 0.0  ;;  %v3102_v30 = vmul.f32 0.1, %v2846_v34  ;;  %4808 = vmatmul.msk.bf16.gmra.mxu2 %vm756_vm0, %v4948_v58  ;;  %v5169_v58 = vunpack.c.l.bf16 %v5278_v23 }
 0x29d   : > { %v2571_v4 = vpop.f32.mrf.mxu3 }
 0x29e   : > { %v3230_v29 = vsel %vm2974_vm9, %v2846_v34, %v3102_v30  ;;  %v2747_v2 = vadd.f32 %v2571_v4, %v1578_v45  ;;  %v1580_v34 = vadd.f32 %v5960_v31, %v5598_v55 }
 0x29f   : > { %v3614_v14 = vadd.f32 %v5102_v16, %v3230_v29  ;;  %v2491_v7 = vpop.f32.mrf.mxu2  ;;  %v1120_v25 = vpop.f32.mrf.mxu0 }
 0x2a0   : > { %v2715_v17 = vadd.f32 %v2491_v7, %v1498_v1  ;;  %v2879_v32 = vadd.f32 %v6246_v13, %v2747_v2  ;;  %v1499_v57 = vpop.f32.mrf.mxu1 }
 0x2a1   : > { %v3742_v49 = vpack.c.bf16 %v3614_v14, %v3614_v14  ;;  %v1500_v29 = vadd.f32 %v1499_v57, %v1120_v25  ;;  %v5106_v57 = vunpack.c.h.bf16 %v5262_v56 }
 0x2a2   : > { %v2847_v8 = vadd.f32 %v6246_v13, %v2715_v17  ;;  %vm3007_vm10 = vcmp.ge.f32.partialorder %v2879_v32, 0.0  ;;  %v3135_v3 = vmul.f32 0.1, %v2879_v32  ;;  %v6322_v17 = vld [vmem:[%s5495_s27 + $0x168] sm:$0xff] }
 0x2a3   : > { %3871 = vst.msk [vmem:[%s5607_s11 + $0xfc] sm:$0xf] %vm3807_vm2, %v3742_v49  ;;  %v4965_v49 = vld [vmem:[%s5495_s27 + $0x208] sm:$0xff] }
 0x2a4   : > { %vm2975_vm11 = vcmp.ge.f32.partialorder %v2847_v8, 0.0  ;;  %v3103_v16 = vmul.f32 0.1, %v2847_v8  ;;  %v3263_v30 = vsel %vm3007_vm10, %v2879_v32, %v3135_v3  ;;  %v5170_v32 = vunpack.c.h.bf16 %v5278_v23 }
 0x2a5   : > { %v3647_v45 = vadd.f32 %v5169_v58, %v3263_v30  ;;  %v2573_v4 = vpop.f32.mrf.mxu3  ;;  %v5279_v30 = vld [vmem:[%s5587_s6 + $0x188] sm:$0xff]  }
 0x2a6   : > { %v3231_v1 = vsel %vm2975_vm11, %v2847_v8, %v3103_v16  ;;  %v2748_v2 = vadd.f32 %v2573_v4, %v1580_v34 }
 0x2a7   : > { %v3615_v14 = vadd.f32 %v5105_v43, %v3231_v1  ;;  %v2493_v7 = vpop.f32.mrf.mxu2  ;;  %v3775_v42 = vpack.c.bf16 %v3647_v45, %v3647_v45  ;;  %v1123_v35 = vpop.f32.mrf.mxu0  ;;  %v5263_v45 = vld [vmem:[%s5587_s6 + $0x108] sm:$0xff]  }
 0x2a8   : > { %v2716_v59 = vadd.f32 %v2493_v7, %v1500_v29  ;;  %v2880_v55 = vadd.f32 %v6246_v13, %v2748_v2  ;;  %v1502_v31 = vpop.f32.mrf.mxu1 }
 0x2a9   : > { %v3743_v37 = vpack.c.bf16 %v3615_v14, %v3615_v14  ;;  %3904 = vst.msk [vmem:[%s5607_s11 + $0x180] sm:$0xf] %vm3807_vm2, %v3775_v42  ;;  %v1503_v43 = vadd.f32 %v1502_v31, %v1123_v35  ;;  %v5109_v14 = vunpack.c.l.bf16 %v5263_v45 }
 0x2aa   : > { %v2848_v25 = vadd.f32 %v6246_v13, %v2716_v59  ;;  %vm3008_vm12 = vcmp.ge.f32.partialorder %v2880_v55, 0.0  ;;  %v3136_v8 = vmul.f32 0.1, %v2880_v55  ;;  %4379 = vmatmul.msk.bf16.gmra.mxu0 %vm756_vm0, %v6322_v17  ;;  %4825 = vmatmul.msk.bf16.gmra.mxu3 %vm756_vm0, %v4965_v49  ;;  %v1583_v59 = vadd.f32 %v5976_v21, %v5619_v6 }
 0x2ab   : > { %3872 = vst.msk [vmem:[%s5607_s11 + $0x100] sm:$0xf] %vm3807_vm2, %v3743_v37  ;;  %4471 = vmatmul.msk.bf16.gmra.mxu1 %vm756_vm0, %v6227_v22  ;;  %v5173_v21 = vunpack.c.l.bf16 %v5279_v30  ;;  %v1585_v49 = vadd.f32 %v5982_v50, %v5625_v20 }
 0x2ac   : > { %vm2976_vm13 = vcmp.ge.f32.partialorder %v2848_v25, 0.0  ;;  %v3104_v58 = vmul.f32 0.1, %v2848_v25  ;;  %4809 = vmatmul.msk.bf16.gmra.mxu2 %vm756_vm0, %v4949_v36  ;;  %v3264_v37 = vsel %vm3008_vm12, %v2880_v55, %v3136_v8 }
 0x2ad   : > { %v3648_v23 = vadd.f32 %v5170_v32, %v3264_v37  ;;  %v2576_v56 = vpop.f32.mrf.mxu3  ;;  %v4966_v37 = vld [vmem:[%s5495_s27 + $0x210] sm:$0xff] }
 0x2ae   : > { %v3232_v42 = vsel %vm2976_vm13, %v2848_v25, %v3104_v58  ;;  %v2749_v34 = vadd.f32 %v2576_v56, %v1583_v59  ;;  %v6351_v59 = vld [vmem:[%s5495_s27 + $0x170] sm:$0xff] }
 0x2af   : > { %v3616_v3 = vadd.f32 %v5106_v57, %v3232_v42  ;;  %v2496_v16 = vpop.f32.mrf.mxu2  ;;  %v3776_v1 = vpack.c.bf16 %v3648_v23, %v3648_v23  ;;  %v1125_v29 = vpop.f32.mrf.mxu0 }
 0x2b0   : > { %v2717_v35 = vadd.f32 %v2496_v16, %v1503_v43  ;;  %v2881_v36 = vadd.f32 %v6246_v13, %v2749_v34  ;;  %v1504_v4 = vpop.f32.mrf.mxu1 }
 0x2b1   : > { %v3744_v22 = vpack.c.bf16 %v3616_v3, %v3616_v3  ;;  %3905 = vst.msk [vmem:[%s5607_s11 + $0x184] sm:$0xf] %vm3807_vm2, %v3776_v1  ;;  %v1505_v32 = vadd.f32 %v1504_v4, %v1125_v29  ;;  %v4950_v3 = vld [vmem:[%s5495_s27 + $0x190] sm:$0xff]  ;;  %v5174_v1 = vunpack.c.h.bf16 %v5279_v30  ;;  %v1588_v30 = vadd.f32 %v5998_v33, %v5641_v38 }
 0x2b2   : > { %v2849_v6 = vadd.f32 %v6246_v13, %v2717_v35  ;;  %vm3009_vm14 = vcmp.ge.f32.partialorder %v2881_v36, 0.0  ;;  %v3137_v7 = vmul.f32 0.1, %v2881_v36  ;;  %v5110_v35 = vunpack.c.h.bf16 %v5263_v45 }
 0x2b3   : > { %3873 = vst.msk [vmem:[%s5607_s11 + $0x104] sm:$0xf] %vm3807_vm2, %v3744_v22 }
 0x2b4   : > { %vm2977_vm15 = vcmp.ge.f32.partialorder %v2849_v6, 0.0  ;;  %v3105_v2 = vmul.f32 0.1, %v2849_v6  ;;  %v3265_v55 = vsel %vm3009_vm14, %v2881_v36, %v3137_v7 }
 0x2b5   : > { %v3649_v25 = vadd.f32 %v5173_v21, %v3265_v55  ;;  %v2578_v57 = vpop.f32.mrf.mxu3 }
 0x2b6   : > { %v3233_v31 = vsel %vm2977_vm15, %v2849_v6, %v3105_v2  ;;  %v2750_v43 = vadd.f32 %v2578_v57, %v1585_v49  ;;  %v5280_v49 = vld [vmem:[%s5587_s6 + $0x190] sm:$0xff]  }
 0x2b7   : > { %v3617_v8 = vadd.f32 %v5109_v14, %v3233_v31  ;;  %v2498_v58 = vpop.f32.mrf.mxu2  ;;  %v3777_v42 = vpack.c.bf16 %v3649_v25, %v3649_v25  ;;  %v1128_v56 = vpop.f32.mrf.mxu0  ;;  %v5264_v25 = vld [vmem:[%s5587_s6 + $0x110] sm:$0xff]   ;;  %v5177_v33 = vunpack.c.l.bf16 %v5280_v49 }
 0x2b8   : > { %v2718_v23 = vadd.f32 %v2498_v58, %v1505_v32  ;;  %v2882_v20 = vadd.f32 %v6246_v13, %v2750_v43  ;;  %v1507_v50 = vpop.f32.mrf.mxu1  ;;  %v5113_v58 = vunpack.c.l.bf16 %v5264_v25 }
 0x2b9   : > { %v3745_v16 = vpack.c.bf16 %v3617_v8, %v3617_v8  ;;  %3906 = vst.msk [vmem:[%s5607_s11 + $0x188] sm:$0xf] %vm3807_vm2, %v3777_v42  ;;  %v1508_v36 = vadd.f32 %v1507_v50, %v1128_v56  ;;  %v1590_v42 = vadd.f32 %v6004_v44, %v5647_v52 }
 0x2ba   : > { %v2850_v34 = vadd.f32 %v6246_v13, %v2718_v23  ;;  %vm3010_vm1 = vcmp.ge.f32.partialorder %v2882_v20, 0.0  ;;  %v3138_v29 = vmul.f32 0.1, %v2882_v20  ;;  %4380 = vmatmul.msk.bf16.gmra.mxu0 %vm756_vm0, %v6351_v59  ;;  %4826 = vmatmul.msk.bf16.gmra.mxu3 %vm756_vm0, %v4966_v37 }
 0x2bb   : > { %3874 = vst.msk [vmem:[%s5607_s11 + $0x108] sm:$0xf] %vm3807_vm2, %v3745_v16  ;;  %4472 = vmatmul.msk.bf16.gmra.mxu1 %vm756_vm0, %v6254_v41 }
 0x2bc   : > { %vm2978_vm3 = vcmp.ge.f32.partialorder %v2850_v34, 0.0  ;;  %v3106_v22 = vmul.f32 0.1, %v2850_v34  ;;  %4810 = vmatmul.msk.bf16.gmra.mxu2 %vm756_vm0, %v4950_v3  ;;  %v3266_v45 = vsel %vm3010_vm1, %v2882_v20, %v3138_v29  ;;  %v4967_v29 = vld [vmem:[%s5495_s27 + $0x218] sm:$0xff] }
 0x2bd   : > { %v3650_v6 = vadd.f32 %v5174_v1, %v3266_v45  ;;  %v2581_v21 = vpop.f32.mrf.mxu3  ;;  %v4951_v45 = vld [vmem:[%s5495_s27 + $0x198] sm:$0xff] }
 0x2be   : > { %v3234_v4 = vsel %vm2978_vm3, %v2850_v34, %v3106_v22  ;;  %v2751_v2 = vadd.f32 %v2581_v21, %v1588_v30  ;;  %v5178_v21 = vunpack.c.h.bf16 %v5280_v49  ;;  %v1593_v49 = vadd.f32 %v6020_v46, %v5663_v5 }
 0x2bf   : > { %v3618_v14 = vadd.f32 %v5110_v35, %v3234_v4  ;;  %v2501_v7 = vpop.f32.mrf.mxu2  ;;  %v3778_v55 = vpack.c.bf16 %v3650_v6, %v3650_v6  ;;  %v1130_v32 = vpop.f32.mrf.mxu0  ;;  %v6380_v35 = vld [vmem:[%s5495_s27 + $0x178] sm:$0xff] }
 0x2c0   : > { %v2719_v31 = vadd.f32 %v2501_v7, %v1508_v36  ;;  %v2883_v57 = vadd.f32 %v6246_v13, %v2751_v2  ;;  %v1509_v8 = vpop.f32.mrf.mxu1 }
 0x2c1   : > { %v3746_v41 = vpack.c.bf16 %v3618_v14, %v3618_v14  ;;  %3907 = vst.msk [vmem:[%s5607_s11 + $0x18c] sm:$0xf] %vm3807_vm2, %v3778_v55  ;;  %v1510_v16 = vadd.f32 %v1509_v8, %v1130_v32  ;;  %v5114_v14 = vunpack.c.h.bf16 %v5264_v25 }
 0x2c2   : > { %v2851_v38 = vadd.f32 %v6246_v13, %v2719_v31  ;;  %vm3011_vm4 = vcmp.ge.f32.partialorder %v2883_v57, 0.0  ;;  %v3139_v43 = vmul.f32 0.1, %v2883_v57 }
 0x2c3   : > { %3875 = vst.msk [vmem:[%s5607_s11 + $0x10c] sm:$0xf] %vm3807_vm2, %v3746_v41 }
 0x2c4   : > { %vm2979_vm5 = vcmp.ge.f32.partialorder %v2851_v38, 0.0  ;;  %v3107_v37 = vmul.f32 0.1, %v2851_v38  ;;  %v3267_v23 = vsel %vm3011_vm4, %v2883_v57, %v3139_v43 }
 0x2c5   : > { %v3651_v3 = vadd.f32 %v5177_v33, %v3267_v23  ;;  %v2583_v20 = vpop.f32.mrf.mxu3  ;;  %v5281_v33 = vld [vmem:[%s5587_s6 + $0x198] sm:$0xff]  }
 0x2c6   : > { %v3235_v56 = vsel %vm2979_vm5, %v2851_v38, %v3107_v37  ;;  %v2752_v1 = vadd.f32 %v2583_v20, %v1590_v42  ;;  %v5265_v37 = vld [vmem:[%s5587_s6 + $0x118] sm:$0xff]   ;;  %v5181_v46 = vunpack.c.l.bf16 %v5281_v33 }
 0x2c7   : > { %v3619_v50 = vadd.f32 %v5113_v58, %v3235_v56  ;;  %v2503_v34 = vpop.f32.mrf.mxu2  ;;  %v3779_v22 = vpack.c.bf16 %v3651_v3, %v3651_v3  ;;  %v1133_v30 = vpop.f32.mrf.mxu0  ;;  %v5117_v3 = vunpack.c.l.bf16 %v5265_v37 }
 0x2c8   : > { %v2720_v36 = vadd.f32 %v2503_v34, %v1510_v16  ;;  %v2884_v52 = vadd.f32 %v6246_v13, %v2752_v1  ;;  %v1512_v44 = vpop.f32.mrf.mxu1 }
 0x2c9   : > { %v3747_v4 = vpack.c.bf16 %v3619_v50, %v3619_v50  ;;  %3908 = vst.msk [vmem:[%s5607_s11 + $0x190] sm:$0xf] %vm3807_vm2, %v3779_v22  ;;  %v1513_v55 = vadd.f32 %v1512_v44, %v1133_v30  ;;  %v1595_v50 = vadd.f32 %v6026_v27, %v5669_v19 }
 0x2ca   : > { %v2852_v6 = vadd.f32 %v6246_v13, %v2720_v36  ;;  %vm3012_vm6 = vcmp.ge.f32.partialorder %v2884_v52, 0.0  ;;  %v3140_v7 = vmul.f32 0.1, %v2884_v52  ;;  %4381 = vmatmul.msk.bf16.gmra.mxu0 %vm756_vm0, %v6380_v35  ;;  %4827 = vmatmul.msk.bf16.gmra.mxu3 %vm756_vm0, %v4967_v29 }
 0x2cb   : > { %3876 = vst.msk [vmem:[%s5607_s11 + $0x110] sm:$0xf] %vm3807_vm2, %v3747_v4  ;;  %4473 = vmatmul.msk.bf16.gmra.mxu1 %vm756_vm0, %v6276_v62 }
 0x2cc   : > { %vm2980_vm7 = vcmp.ge.f32.partialorder %v2852_v6, 0.0  ;;  %v3108_v2 = vmul.f32 0.1, %v2852_v6  ;;  %4811 = vmatmul.msk.bf16.gmra.mxu2 %vm756_vm0, %v4951_v45  ;;  %v3268_v31 = vsel %vm3012_vm6, %v2884_v52, %v3140_v7  ;;  %v4968_v52 = vld [vmem:[%s5495_s27 + $0x220] sm:$0xff] }
 0x2cd   : > { %v3652_v32 = vadd.f32 %v5178_v21, %v3268_v31  ;;  %v2586_v41 = vpop.f32.mrf.mxu3 }
 0x2ce   : > { %v3236_v25 = vsel %vm2980_vm7, %v2852_v6, %v3108_v2  ;;  %v2753_v38 = vadd.f32 %v2586_v41, %v1593_v49  ;;  %v5118_v49 = vunpack.c.h.bf16 %v5265_v37 }
 0x2cf   : > { %v3620_v57 = vadd.f32 %v5114_v14, %v3236_v25  ;;  %v2506_v8 = vpop.f32.mrf.mxu2  ;;  %v3780_v58 = vpack.c.bf16 %v3652_v32, %v3652_v32  ;;  %v1135_v42 = vpop.f32.mrf.mxu0  ;;  %v4952_v14 = vld [vmem:[%s5495_s27 + $0x1a0] sm:$0xff] }
 0x2d0   : > { %v2721_v43 = vadd.f32 %v2506_v8, %v1513_v55  ;;  %v2885_v23 = vadd.f32 %v6246_v13, %v2753_v38  ;;  %v1514_v56 = vpop.f32.mrf.mxu1  ;;  %v5182_v55 = vunpack.c.h.bf16 %v5281_v33  ;;  %v5359_v25 = vld [vmem:[%s5495_s27 + $0x180] sm:$0xff] }
 0x2d1   : > { %v3748_v62 = vpack.c.bf16 %v3620_v57, %v3620_v57  ;;  %3909 = vst.msk [vmem:[%s5607_s11 + $0x194] sm:$0xf] %vm3807_vm2, %v3780_v58  ;;  %v1515_v22 = vadd.f32 %v1514_v56, %v1135_v42  ;;  %v1598_v57 = vadd.f32 %v6042_v53, %v5685_v40 }
 0x2d2   : > { %v2853_v5 = vadd.f32 %v6246_v13, %v2721_v43  ;;  %vm3013_vm8 = vcmp.ge.f32.partialorder %v2885_v23, 0.0  ;;  %v3141_v16 = vmul.f32 0.1, %v2885_v23 }
 0x2d3   : > { %3877 = vst.msk [vmem:[%s5607_s11 + $0x114] sm:$0xf] %vm3807_vm2, %v3748_v62  ;;  %v5282_v62 = vld [vmem:[%s5587_s6 + $0x1a0] sm:$0xff]  }
 0x2d4   : > { %vm2981_vm9 = vcmp.ge.f32.partialorder %v2853_v5, 0.0  ;;  %v3109_v20 = vmul.f32 0.1, %v2853_v5  ;;  %v3269_v34 = vsel %vm3013_vm8, %v2885_v23, %v3141_v16  ;;  %v5185_v53 = vunpack.c.l.bf16 %v5282_v62 }
 0x2d5   : > { %v3653_v29 = vadd.f32 %v5181_v46, %v3269_v34  ;;  %v2588_v36 = vpop.f32.mrf.mxu3 }
 0x2d6   : > { %v3237_v1 = vsel %vm2981_vm9, %v2853_v5, %v3109_v20  ;;  %v2754_v4 = vadd.f32 %v2588_v36, %v1595_v50  ;;  %v5266_v5 = vld [vmem:[%s5587_s6 + $0x120] sm:$0xff]  }
 0x2d7   : > { %v3621_v30 = vadd.f32 %v5117_v3, %v3237_v1  ;;  %v2508_v45 = vpop.f32.mrf.mxu2  ;;  %v3781_v44 = vpack.c.bf16 %v3653_v29, %v3653_v29  ;;  %v1138_v21 = vpop.f32.mrf.mxu0  ;;  %v5121_v20 = vunpack.c.l.bf16 %v5266_v5  ;;  %v1600_v1 = vadd.f32 %v6048_v47, %v5691_v54 }
 0x2d8   : > { %v2722_v6 = vadd.f32 %v2508_v45, %v1515_v22  ;;  %v2886_v2 = vadd.f32 %v6246_v13, %v2754_v4  ;;  %v1517_v19 = vpop.f32.mrf.mxu1 }
 0x2d9   : > { %v3749_v7 = vpack.c.bf16 %v3621_v30, %v3621_v30  ;;  %3910 = vst.msk [vmem:[%s5607_s11 + $0x198] sm:$0xf] %vm3807_vm2, %v3781_v44  ;;  %v1518_v41 = vadd.f32 %v1517_v19, %v1138_v21 }
 0x2da   : > { %v2854_v27 = vadd.f32 %v6246_v13, %v2722_v6  ;;  %vm3014_vm10 = vcmp.ge.f32.partialorder %v2886_v2, 0.0  ;;  %v3142_v31 = vmul.f32 0.1, %v2886_v2  ;;  %4382 = vmatmul.msk.bf16.gmra.mxu0 %vm756_vm0, %v5359_v25  ;;  %4828 = vmatmul.msk.bf16.gmra.mxu3 %vm756_vm0, %v4968_v52  ;;  %v4969_v6 = vld [vmem:[%s5495_s27 + $0x228] sm:$0xff] }
 0x2db   : > { %3878 = vst.msk [vmem:[%s5607_s11 + $0x118] sm:$0xf] %vm3807_vm2, %v3749_v7  ;;  %4474 = vmatmul.msk.bf16.gmra.mxu1 %vm756_vm0, %v6298_v51  ;;  %v5360_v25 = vld [vmem:[%s5495_s27 + $0x188] sm:$0xff] }
 0x2dc   : > { %vm2982_vm11 = vcmp.ge.f32.partialorder %v2854_v27, 0.0  ;;  %v3110_v32 = vmul.f32 0.1, %v2854_v27  ;;  %4812 = vmatmul.msk.bf16.gmra.mxu2 %vm756_vm0, %v4952_v14  ;;  %v3270_v8 = vsel %vm3014_vm10, %v2886_v2, %v3142_v31  ;;  %v4953_v2 = vld [vmem:[%s5495_s27 + $0x1a8] sm:$0xff] }
 0x2dd   : > { %v3654_v33 = vadd.f32 %v5182_v55, %v3270_v8  ;;  %v2591_v58 = vpop.f32.mrf.mxu3  ;;  %v5186_v55 = vunpack.c.h.bf16 %v5282_v62  ;;  %v5283_v62 = vld [vmem:[%s5587_s6 + $0x1a8] sm:$0xff]  }
 0x2de   : > { %v3238_v38 = vsel %vm2982_vm11, %v2854_v27, %v3110_v32  ;;  %v2755_v42 = vadd.f32 %v2591_v58, %v1598_v57  ;;  %v1603_v57 = vadd.f32 %v6064_v28, %v5707_v11  ;;  %v5189_v28 = vunpack.c.l.bf16 %v5283_v62 }
 0x2df   : > { %v3622_v43 = vadd.f32 %v5118_v49, %v3238_v38  ;;  %v2511_v37 = vpop.f32.mrf.mxu2  ;;  %v3782_v23 = vpack.c.bf16 %v3654_v33, %v3654_v33  ;;  %v1140_v46 = vpop.f32.mrf.mxu0  ;;  %v5122_v49 = vunpack.c.h.bf16 %v5266_v5  ;;  %v5267_v5 = vld [vmem:[%s5587_s6 + $0x128] sm:$0xff]  }
 0x2e0   : > { %v2723_v56 = vadd.f32 %v2511_v37, %v1518_v41  ;;  %v2887_v3 = vadd.f32 %v6246_v13, %v2755_v42  ;;  %v1519_v16 = vpop.f32.mrf.mxu1 }
 0x2e1   : > { %v3750_v51 = vpack.c.bf16 %v3622_v43, %v3622_v43  ;;  %3911 = vst.msk [vmem:[%s5607_s11 + $0x19c] sm:$0xf] %vm3807_vm2, %v3782_v23  ;;  %v1520_v30 = vadd.f32 %v1519_v16, %v1140_v46  ;;  %v5125_v16 = vunpack.c.l.bf16 %v5267_v5 }
 0x2e2   : > { %v2855_v40 = vadd.f32 %v6246_v13, %v2723_v56  ;;  %vm3015_vm12 = vcmp.ge.f32.partialorder %v2887_v3, 0.0  ;;  %v3143_v50 = vmul.f32 0.1, %v2887_v3 }
 0x2e3   : > { %3879 = vst.msk [vmem:[%s5607_s11 + $0x11c] sm:$0xf] %vm3807_vm2, %v3750_v51 }
 0x2e4   : > { %vm2983_vm13 = vcmp.ge.f32.partialorder %v2855_v40, 0.0  ;;  %v3111_v34 = vmul.f32 0.1, %v2855_v40  ;;  %v3271_v29 = vsel %vm3015_vm12, %v2887_v3, %v3143_v50 }
 0x2e5   : > { %v3655_v36 = vadd.f32 %v5185_v53, %v3271_v29  ;;  %v2593_v45 = vpop.f32.mrf.mxu3 }
 0x2e6   : > { %v3239_v22 = vsel %vm2983_vm13, %v2855_v40, %v3111_v34  ;;  %v2756_v44 = vadd.f32 %v2593_v45, %v1600_v1 }
 0x2e7   : > { %v3623_v4 = vadd.f32 %v5121_v20, %v3239_v22  ;;  %v2513_v52 = vpop.f32.mrf.mxu2  ;;  %v3783_v21 = vpack.c.bf16 %v3655_v36, %v3655_v36  ;;  %v1143_v7 = vpop.f32.mrf.mxu0  ;;  %v1605_v20 = vadd.f32 %v6070_v63, %v5713_v26 }
 0x2e8   : > { %v2724_v14 = vadd.f32 %v2513_v52, %v1520_v30  ;;  %v2888_v27 = vadd.f32 %v6246_v13, %v2756_v44  ;;  %v1522_v54 = vpop.f32.mrf.mxu1 }
 0x2e9   : > { %v3751_v19 = vpack.c.bf16 %v3623_v4, %v3623_v4  ;;  %3912 = vst.msk [vmem:[%s5607_s11 + $0x1a0] sm:$0xf] %vm3807_vm2, %v3783_v21  ;;  %v1523_v41 = vadd.f32 %v1522_v54, %v1143_v7  ;;  %v4970_v4 = vld [vmem:[%s5495_s27 + $0x230] sm:$0xff] }
 0x2ea   : > { %v2856_v47 = vadd.f32 %v6246_v13, %v2724_v14  ;;  %vm3016_vm14 = vcmp.ge.f32.partialorder %v2888_v27, 0.0  ;;  %v3144_v31 = vmul.f32 0.1, %v2888_v27  ;;  %4383 = vmatmul.msk.bf16.gmra.mxu0 %vm756_vm0, %v5360_v25  ;;  %4829 = vmatmul.msk.bf16.gmra.mxu3 %vm756_vm0, %v4969_v6  ;;  %v4954_v21 = vld [vmem:[%s5495_s27 + $0x1b0] sm:$0xff] }
 0x2eb   : > { %3880 = vst.msk [vmem:[%s5607_s11 + $0x120] sm:$0xf] %vm3807_vm2, %v3751_v19  ;;  %4475 = vmatmul.msk.bf16.gmra.mxu1 %vm756_vm0, %v6322_v17  ;;  %v5126_v19 = vunpack.c.h.bf16 %v5267_v5  ;;  %v5361_v54 = vld [vmem:[%s5495_s27 + $0x190] sm:$0xff] }
 0x2ec   : > { %vm2984_vm15 = vcmp.ge.f32.partialorder %v2856_v47, 0.0  ;;  %v3112_v32 = vmul.f32 0.1, %v2856_v47  ;;  %4813 = vmatmul.msk.bf16.gmra.mxu2 %vm756_vm0, %v4953_v2  ;;  %v3272_v8 = vsel %vm3016_vm14, %v2888_v27, %v3144_v31  ;;  %v5190_v2 = vunpack.c.h.bf16 %v5283_v62 }
 0x2ed   : > { %v3656_v33 = vadd.f32 %v5186_v55, %v3272_v8  ;;  %v2596_v58 = vpop.f32.mrf.mxu3 }
 0x2ee   : > { %v3240_v38 = vsel %vm2984_vm15, %v2856_v47, %v3112_v32  ;;  %v2757_v42 = vadd.f32 %v2596_v58, %v1603_v57 }
 0x2ef   : > { %v3624_v43 = vadd.f32 %v5122_v49, %v3240_v38  ;;  %v2516_v37 = vpop.f32.mrf.mxu2  ;;  %v3784_v23 = vpack.c.bf16 %v3656_v33, %v3656_v33  ;;  %v1145_v46 = vpop.f32.mrf.mxu0  ;;  %v1608_v49 = vadd.f32 %v6086_v9, %v5729_v48  ;;  %v5284_v33 = vld [vmem:[%s5587_s6 + $0x1b0] sm:$0xff]  }
 0x2f0   : > { %v2725_v56 = vadd.f32 %v2516_v37, %v1523_v41  ;;  %v2889_v51 = vadd.f32 %v6246_v13, %v2757_v42  ;;  %v1524_v3 = vpop.f32.mrf.mxu1  ;;  %v5268_v37 = vld [vmem:[%s5587_s6 + $0x130] sm:$0xff]   ;;  %v5193_v9 = vunpack.c.l.bf16 %v5284_v33 }
 0x2f1   : > { %v3752_v17 = vpack.c.bf16 %v3624_v43, %v3624_v43  ;;  %3913 = vst.msk [vmem:[%s5607_s11 + $0x1a4] sm:$0xf] %vm3807_vm2, %v3784_v23  ;;  %v1525_v29 = vadd.f32 %v1524_v3, %v1145_v46 }
 0x2f2   : > { %v2857_v11 = vadd.f32 %v6246_v13, %v2725_v56  ;;  %vm3017_vm1 = vcmp.ge.f32.partialorder %v2889_v51, 0.0  ;;  %v3145_v40 = vmul.f32 0.1, %v2889_v51  ;;  %v5129_v56 = vunpack.c.l.bf16 %v5268_v37 }
 0x2f3   : > { %3881 = vst.msk [vmem:[%s5607_s11 + $0x124] sm:$0xf] %vm3807_vm2, %v3752_v17  ;;  %v1610_v17 = vadd.f32 %v6092_v60, %v5735_v0 }
 0x2f4   : > { %vm2985_vm3 = vcmp.ge.f32.partialorder %v2857_v11, 0.0  ;;  %v3113_v53 = vmul.f32 0.1, %v2857_v11  ;;  %v3273_v50 = vsel %vm3017_vm1, %v2889_v51, %v3145_v40 }
 0x2f5   : > { %v3657_v1 = vadd.f32 %v5189_v28, %v3273_v50  ;;  %v2598_v22 = vpop.f32.mrf.mxu3  ;;  %v4971_v50 = vld [vmem:[%s5495_s27 + $0x238] sm:$0xff] }
 0x2f6   : > { %v3241_v34 = vsel %vm2985_vm3, %v2857_v11, %v3113_v53  ;;  %v2758_v45 = vadd.f32 %v2598_v22, %v1605_v20  ;;  %v4955_v22 = vld [vmem:[%s5495_s27 + $0x1b8] sm:$0xff] }
 0x2f7   : > { %v3625_v36 = vadd.f32 %v5125_v16, %v3241_v34  ;;  %v2518_v30 = vpop.f32.mrf.mxu2  ;;  %v3785_v52 = vpack.c.bf16 %v3657_v1, %v3657_v1  ;;  %v1148_v6 = vpop.f32.mrf.mxu0 }
 0x2f8   : > { %v2726_v44 = vadd.f32 %v2518_v30, %v1525_v29  ;;  %v2890_v7 = vadd.f32 %v6246_v13, %v2758_v45  ;;  %v1527_v26 = vpop.f32.mrf.mxu1  ;;  %v5194_v45 = vunpack.c.h.bf16 %v5284_v33  ;;  %v1615_v33 = vadd.f32 %v6114_v10, %v5757_v39 }
 0x2f9   : > { %v3753_v14 = vpack.c.bf16 %v3625_v36, %v3625_v36  ;;  %3914 = vst.msk [vmem:[%s5607_s11 + $0x1a8] sm:$0xf] %vm3807_vm2, %v3785_v52  ;;  %v1528_v55 = vadd.f32 %v1527_v26, %v1148_v6 }
 0x2fa   : > { %v2858_v63 = vadd.f32 %v6246_v13, %v2726_v44  ;;  %vm3018_vm4 = vcmp.ge.f32.partialorder %v2890_v7, 0.0  ;;  %v3146_v27 = vmul.f32 0.1, %v2890_v7  ;;  %4384 = vmatmul.msk.bf16.gmra.mxu0 %vm756_vm0, %v5361_v54  ;;  %4830 = vmatmul.msk.bf16.gmra.mxu3 %vm756_vm0, %v4970_v4  ;;  %v5130_v4 = vunpack.c.h.bf16 %v5268_v37  ;;  %v5362_v44 = vld [vmem:[%s5495_s27 + $0x198] sm:$0xff] }
 0x2fb   : > { %3882 = vst.msk [vmem:[%s5607_s11 + $0x128] sm:$0xf] %vm3807_vm2, %v3753_v14  ;;  %4476 = vmatmul.msk.bf16.gmra.mxu1 %vm756_vm0, %v6351_v59  ;;  %v1613_v14 = vadd.f32 %v6108_v12, %v5751_v18 }
 0x2fc   : > { %vm2986_vm5 = vcmp.ge.f32.partialorder %v2858_v63, 0.0  ;;  %v3114_v47 = vmul.f32 0.1, %v2858_v63  ;;  %4814 = vmatmul.msk.bf16.gmra.mxu2 %vm756_vm0, %v4954_v21  ;;  %v3274_v31 = vsel %vm3018_vm4, %v2890_v7, %v3146_v27 }
 0x2fd   : > { %v3658_v32 = vadd.f32 %v5190_v2, %v3274_v31  ;;  %v2601_v41 = vpop.f32.mrf.mxu3  ;;  %v5269_v31 = vld [vmem:[%s5587_s6 + $0x138] sm:$0xff]  }
 0x2fe   : > { %v3242_v25 = vsel %vm2986_vm5, %v2858_v63, %v3114_v47  ;;  %v2759_v38 = vadd.f32 %v2601_v41, %v1608_v49  ;;  %v5285_v47 = vld [vmem:[%s5587_s6 + $0x1b8] sm:$0xff]  }
 0x2ff   : > { %v3626_v57 = vadd.f32 %v5126_v19, %v3242_v25  ;;  %v2521_v8 = vpop.f32.mrf.mxu2  ;;  %v3786_v58 = vpack.c.bf16 %v3658_v32, %v3658_v32  ;;  %v1150_v42 = vpop.f32.mrf.mxu0  ;;  %v5197_v12 = vunpack.c.l.bf16 %v5285_v47 }
 0x300   : > { %v2727_v43 = vadd.f32 %v2521_v8, %v1528_v55  ;;  %v2891_v62 = vadd.f32 %v6246_v13, %v2759_v38  ;;  %v1529_v23 = vpop.f32.mrf.mxu1 }
 0x301   : > { %v3754_v59 = vpack.c.bf16 %v3626_v57, %v3626_v57  ;;  %3915 = vst.msk [vmem:[%s5607_s11 + $0x1ac] sm:$0xf] %vm3807_vm2, %v3786_v58  ;;  %v1530_v28 = vadd.f32 %v1529_v23, %v1150_v42  ;;  %v5133_v57 = vunpack.c.l.bf16 %v5269_v31 }
 0x302   : > { %v2859_v48 = vadd.f32 %v6246_v13, %v2727_v43  ;;  %vm3019_vm6 = vcmp.ge.f32.partialorder %v2891_v62, 0.0  ;;  %v3147_v5 = vmul.f32 0.1, %v2891_v62 }
 0x303   : > { %3883 = vst.msk [vmem:[%s5607_s11 + $0x12c] sm:$0xf] %vm3807_vm2, %v3754_v59 }
 0x304   : > { %vm2987_vm7 = vcmp.ge.f32.partialorder %v2859_v48, 0.0  ;;  %v3115_v46 = vmul.f32 0.1, %v2859_v48  ;;  %v3275_v51 = vsel %vm3019_vm6, %v2891_v62, %v3147_v5 }
 0x305   : > { %v3659_v11 = vadd.f32 %v5193_v9, %v3275_v51  ;;  %v2603_v16 = vpop.f32.mrf.mxu3  ;;  %v5198_v51 = vunpack.c.h.bf16 %v5285_v47 }
 0x306   : > { %v3243_v3 = vsel %vm2987_vm7, %v2859_v48, %v3115_v46  ;;  %v2760_v20 = vadd.f32 %v2603_v16, %v1610_v17  ;;  %v6515_v46 = vld [vmem:[%s6688_s2] ss:$0 sm:$0xff] }
 0x307   : > { %v3627_v40 = vadd.f32 %v5129_v56, %v3243_v3  ;;  %v2523_v53 = vpop.f32.mrf.mxu2  ;;  %v3787_v34 = vpack.c.bf16 %v3659_v11, %v3659_v11  ;;  %v1153_v29 = vpop.f32.mrf.mxu0  ;;  %v5134_v3 = vunpack.c.h.bf16 %v5269_v31 }
 0x308   : > { %v2728_v1 = vadd.f32 %v2523_v53, %v1530_v28  ;;  %v2892_v30 = vadd.f32 %v6246_v13, %v2760_v20  ;;  %v1532_v0 = vpop.f32.mrf.mxu1 }
 0x309   : > { %v3755_v36 = vpack.c.bf16 %v3627_v40, %v3627_v40  ;;  %3916 = vst.msk [vmem:[%s5607_s11 + $0x1b0] sm:$0xf] %vm3807_vm2, %v3787_v34  ;;  %v1533_v21 = vadd.f32 %v1532_v0, %v1153_v29  ;;  %v1618_v40 = vadd.f32 %v6130_v24, %v5773_v61 }
 0x30a   : > { %v2860_v60 = vadd.f32 %v6246_v13, %v2728_v1  ;;  %vm3020_vm8 = vcmp.ge.f32.partialorder %v2892_v30, 0.0  ;;  %v3148_v52 = vmul.f32 0.1, %v2892_v30  ;;  %4385 = vmatmul.msk.bf16.gmra.mxu0 %vm756_vm0, %v5362_v44  ;;  %4831 = vmatmul.msk.bf16.gmra.mxu3 %vm756_vm0, %v4971_v50 }
 0x30b   : > { %3884 = vst.msk [vmem:[%s5607_s11 + $0x130] sm:$0xf] %vm3807_vm2, %v3755_v36  ;;  %4477 = vmatmul.msk.bf16.gmra.mxu1 %vm756_vm0, %v6380_v35  ;;  %v5286_v36 = vld [vmem:[%s5587_s6 + $0x1c0] sm:$0xff]  }
 0x30c   : > { %vm2988_vm9 = vcmp.ge.f32.partialorder %v2860_v60, 0.0  ;;  %v3116_v6 = vmul.f32 0.1, %v2860_v60  ;;  %4815 = vmatmul.msk.bf16.gmra.mxu2 %vm756_vm0, %v4955_v22  ;;  %v3276_v7 = vsel %vm3020_vm8, %v2892_v30, %v3148_v52  ;;  %v5201_v24 = vunpack.c.l.bf16 %v5286_v36 }
 0x30d   : > { %v3660_v63 = vadd.f32 %v5194_v45, %v3276_v7  ;;  %v2606_v2 = vpop.f32.mrf.mxu3  ;;  %v6720_v7 = vld [vmem:[#allocation16_spill] sm:$0xff] }
 0x30e   : > { %v3244_v26 = vsel %vm2988_vm9, %v2860_v60, %v3116_v6  ;;  %v2761_v54 = vadd.f32 %v2606_v2, %v1613_v14  ;;  %v5270_v60 = vld [vmem:[%s5587_s6 + $0x140] sm:$0xff]  }
 0x30f   : > { %v3628_v19 = vadd.f32 %v5130_v4, %v3244_v26  ;;  %v2526_v27 = vpop.f32.mrf.mxu2  ;;  %v3788_v55 = vpack.c.bf16 %v3660_v63, %v3660_v63  ;;  %v1155_v25 = vpop.f32.mrf.mxu0  ;;  %v5137_v6 = vunpack.c.l.bf16 %v5270_v60  ;;  %v1620_v26 = vadd.f32 %v6720_v7, %v5779_v15 }
 0x310   : > { %v2729_v49 = vadd.f32 %v2526_v27, %v1533_v21  ;;  %v2893_v32 = vadd.f32 %v6246_v13, %v2761_v54  ;;  %v1534_v41 = vpop.f32.mrf.mxu1 }
 0x311   : > { %v3756_v35 = vpack.c.bf16 %v3628_v19, %v3628_v19  ;;  %3917 = vst.msk [vmem:[%s5607_s11 + $0x1b4] sm:$0xf] %vm3807_vm2, %v3788_v55  ;;  %v1535_v42 = vadd.f32 %v1534_v41, %v1155_v25 }
 0x312   : > { %v2861_v18 = vadd.f32 %v6246_v13, %v2729_v49  ;;  %vm3021_vm0 = vcmp.ge.f32.partialorder %v2893_v32, 0.0  ;;  %v3149_v8 = vmul.f32 0.1, %v2893_v32 }
 0x313   : > { %3885 = vst.msk [vmem:[%s5607_s11 + $0x134] sm:$0xf] %vm3807_vm2, %v3756_v35 }
 0x314   : > { %vm2989_vm10 = vcmp.ge.f32.partialorder %v2861_v18, 0.0  ;;  %v3117_v38 = vmul.f32 0.1, %v2861_v18  ;;  %v3277_v58 = vsel %vm3021_vm0, %v2893_v32, %v3149_v8 }
 0x315   : > { %v3661_v37 = vadd.f32 %v5197_v12, %v3277_v58  ;;  %v2608_v59 = vpop.f32.mrf.mxu3  ;;  %v5202_v12 = vunpack.c.h.bf16 %v5286_v36  ;;  %v6721_v58 = vld [vmem:[#allocation2_spill] sm:$0xff] }
 0x316   : > { %v3245_v43 = vsel %vm2989_vm10, %v2861_v18, %v3117_v38  ;;  %v2762_v23 = vadd.f32 %v2608_v59, %v1615_v33 }
 0x317   : > { %v3629_v62 = vadd.f32 %v5133_v57, %v3245_v43  ;;  %v2528_v13 = vpop.f32.mrf.mxu2  ;;  %v3789_v48 = vpack.c.bf16 %v3661_v37, %v3661_v37  ;;  %v1158_v56 = vpop.f32.mrf.mxu0  ;;  %v5138_v57 = vunpack.c.h.bf16 %v5270_v60  ;;  %v6722_v43 = vld [vmem:[#allocation17_spill] sm:$0xff] }
 0x318   : > { %v2730_v9 = vadd.f32 %v2528_v13, %v1535_v42  ;;  %v2894_v39 = vadd.f32 %v6515_v46, %v2762_v23  ;;  %v1537_v10 = vpop.f32.mrf.mxu1  ;;  %v1623_v37 = vadd.f32 %v6722_v43, %v6721_v58 }
 0x319   : > { %v3757_v5 = vpack.c.bf16 %v3629_v62, %v3629_v62  ;;  %3918 = vst.msk [vmem:[%s5607_s11 + $0x1b8] sm:$0xf] %vm3807_vm2, %v3789_v48  ;;  %v1538_v16 = vadd.f32 %v1537_v10, %v1158_v56  ;;  %v5287_v56 = vld [vmem:[%s5587_s6 + $0x1c8] sm:$0xff]  }
 0x31a   : > { %v2862_v17 = vadd.f32 %v6515_v46, %v2730_v9  ;;  %vm3022_vm11 = vcmp.ge.f32.partialorder %v2894_v39, 0.0  ;;  %v3150_v11 = vmul.f32 0.1, %v2894_v39  ;;  %v5271_v10 = vld [vmem:[%s5587_s6 + $0x148] sm:$0xff]   ;;  %v5206_v7 = vunpack.c.h.bf16 %v5287_v56 }
 0x31b   : > { %3886 = vst.msk [vmem:[%s5607_s11 + $0x138] sm:$0xf] %vm3807_vm2, %v3757_v5 }
 0x31c   : > { %vm2990_vm12 = vcmp.ge.f32.partialorder %v2862_v17, 0.0  ;;  %v3118_v28 = vmul.f32 0.1, %v2862_v17  ;;  %v3278_v53 = vsel %vm3022_vm11, %v2894_v39, %v3150_v11 }
 0x31d   : > { %v3662_v50 = vadd.f32 %v5198_v51, %v3278_v53  ;;  %v2611_v34 = vpop.f32.mrf.mxu3 }
 0x31e   : > { %v3246_v20 = vsel %vm2990_vm12, %v2862_v17, %v3118_v28  ;;  %v2763_v22 = vadd.f32 %v2611_v34, %v1618_v40  ;;  %v5141_v40 = vunpack.c.l.bf16 %v5271_v10  ;;  %v6724_v34 = vld [vmem:[#allocation18_spill] sm:$0xff] }
 0x31f   : > { %v3630_v1 = vadd.f32 %v5134_v3, %v3246_v20  ;;  %v2531_v29 = vpop.f32.mrf.mxu2  ;;  %v3790_v30 = vpack.c.bf16 %v3662_v50, %v3662_v50  ;;  %v1160_v45 = vpop.f32.mrf.mxu0  ;;  %v6723_v50 = vld [vmem:[#allocation3_spill] sm:$0xff] }
 0x320   : > { %v2731_v0 = vadd.f32 %v2531_v29, %v1538_v16  ;;  %v2895_v52 = vadd.f32 %v6515_v46, %v2763_v22  ;;  %v1539_v44 = vpop.f32.mrf.mxu1  ;;  %v5205_v16 = vunpack.c.l.bf16 %v5287_v56 }
 0x321   : > { %v3758_v4 = vpack.c.bf16 %v3630_v1, %v3630_v1  ;;  %3919 = vst.msk [vmem:[%s5607_s11 + $0x1bc] sm:$0xf] %vm3807_vm2, %v3790_v30  ;;  %v1540_v27 = vadd.f32 %v1539_v44, %v1160_v45  ;;  %v1625_v1 = vadd.f32 %v6724_v34, %v6723_v50 }
 0x322   : > { %v2863_v61 = vadd.f32 %v6515_v46, %v2731_v0  ;;  %vm3023_vm13 = vcmp.ge.f32.partialorder %v2895_v52, 0.0  ;;  %v3151_v21 = vmul.f32 0.1, %v2895_v52 }
 0x323   : > { %3887 = vst.msk [vmem:[%s5607_s11 + $0x13c] sm:$0xf] %vm3807_vm2, %v3758_v4 }
 0x324   : > { %vm2991_vm14 = vcmp.ge.f32.partialorder %v2863_v61, 0.0  ;;  %v3119_v14 = vmul.f32 0.1, %v2863_v61  ;;  %v3279_v63 = vsel %vm3023_vm13, %v2895_v52, %v3151_v21 }
 0x325   : > { %v3663_v19 = vadd.f32 %v5201_v24, %v3279_v63  ;;  %v2613_v54 = vpop.f32.mrf.mxu3 }
 0x326   : > { %v3247_v2 = vsel %vm2991_vm14, %v2863_v61, %v3119_v14  ;;  %v2764_v49 = vadd.f32 %v2613_v54, %v1620_v26  ;;  %v5142_v26 = vunpack.c.h.bf16 %v5271_v10  ;;  %v6726_v54 = vld [vmem:[#allocation19_spill] sm:$0xff] }
 0x327   : > { %v3631_v47 = vadd.f32 %v5137_v6, %v3247_v2  ;;  %v2533_v55 = vpop.f32.mrf.mxu2  ;;  %v3791_v31 = vpack.c.bf16 %v3663_v19, %v3663_v19  ;;  %v1163_v35 = vpop.f32.mrf.mxu0 }
 0x328   : > { %v2732_v25 = vadd.f32 %v2533_v55, %v1540_v27  ;;  %v2896_v41 = vadd.f32 %v6515_v46, %v2764_v49  ;;  %v1542_v18 = vpop.f32.mrf.mxu1  ;;  %v6725_v27 = vld [vmem:[#allocation4_spill] sm:$0xff] }
 0x329   : > { %v3759_v32 = vpack.c.bf16 %v3631_v47, %v3631_v47  ;;  %3920 = vst.msk [vmem:[%s5607_s11 + $0x1c0] sm:$0xf] %vm3807_vm2, %v3791_v31  ;;  %v1543_v33 = vadd.f32 %v1542_v18, %v1163_v35  ;;  %v1628_v47 = vadd.f32 %v6726_v54, %v6725_v27  ;;  %v5288_v18 = vld [vmem:[%s5587_s6 + $0x1d0] sm:$0xff]  }
 0x32a   : > { %v2864_v15 = vadd.f32 %v6515_v46, %v2732_v25  ;;  %vm3024_vm15 = vcmp.ge.f32.partialorder %v2896_v41, 0.0  ;;  %v3152_v8 = vmul.f32 0.1, %v2896_v41  ;;  %v5210_v34 = vunpack.c.h.bf16 %v5288_v18 }
 0x32b   : > { %3888 = vst.msk [vmem:[%s5607_s11 + $0x140] sm:$0xf] %vm3807_vm2, %v3759_v32 }
 0x32c   : > { %vm2992_vm1 = vcmp.ge.f32.partialorder %v2864_v15, 0.0  ;;  %v3120_v38 = vmul.f32 0.1, %v2864_v15  ;;  %v3280_v42 = vsel %vm3024_vm15, %v2896_v41, %v3152_v8 }
 0x32d   : > { %v3664_v62 = vadd.f32 %v5202_v12, %v3280_v42  ;;  %v2616_v13 = vpop.f32.mrf.mxu3 }
 0x32e   : > { %v3248_v59 = vsel %vm2992_vm1, %v2864_v15, %v3120_v38  ;;  %v2765_v9 = vadd.f32 %v2616_v13, %v1623_v37  ;;  %v5209_v37 = vunpack.c.l.bf16 %v5288_v18  ;;  %v6727_v13 = vld [vmem:[#allocation5_spill] sm:$0xff] }
 0x32f   : > { %v3632_v23 = vadd.f32 %v5138_v57, %v3248_v59  ;;  %v2536_v48 = vpop.f32.mrf.mxu2  ;;  %v3792_v5 = vpack.c.bf16 %v3664_v62, %v3664_v62  ;;  %v1165_v17 = vpop.f32.mrf.mxu0  ;;  %v5272_v57 = vld [vmem:[%s5587_s6 + $0x150] sm:$0xff]  }
 0x330   : > { %v2733_v39 = vadd.f32 %v2536_v48, %v1543_v33  ;;  %v2897_v3 = vadd.f32 %v6515_v46, %v2765_v9  ;;  %v1544_v11 = vpop.f32.mrf.mxu1  ;;  %v5145_v42 = vunpack.c.l.bf16 %v5272_v57 }
 0x331   : > { %v3760_v51 = vpack.c.bf16 %v3632_v23, %v3632_v23  ;;  %3921 = vst.msk [vmem:[%s5607_s11 + $0x1c4] sm:$0xf] %vm3807_vm2, %v3792_v5  ;;  %v1545_v30 = vadd.f32 %v1544_v11, %v1165_v17  ;;  %v6728_v23 = vld [vmem:[#allocation20_spill] sm:$0xff] }
 0x332   : > { %v2865_v28 = vadd.f32 %v6515_v46, %v2733_v39  ;;  %vm3025_vm3 = vcmp.ge.f32.partialorder %v2897_v3, 0.0  ;;  %v3153_v53 = vmul.f32 0.1, %v2897_v3  ;;  %v1630_v48 = vadd.f32 %v6728_v23, %v6727_v13 }
 0x333   : > { %3889 = vst.msk [vmem:[%s5607_s11 + $0x144] sm:$0xf] %vm3807_vm2, %v3760_v51 }
 0x334   : > { %vm2993_vm4 = vcmp.ge.f32.partialorder %v2865_v28, 0.0  ;;  %v3121_v20 = vmul.f32 0.1, %v2865_v28  ;;  %v3281_v29 = vsel %vm3025_vm3, %v2897_v3, %v3153_v53 }
 0x335   : > { %v3665_v36 = vadd.f32 %v5205_v16, %v3281_v29  ;;  %v2618_v0 = vpop.f32.mrf.mxu3 }
 0x336   : > { %v3249_v22 = vsel %vm2993_vm4, %v2865_v28, %v3121_v20  ;;  %v2766_v4 = vadd.f32 %v2618_v0, %v1625_v1  ;;  %v5146_v1 = vunpack.c.h.bf16 %v5272_v57  ;;  %v6730_v0 = vld [vmem:[#allocation21_spill] sm:$0xff] }
 0x337   : > { %v3633_v60 = vadd.f32 %v5141_v40, %v3249_v22  ;;  %v2538_v45 = vpop.f32.mrf.mxu2  ;;  %v3793_v52 = vpack.c.bf16 %v3665_v36, %v3665_v36  ;;  %v1168_v61 = vpop.f32.mrf.mxu0 }
 0x338   : > { %v2734_v44 = vadd.f32 %v2538_v45, %v1545_v30  ;;  %v2898_v6 = vadd.f32 %v6515_v46, %v2766_v4  ;;  %v1547_v21 = vpop.f32.mrf.mxu1  ;;  %v6729_v30 = vld [vmem:[#allocation6_spill] sm:$0xff] }
 0x339   : > { %v3761_v24 = vpack.c.bf16 %v3633_v60, %v3633_v60  ;;  %3922 = vst.msk [vmem:[%s5607_s11 + $0x1c8] sm:$0xf] %vm3807_vm2, %v3793_v52  ;;  %v1548_v19 = vadd.f32 %v1547_v21, %v1168_v61  ;;  %v1633_v60 = vadd.f32 %v6730_v0, %v6729_v30  ;;  %v5289_v21 = vld [vmem:[%s5587_s6 + $0x1d8] sm:$0xff]  }
 0x33a   : > { %v2866_v14 = vadd.f32 %v6515_v46, %v2734_v44  ;;  %vm3026_vm5 = vcmp.ge.f32.partialorder %v2898_v6, 0.0  ;;  %v3154_v63 = vmul.f32 0.1, %v2898_v6  ;;  %v5214_v23 = vunpack.c.h.bf16 %v5289_v21 }
 0x33b   : > { %3890 = vst.msk [vmem:[%s5607_s11 + $0x148] sm:$0xf] %vm3807_vm2, %v3761_v24 }
 0x33c   : > { %vm2994_vm6 = vcmp.ge.f32.partialorder %v2866_v14, 0.0  ;;  %v3122_v2 = vmul.f32 0.1, %v2866_v14  ;;  %v3282_v55 = vsel %vm3026_vm5, %v2898_v6, %v3154_v63 }
 0x33d   : > { %v3666_v31 = vadd.f32 %v5206_v7, %v3282_v55  ;;  %v2621_v25 = vpop.f32.mrf.mxu3 }
 0x33e   : > { %v3250_v49 = vsel %vm2994_vm6, %v2866_v14, %v3122_v2  ;;  %v2767_v41 = vadd.f32 %v2621_v25, %v1628_v47  ;;  %v5213_v47 = vunpack.c.l.bf16 %v5289_v21  ;;  %v6731_v25 = vld [vmem:[#allocation7_spill] sm:$0xff] }
 0x33f   : > { %v3634_v35 = vadd.f32 %v5142_v26, %v3250_v49  ;;  %v2541_v32 = vpop.f32.mrf.mxu2  ;;  %v3794_v15 = vpack.c.bf16 %v3666_v31, %v3666_v31  ;;  %v1170_v8 = vpop.f32.mrf.mxu0  ;;  %v5273_v26 = vld [vmem:[%s5587_s6 + $0x158] sm:$0xff]  }
 0x340   : > { %v2735_v12 = vadd.f32 %v2541_v32, %v1548_v19  ;;  %v2899_v33 = vadd.f32 %v6515_v46, %v2767_v41  ;;  %v1549_v58 = vpop.f32.mrf.mxu1  ;;  %v5149_v55 = vunpack.c.l.bf16 %v5273_v26 }
 0x341   : > { %v3762_v38 = vpack.c.bf16 %v3634_v35, %v3634_v35  ;;  %3923 = vst.msk [vmem:[%s5607_s11 + $0x1cc] sm:$0xf] %vm3807_vm2, %v3794_v15  ;;  %v1550_v39 = vadd.f32 %v1549_v58, %v1170_v8  ;;  %v6732_v35 = vld [vmem:[#allocation22_spill] sm:$0xff] }
 0x342   : > { %v2867_v43 = vadd.f32 %v6515_v46, %v2735_v12  ;;  %vm3027_vm7 = vcmp.ge.f32.partialorder %v2899_v33, 0.0  ;;  %v3155_v59 = vmul.f32 0.1, %v2899_v33  ;;  %v1635_v32 = vadd.f32 %v6732_v35, %v6731_v25 }
 0x343   : > { %3891 = vst.msk [vmem:[%s5607_s11 + $0x14c] sm:$0xf] %vm3807_vm2, %v3762_v38 }
 0x344   : > { %vm2995_vm8 = vcmp.ge.f32.partialorder %v2867_v43, 0.0  ;;  %v3123_v62 = vmul.f32 0.1, %v2867_v43  ;;  %v3283_v9 = vsel %vm3027_vm7, %v2899_v33, %v3155_v59 }
 0x345   : > { %v3667_v5 = vadd.f32 %v5209_v37, %v3283_v9  ;;  %v2623_v10 = vpop.f32.mrf.mxu3 }
 0x346   : > { %v3251_v56 = vsel %vm2995_vm8, %v2867_v43, %v3123_v62  ;;  %v2768_v3 = vadd.f32 %v2623_v10, %v1630_v48  ;;  %v5150_v48 = vunpack.c.h.bf16 %v5273_v26  ;;  %v6734_v10 = vld [vmem:[#allocation23_spill] sm:$0xff] }
 0x347   : > { %v3635_v17 = vadd.f32 %v5145_v42, %v3251_v56  ;;  %v2543_v51 = vpop.f32.mrf.mxu2  ;;  %v3795_v11 = vpack.c.bf16 %v3667_v5, %v3667_v5  ;;  %v1173_v16 = vpop.f32.mrf.mxu0 }
 0x348   : > { %v2736_v28 = vadd.f32 %v2543_v51, %v1550_v39  ;;  %v2900_v53 = vadd.f32 %v6515_v46, %v2768_v3  ;;  %v1552_v20 = vpop.f32.mrf.mxu1  ;;  %v6733_v39 = vld [vmem:[#allocation8_spill] sm:$0xff] }
 0x349   : > { %v3763_v40 = vpack.c.bf16 %v3635_v17, %v3635_v17  ;;  %3924 = vst.msk [vmem:[%s5607_s11 + $0x1d0] sm:$0xf] %vm3807_vm2, %v3795_v11  ;;  %v1553_v36 = vadd.f32 %v1552_v20, %v1173_v16  ;;  %v1638_v17 = vadd.f32 %v6734_v10, %v6733_v39  ;;  %v5290_v20 = vld [vmem:[%s5587_s6 + $0x1e0] sm:$0xff]  }
 0x34a   : > { %v2868_v50 = vadd.f32 %v6515_v46, %v2736_v28  ;;  %vm3028_vm9 = vcmp.ge.f32.partialorder %v2900_v53, 0.0  ;;  %v3156_v29 = vmul.f32 0.1, %v2900_v53  ;;  %v5218_v35 = vunpack.c.h.bf16 %v5290_v20 }
 0x34b   : > { %3892 = vst.msk [vmem:[%s5607_s11 + $0x150] sm:$0xf] %vm3807_vm2, %v3763_v40 }
 0x34c   : > { %vm2996_vm0 = vcmp.ge.f32.partialorder %v2868_v50, 0.0  ;;  %v3124_v22 = vmul.f32 0.1, %v2868_v50  ;;  %v3284_v45 = vsel %vm3028_vm9, %v2900_v53, %v3156_v29 }
 0x34d   : > { %v3668_v52 = vadd.f32 %v5210_v34, %v3284_v45  ;;  %v2626_v44 = vpop.f32.mrf.mxu3 }
 0x34e   : > { %v3252_v4 = vsel %vm2996_vm0, %v2868_v50, %v3124_v22  ;;  %v2769_v6 = vadd.f32 %v2626_v44, %v1633_v60  ;;  %v5217_v60 = vunpack.c.l.bf16 %v5290_v20  ;;  %v6735_v44 = vld [vmem:[#allocation9_spill] sm:$0xff] }
 0x34f   : > { %v3636_v61 = vadd.f32 %v5146_v1, %v3252_v4  ;;  %v2546_v24 = vpop.f32.mrf.mxu2  ;;  %v3796_v14 = vpack.c.bf16 %v3668_v52, %v3668_v52  ;;  %v1175_v63 = vpop.f32.mrf.mxu0  ;;  %v5274_v1 = vld [vmem:[%s5587_s6 + $0x160] sm:$0xff]  }
 0x350   : > { %v2737_v7 = vadd.f32 %v2546_v24, %v1553_v36  ;;  %v2901_v19 = vadd.f32 %v6515_v46, %v2769_v6  ;;  %v1554_v27 = vpop.f32.mrf.mxu1  ;;  %v5153_v45 = vunpack.c.l.bf16 %v5274_v1 }
 0x351   : > { %v3764_v2 = vpack.c.bf16 %v3636_v61, %v3636_v61  ;;  %3925 = vst.msk [vmem:[%s5607_s11 + $0x1d4] sm:$0xf] %vm3807_vm2, %v3796_v14  ;;  %v1555_v12 = vadd.f32 %v1554_v27, %v1175_v63  ;;  %v6736_v61 = vld [vmem:[#allocation24_spill] sm:$0xff] }
 0x352   : > { %v2869_v54 = vadd.f32 %v6515_v46, %v2737_v7  ;;  %vm3029_vm10 = vcmp.ge.f32.partialorder %v2901_v19, 0.0  ;;  %v3157_v49 = vmul.f32 0.1, %v2901_v19  ;;  %v1640_v24 = vadd.f32 %v6736_v61, %v6735_v44 }
 0x353   : > { %3893 = vst.msk [vmem:[%s5607_s11 + $0x154] sm:$0xf] %vm3807_vm2, %v3764_v2 }
 0x354   : > { %vm2997_vm11 = vcmp.ge.f32.partialorder %v2869_v54, 0.0  ;;  %v3125_v31 = vmul.f32 0.1, %v2869_v54  ;;  %v3285_v41 = vsel %vm3029_vm10, %v2901_v19, %v3157_v49 }
 0x355   : > { %v3669_v15 = vadd.f32 %v5213_v47, %v3285_v41  ;;  %v2628_v57 = vpop.f32.mrf.mxu3 }
 0x356   : > { %v3253_v18 = vsel %vm2997_vm11, %v2869_v54, %v3125_v31  ;;  %v2770_v33 = vadd.f32 %v2628_v57, %v1635_v32  ;;  %v5154_v32 = vunpack.c.h.bf16 %v5274_v1  ;;  %v6738_v57 = vld [vmem:[#allocation25_spill] sm:$0xff] }
 0x357   : > { %v3637_v8 = vadd.f32 %v5149_v55, %v3253_v18  ;;  %v2548_v38 = vpop.f32.mrf.mxu2  ;;  %v3797_v58 = vpack.c.bf16 %v3669_v15, %v3669_v15  ;;  %v1178_v37 = vpop.f32.mrf.mxu0 }
 0x358   : > { %v2738_v43 = vadd.f32 %v2548_v38, %v1555_v12  ;;  %v2902_v59 = vadd.f32 %v6515_v46, %v2770_v33  ;;  %v1557_v62 = vpop.f32.mrf.mxu1  ;;  %v6737_v12 = vld [vmem:[#allocation10_spill] sm:$0xff] }
 0x359   : > { %v3765_v42 = vpack.c.bf16 %v3637_v8, %v3637_v8  ;;  %3926 = vst.msk [vmem:[%s5607_s11 + $0x1d8] sm:$0xf] %vm3807_vm2, %v3797_v58  ;;  %v1558_v5 = vadd.f32 %v1557_v62, %v1178_v37  ;;  %v1643_v8 = vadd.f32 %v6738_v57, %v6737_v12  ;;  %v5291_v62 = vld [vmem:[%s5587_s6 + $0x1e8] sm:$0xff]  }
 0x35a   : > { %v2870_v13 = vadd.f32 %v6515_v46, %v2738_v43  ;;  %vm3030_vm12 = vcmp.ge.f32.partialorder %v2902_v59, 0.0  ;;  %v3158_v9 = vmul.f32 0.1, %v2902_v59  ;;  %v5222_v61 = vunpack.c.h.bf16 %v5291_v62 }
 0x35b   : > { %3894 = vst.msk [vmem:[%s5607_s11 + $0x158] sm:$0xf] %vm3807_vm2, %v3765_v42 }
 0x35c   : > { %vm2998_vm13 = vcmp.ge.f32.partialorder %v2870_v13, 0.0  ;;  %v3126_v56 = vmul.f32 0.1, %v2870_v13  ;;  %v3286_v51 = vsel %vm3030_vm12, %v2902_v59, %v3158_v9 }
 0x35d   : > { %v3670_v11 = vadd.f32 %v5214_v23, %v3286_v51  ;;  %v2631_v28 = vpop.f32.mrf.mxu3 }
 0x35e   : > { %v3254_v3 = vsel %vm2998_vm13, %v2870_v13, %v3126_v56  ;;  %v2771_v53 = vadd.f32 %v2631_v28, %v1638_v17  ;;  %v5221_v17 = vunpack.c.l.bf16 %v5291_v62  ;;  %v6739_v28 = vld [vmem:[#allocation11_spill] sm:$0xff] }
 0x35f   : > { %v3638_v16 = vadd.f32 %v5150_v48, %v3254_v3  ;;  %v2551_v40 = vpop.f32.mrf.mxu2  ;;  %v3798_v50 = vpack.c.bf16 %v3670_v11, %v3670_v11  ;;  %v1180_v29 = vpop.f32.mrf.mxu0  ;;  %v5275_v48 = vld [vmem:[%s5587_s6 + $0x168] sm:$0xff]  }
 0x360   : > { %v2739_v34 = vadd.f32 %v2551_v40, %v1558_v5  ;;  %v2903_v36 = vadd.f32 %v6515_v46, %v2771_v53  ;;  %v1559_v30 = vpop.f32.mrf.mxu1  ;;  %v5157_v51 = vunpack.c.l.bf16 %v5275_v48 }
 0x361   : > { %v3766_v22 = vpack.c.bf16 %v3638_v16, %v3638_v16  ;;  %3927 = vst.msk [vmem:[%s5607_s11 + $0x1dc] sm:$0xf] %vm3807_vm2, %v3798_v50  ;;  %v1560_v7 = vadd.f32 %v1559_v30, %v1180_v29  ;;  %v6740_v16 = vld [vmem:[#allocation26_spill] sm:$0xff] }
 0x362   : > { %v2871_v0 = vadd.f32 %v6515_v46, %v2739_v34  ;;  %vm3031_vm14 = vcmp.ge.f32.partialorder %v2903_v36, 0.0  ;;  %v3159_v4 = vmul.f32 0.1, %v2903_v36  ;;  %v1645_v40 = vadd.f32 %v6740_v16, %v6739_v28 }
 0x363   : > { %3895 = vst.msk [vmem:[%s5607_s11 + $0x15c] sm:$0xf] %vm3807_vm2, %v3766_v22 }
 0x364   : > { %vm2999_vm15 = vcmp.ge.f32.partialorder %v2871_v0, 0.0  ;;  %v3127_v52 = vmul.f32 0.1, %v2871_v0  ;;  %v3287_v6 = vsel %vm3031_vm14, %v2903_v36, %v3159_v4 }
 0x365   : > { %v3671_v14 = vadd.f32 %v5217_v60, %v3287_v6  ;;  %v2633_v26 = vpop.f32.mrf.mxu3 }
 0x366   : > { %v3255_v21 = vsel %vm2999_vm15, %v2871_v0, %v3127_v52  ;;  %v2772_v19 = vadd.f32 %v2633_v26, %v1640_v24  ;;  %v5158_v24 = vunpack.c.h.bf16 %v5275_v48  ;;  %v6742_v26 = vld [vmem:[#allocation27_spill] sm:$0xff] }
 0x367   : > { %v3639_v63 = vadd.f32 %v5153_v45, %v3255_v21  ;;  %v2553_v2 = vpop.f32.mrf.mxu2  ;;  %v3799_v27 = vpack.c.bf16 %v3671_v14, %v3671_v14  ;;  %v1183_v47 = vpop.f32.mrf.mxu0 }
 0x368   : > { %v2740_v54 = vadd.f32 %v2553_v2, %v1560_v7  ;;  %v2904_v49 = vadd.f32 %v6515_v46, %v2772_v19  ;;  %v1562_v31 = vpop.f32.mrf.mxu1  ;;  %v6741_v7 = vld [vmem:[#allocation12_spill] sm:$0xff] }
 0x369   : > { %v3767_v55 = vpack.c.bf16 %v3639_v63, %v3639_v63  ;;  %3928 = vst.msk [vmem:[%s5607_s11 + $0x1e0] sm:$0xf] %vm3807_vm2, %v3799_v27  ;;  %v1563_v15 = vadd.f32 %v1562_v31, %v1183_v47  ;;  %v1648_v63 = vadd.f32 %v6742_v26, %v6741_v7  ;;  %v5292_v31 = vld [vmem:[%s5587_s6 + $0x1f0] sm:$0xff]  }
 0x36a   : > { %v2872_v25 = vadd.f32 %v6515_v46, %v2740_v54  ;;  %vm3032_vm1 = vcmp.ge.f32.partialorder %v2904_v49, 0.0  ;;  %v3160_v41 = vmul.f32 0.1, %v2904_v49  ;;  %v5226_v16 = vunpack.c.h.bf16 %v5292_v31 }
 0x36b   : > { %3896 = vst.msk [vmem:[%s5607_s11 + $0x160] sm:$0xf] %vm3807_vm2, %v3767_v55 }
 0x36c   : > { %vm3000_vm3 = vcmp.ge.f32.partialorder %v2872_v25, 0.0  ;;  %v3128_v18 = vmul.f32 0.1, %v2872_v25  ;;  %v3288_v38 = vsel %vm3032_vm1, %v2904_v49, %v3160_v41 }
 0x36d   : > { %v3672_v58 = vadd.f32 %v5218_v35, %v3288_v38  ;;  %v2636_v43 = vpop.f32.mrf.mxu3 }
 0x36e   : > { %v3256_v33 = vsel %vm3000_vm3, %v2872_v25, %v3128_v18  ;;  %v2773_v59 = vadd.f32 %v2636_v43, %v1643_v8  ;;  %v5225_v8 = vunpack.c.l.bf16 %v5292_v31  ;;  %v6743_v43 = vld [vmem:[#allocation13_spill] sm:$0xff] }
 0x36f   : > { %v3640_v37 = vadd.f32 %v5154_v32, %v3256_v33  ;;  %v2556_v42 = vpop.f32.mrf.mxu2  ;;  %v3800_v13 = vpack.c.bf16 %v3672_v58, %v3672_v58  ;;  %v1185_v9 = vpop.f32.mrf.mxu0  ;;  %v5276_v32 = vld [vmem:[%s5587_s6 + $0x170] sm:$0xff]  }
 0x370   : > { %v2741_v23 = vadd.f32 %v2556_v42, %v1563_v15  ;;  %v2905_v5 = vadd.f32 %v6515_v46, %v2773_v59  ;;  %v1564_v39 = vpop.f32.mrf.mxu1  ;;  %v5161_v38 = vunpack.c.l.bf16 %v5276_v32 }
 0x371   : > { %v3768_v56 = vpack.c.bf16 %v3640_v37, %v3640_v37  ;;  %3929 = vst.msk [vmem:[%s5607_s11 + $0x1e4] sm:$0xf] %vm3807_vm2, %v3800_v13  ;;  %v1565_v34 = vadd.f32 %v1564_v39, %v1185_v9  ;;  %v6744_v37 = vld [vmem:[#allocation28_spill] sm:$0xff] }
 0x372   : > { %v2873_v10 = vadd.f32 %v6515_v46, %v2741_v23  ;;  %vm3033_vm4 = vcmp.ge.f32.partialorder %v2905_v5, 0.0  ;;  %v3161_v3 = vmul.f32 0.1, %v2905_v5  ;;  %v1650_v42 = vadd.f32 %v6744_v37, %v6743_v43 }
 0x373   : > { %3897 = vst.msk [vmem:[%s5607_s11 + $0x164] sm:$0xf] %vm3807_vm2, %v3768_v56 }
 0x374   : > { %vm3001_vm5 = vcmp.ge.f32.partialorder %v2873_v10, 0.0  ;;  %v3129_v11 = vmul.f32 0.1, %v2873_v10  ;;  %v3289_v53 = vsel %vm3033_vm4, %v2905_v5, %v3161_v3 }
 0x375   : > { %v3673_v50 = vadd.f32 %v5221_v17, %v3289_v53  ;;  %v2638_v1 = vpop.f32.mrf.mxu3 }
 0x376   : > { %v3257_v20 = vsel %vm3001_vm5, %v2873_v10, %v3129_v11  ;;  %v2774_v36 = vadd.f32 %v2638_v1, %v1645_v40  ;;  %v5162_v40 = vunpack.c.h.bf16 %v5276_v32  ;;  %v6746_v1 = vld [vmem:[#allocation29_spill] sm:$0xff] }
 0x377   : > { %v3641_v29 = vadd.f32 %v5157_v51, %v3257_v20  ;;  %v2558_v22 = vpop.f32.mrf.mxu2  ;;  %v3801_v30 = vpack.c.bf16 %v3673_v50, %v3673_v50  ;;  %v1188_v60 = vpop.f32.mrf.mxu0 }
 0x378   : > { %v2742_v0 = vadd.f32 %v2558_v22, %v1565_v34  ;;  %v2906_v4 = vadd.f32 %v6515_v46, %v2774_v36  ;;  %v1567_v52 = vpop.f32.mrf.mxu1  ;;  %v6745_v34 = vld [vmem:[#allocation14_spill] sm:$0xff] }
 0x379   : > { %v3769_v45 = vpack.c.bf16 %v3641_v29, %v3641_v29  ;;  %3930 = vst.msk [vmem:[%s5607_s11 + $0x1e8] sm:$0xf] %vm3807_vm2, %v3801_v30  ;;  %v1568_v14 = vadd.f32 %v1567_v52, %v1188_v60  ;;  %v1653_v29 = vadd.f32 %v6746_v1, %v6745_v34  ;;  %v5293_v52 = vld [vmem:[%s5587_s6 + $0x1f8] sm:$0xff]  }
 0x37a   : > { %v2874_v44 = vadd.f32 %v6515_v46, %v2742_v0  ;;  %vm3034_vm6 = vcmp.ge.f32.partialorder %v2906_v4, 0.0  ;;  %v3162_v6 = vmul.f32 0.1, %v2906_v4  ;;  %v5229_v7 = vunpack.c.l.bf16 %v5293_v52 }
 0x37b   : > { %3898 = vst.msk [vmem:[%s5607_s11 + $0x168] sm:$0xf] %vm3807_vm2, %v3769_v45 }
 0x37c   : > { %vm3002_vm7 = vcmp.ge.f32.partialorder %v2874_v44, 0.0  ;;  %v3130_v21 = vmul.f32 0.1, %v2874_v44  ;;  %v3290_v2 = vsel %vm3034_vm6, %v2906_v4, %v3162_v6 }
 0x37d   : > { %v3674_v27 = vadd.f32 %v5222_v61, %v3290_v2  ;;  %v2641_v54 = vpop.f32.mrf.mxu3 }
 0x37e   : > { %v3258_v19 = vsel %vm3002_vm7, %v2874_v44, %v3130_v21  ;;  %v2775_v49 = vadd.f32 %v2641_v54, %v1648_v63  ;;  %v6747_v54 = vld [vmem:[#allocation15_spill] sm:$0xff] }
 0x37f   : > { %v3642_v47 = vadd.f32 %v5158_v24, %v3258_v19  ;;  %v2561_v55 = vpop.f32.mrf.mxu2  ;;  %v3802_v25 = vpack.c.bf16 %v3674_v27, %v3674_v27  ;;  %v1190_v41 = vpop.f32.mrf.mxu0  ;;  %v5277_v24 = vld [vmem:[%s5587_s6 + $0x178] sm:$0xff]  }
 0x380   : > { %v2743_v35 = vadd.f32 %v2561_v55, %v1568_v14  ;;  %v2907_v15 = vadd.f32 %v6515_v46, %v2775_v49  ;;  %v1569_v12 = vpop.f32.mrf.mxu1  ;;  %v5165_v26 = vunpack.c.l.bf16 %v5277_v24  ;;  %v5166_v43 = vunpack.c.h.bf16 %v5277_v24 }
 0x381   : > { %v3770_v18 = vpack.c.bf16 %v3642_v47, %v3642_v47  ;;  %3931 = vst.msk [vmem:[%s5607_s11 + $0x1ec] sm:$0xf] %vm3807_vm2, %v3802_v25  ;;  %v1570_v23 = vadd.f32 %v1569_v12, %v1190_v41  ;;  %v6748_v47 = vld [vmem:[#allocation30_spill] sm:$0xff] }
 0x382   : > { %v2875_v57 = vadd.f32 %v6515_v46, %v2743_v35  ;;  %vm3035_vm8 = vcmp.ge.f32.partialorder %v2907_v15, 0.0  ;;  %v3163_v33 = vmul.f32 0.1, %v2907_v15  ;;  %v1655_v55 = vadd.f32 %v6748_v47, %v6747_v54 }
 0x383   : > { %3899 = vst.msk [vmem:[%s5607_s11 + $0x16c] sm:$0xf] %vm3807_vm2, %v3770_v18 }
 0x384   : > { %vm3003_vm9 = vcmp.ge.f32.partialorder %v2875_v57, 0.0  ;;  %v3131_v58 = vmul.f32 0.1, %v2875_v57  ;;  %v3291_v59 = vsel %vm3035_vm8, %v2907_v15, %v3163_v33 }
 0x385   : > { %v3675_v13 = vadd.f32 %v5225_v8, %v3291_v59  ;;  %v2643_v48 = vpop.f32.mrf.mxu3 }
 0x386   : > { %v3259_v62 = vsel %vm3003_vm9, %v2875_v57, %v3131_v58  ;;  %v2776_v5 = vadd.f32 %v2643_v48, %v1650_v42  ;;  %v5230_v58 = vunpack.c.h.bf16 %v5293_v52 }
 0x387   : > { %v3643_v9 = vadd.f32 %v5161_v38, %v3259_v62  ;;  %v2563_v56 = vpop.f32.mrf.mxu2  ;;  %v3803_v39 = vpack.c.bf16 %v3675_v13, %v3675_v13  ;;  %v1193_v3 = vpop.f32.mrf.mxu0 }
 0x388   : > { %v2744_v10 = vadd.f32 %v2563_v56, %v1570_v23  ;;  %v2908_v51 = vadd.f32 %v6515_v46, %v2776_v5  ;;  %v1572_v11 = vpop.f32.mrf.mxu1 }
 0x389   : > { %v3771_v17 = vpack.c.bf16 %v3643_v9, %v3643_v9  ;;  %3932 = vst.msk [vmem:[%s5607_s11 + $0x1f0] sm:$0xf] %vm3807_vm2, %v3803_v39  ;;  %v1573_v50 = vadd.f32 %v1572_v11, %v1193_v3 }
 0x38a   : > { %v2876_v28 = vadd.f32 %v6515_v46, %v2744_v10  ;;  %vm3036_vm0 = vcmp.ge.f32.partialorder %v2908_v51, 0.0  ;;  %v3164_v53 = vmul.f32 0.1, %v2908_v51 }
 0x38b   : > { %3900 = vst.msk [vmem:[%s5607_s11 + $0x170] sm:$0xf] %vm3807_vm2, %v3771_v17 }
 0x38c   : > { %vm3004_vm10 = vcmp.ge.f32.partialorder %v2876_v28, 0.0  ;;  %v3132_v20 = vmul.f32 0.1, %v2876_v28  ;;  %v3292_v22 = vsel %vm3036_vm0, %v2908_v51, %v3164_v53 }
 0x38d   : > { %v3676_v30 = vadd.f32 %v5226_v16, %v3292_v22  ;;  %v2646_v0 = vpop.f32.mrf.mxu3 }
 0x38e   : > { %v3260_v36 = vsel %vm3004_vm10, %v2876_v28, %v3132_v20  ;;  %v2777_v4 = vadd.f32 %v2646_v0, %v1653_v29 }
 0x38f   : > { %v3644_v60 = vadd.f32 %v5162_v40, %v3260_v36  ;;  %v2566_v45 = vpop.f32.mrf.mxu2  ;;  %v3804_v44 = vpack.c.bf16 %v3676_v30, %v3676_v30  ;;  %v1195_v2 = vpop.f32.mrf.mxu0 }
 0x390   : > { %v2745_v61 = vadd.f32 %v2566_v45, %v1573_v50  ;;  %v2909_v21 = vadd.f32 %v6515_v46, %v2777_v4  ;;  %v1574_v19 = vpop.f32.mrf.mxu1 }
 0x391   : > { %v3772_v6 = vpack.c.bf16 %v3644_v60, %v3644_v60  ;;  %3933 = vst.msk [vmem:[%s5607_s11 + $0x1f4] sm:$0xf] %vm3807_vm2, %v3804_v44  ;;  %v1575_v35 = vadd.f32 %v1574_v19, %v1195_v2 }
 0x392   : > { %v2877_v14 = vadd.f32 %v6515_v46, %v2745_v61  ;;  %vm3037_vm11 = vcmp.ge.f32.partialorder %v2909_v21, 0.0  ;;  %v3165_v63 = vmul.f32 0.1, %v2909_v21 }
 0x393   : > { %3901 = vst.msk [vmem:[%s5607_s11 + $0x174] sm:$0xf] %vm3807_vm2, %v3772_v6 }
 0x394   : > { %vm3005_vm12 = vcmp.ge.f32.partialorder %v2877_v14, 0.0  ;;  %v3133_v27 = vmul.f32 0.1, %v2877_v14  ;;  %v3293_v49 = vsel %vm3037_vm11, %v2909_v21, %v3165_v63 }
 0x395   : > { %v3677_v25 = vadd.f32 %v5229_v7, %v3293_v49  ;;  %v2648_v32 = vpop.f32.mrf.mxu3 }
 0x396   : > { %v3261_v31 = vsel %vm3005_vm12, %v2877_v14, %v3133_v27  ;;  %v2778_v15 = vadd.f32 %v2648_v32, %v1655_v55 }
 0x397   : > { %v3645_v41 = vadd.f32 %v5165_v26, %v3261_v31  ;;  %v2568_v18 = vpop.f32.mrf.mxu2  ;;  %v3805_v12 = vpack.c.bf16 %v3677_v25, %v3677_v25 }
 0x398   : > { %v2746_v57 = vadd.f32 %v2568_v18, %v1575_v35  ;;  %v2910_v38 = vadd.f32 %v6515_v46, %v2778_v15 }
 0x399   : > { %v3773_v8 = vpack.c.bf16 %v3645_v41, %v3645_v41  ;;  %3934 = vst.msk [vmem:[%s5607_s11 + $0x1f8] sm:$0xf] %vm3807_vm2, %v3805_v12 }
 0x39a   : > { %v2878_v33 = vadd.f32 %v6515_v46, %v2746_v57  ;;  %vm3038_vm13 = vcmp.ge.f32.partialorder %v2910_v38, 0.0  ;;  %v3166_v37 = vmul.f32 0.1, %v2910_v38 }
 0x39b   : > { %3902 = vst.msk [vmem:[%s5607_s11 + $0x178] sm:$0xf] %vm3807_vm2, %v3773_v8 }
 0x39c   : > { %vm3006_vm14 = vcmp.ge.f32.partialorder %v2878_v33, 0.0  ;;  %v3134_v42 = vmul.f32 0.1, %v2878_v33  ;;  %v3294_v59 = vsel %vm3038_vm13, %v2910_v38, %v3166_v37 }
 0x39d   : > { %v3678_v13 = vadd.f32 %v5230_v58, %v3294_v59 }
 0x39e   : > { %v3262_v62 = vsel %vm3006_vm14, %v2878_v33, %v3134_v42 }
 0x39f   : > { %v3646_v23 = vadd.f32 %v5166_v43, %v3262_v62  ;;  %v3806_v48 = vpack.c.bf16 %v3678_v13, %v3678_v13 }
 0x3a1   : > { %v3774_v9 = vpack.c.bf16 %v3646_v23, %v3646_v23  ;;  %3935 = vst.msk [vmem:[%s5607_s11 + $0x1fc] sm:$0xf] %vm3807_vm2, %v3806_v48 }
 0x3a3   : > { %3903 = vst.msk [vmem:[%s5607_s11 + $0x17c] sm:$0xf] %vm3807_vm2, %v3774_v9 }
 0x3a4 PF: > { %s14_s19 = sadd.s32 1, %s5402_s19   ;;  %s6749_s15 = smov %s5394_s17 }
 0x3a5   : > { %p11_p7 = scmp.ge.s32.totalorder %s14_s19, 10   ;;  %s6750_s16 = smov %s5398_s18 }
 0x3a6   : > { %s6751_s17 = smov %s6754_s20  ;;  %s6752_s18 = smov %s6758_s21 }
 0x3a7   :  { %13 = sbr.rel (!%p11_p7) target bundleno = 3 (0x3), region = 71 }

</bundles_post_ra>
